<compile_context>
chip_gen: v7x
topology: tpu7x:2x2x1
jax: 0.10.0
libtpu: 0.0.40
codegen_flags: <defaults>
</compile_context>

<pallas_src>
import math
from functools import partial

import numpy as np
import jax
import jax.numpy as jnp
from jax.experimental import pallas as pl
from jax.experimental.pallas import tpu as pltpu


# ---------------------------------------------------------------------------
# Host-side constants: boundary / selection masks for roll-based 3x3 taps.
#   m1  : taps on the full HxW grid            (zero pad at image border)
#   m2  : stride-2 taps, valid only on even/even ("selected") lanes
#   neg2: additive -BIG where a stride-2 tap is outside the image (maxpool)
#   m3  : stride-1 taps on the (H/2)x(W/2) grid, sparsely embedded
#   avg : (L, Nc) matrix averaging the 64 selected lanes of each image
# ---------------------------------------------------------------------------
def build_masks(H=16, W=16, n_per_block=1, big=1e30):
    S = H * W
    L = n_per_block * S
    H2, W2 = H // 2, W // 2
    m1 = np.zeros((9, 1, L), np.float32)
    m2 = np.zeros((9, 1, L), np.float32)
    neg2 = np.zeros((9, 1, L), np.float32)
    m3 = np.zeros((9, 1, L), np.float32)
    avg = np.zeros((L, n_per_block), np.float32)
    for n in range(n_per_block):
        for i in range(H):
            for j in range(W):
                q = n * S + i * W + j
                sel = (i % 2 == 0) and (j % 2 == 0)
                if sel:
                    avg[q, n] = 1.0 / (H2 * W2)
                for t in range(9):
                    di, dj = t // 3 - 1, t % 3 - 1
                    inside = (0 <= i + di < H) and (0 <= j + dj < W)
                    if inside:
                        m1[t, 0, q] = 1.0
                    if sel:
                        if inside:
                            m2[t, 0, q] = 1.0
                        else:
                            neg2[t, 0, q] = -big
                        if (0 <= i // 2 + di < H2) and (0 <= j // 2 + dj < W2):
                            m3[t, 0, q] = 1.0
    return {"m1": jnp.asarray(m1), "m2": jnp.asarray(m2),
            "neg2": jnp.asarray(neg2), "m3": jnp.asarray(m3),
            "avg": jnp.asarray(avg)}


# ---------------------------------------------------------------------------
# Fused forward kernel (one program = n_per_block images).
# Activation layout: rows = channels (sublanes), cols = image*S + h*W + w.
# ---------------------------------------------------------------------------
def make_kernel(H, W, n_per_block):
    S = H * W
    L = n_per_block * S
    offs = [(t // 3 - 1) * W + (t % 3 - 1) for t in range(9)]
    sh_full = [(-o) % L for o in offs]        # taps on the HxW grid
    sh_half = [(-2 * o) % L for o in offs]    # taps on the sparse (H/2)x(W/2) grid
    f32 = jnp.float32

    def mm(a, b):
        return jnp.dot(a, b, preferred_element_type=f32)

    def rolled(x, s):
        return x if s == 0 else pltpu.roll(x, s, 1)

    def taps(x, shifts, mask_ref):
        # 9 shifted copies: XLU roll + 0/1 boundary mask (no MXU work).
        return [rolled(x, shifts[t]) * mask_ref[t] for t in range(9)]

    def conv3x3(x, w_ref, shifts, mask_ref):
        # Fuse the 9 tap matmuls into one: K = 9*Cin.
        stacked = jnp.concatenate(taps(x, shifts, mask_ref), axis=0)   # (9*Cin, L)
        return mm(w_ref[...], stacked)

    def dwconv(ts, w, b):
        # depthwise 3x3: w (C, 9) tap weights, b (C, 1) bias  (VPU FMAs only)
        acc = b + w[:, 0:1] * ts[0]
        for t in range(1, 9):
            acc = acc + w[:, t:t + 1] * ts[t]
        return acc

    def bn_relu(x, n_ref):
        return jnp.maximum(x * n_ref[0] + n_ref[1], 0.0)

    def kernel(x_ref, m1_ref, m2_ref, neg2_ref, m3_ref, avg_ref,
               wi_ref, b1n1_ref, b1w1_ref, b1n2_ref, b1w2_ref,
               trn_ref, trw_ref,
               mg_ref, mb_ref, pc_ref, pb_ref, pg_ref, gb_ref,
               b2n1_ref, b2w1_ref, b2n2_ref, b2w2_ref,
               nln_ref, wc_ref, bc_ref,
               out_ref):
        # ---- init conv: 3 -> 8 @ HxW --------------------------------------
        a1 = conv3x3(x_ref[...], wi_ref, sh_full, m1_ref)              # (8, L)

        # ---- dense block 1 / layer 1: 8 -> (+4) ---------------------------
        h = bn_relu(a1, b1n1_ref)
        h = mm(b1w1_ref[...], h)                                       # 1x1
        h = bn_relu(h, b1n2_ref)
        new1 = conv3x3(h, b1w2_ref, sh_full, m1_ref)                   # (4, L)

        # ---- transition 1: BN+ReLU+1x1 on concat([a1, new1]) (12 -> 6) ----
        cat1 = jnp.concatenate([a1, new1], axis=0)                     # (12, L)
        xt = mm(trw_ref[...], bn_relu(cat1, trn_ref))                  # (6, L)

        # ---- cmaxgb2: stride-2 taps on the even/even sparse lane subset ---
        xs = taps(xt, sh_full, m2_ref)                                 # 9 x (6, L)
        mx = xs[0] + neg2_ref[0]
        for t in range(1, 9):
            mx = jnp.maximum(mx, xs[t] + neg2_ref[t])                  # -inf-padded maxpool
        out = mx * dwconv(xs, mg_ref[...], mb_ref[...])                # maxpool * maxgate

        leaves = [dwconv(xs, pg_ref[l], gb_ref[l]) * dwconv(xs, pc_ref[l], pb_ref[l])
                  for l in range(4)]
        node0 = leaves[0] + leaves[1]
        node1 = leaves[2] + leaves[3]
        n0t = taps(node0, sh_half, m3_ref)
        n1t = taps(node1, sh_half, m3_ref)
        xp = (out
              + node0 * dwconv(n0t, pg_ref[4], gb_ref[4])
              + node1 * dwconv(n1t, pg_ref[5], gb_ref[5]))             # (6, L)

        # ---- dense block 2 / layer 1: 6 -> (+4) @ (H/2)x(W/2) -------------
        h = bn_relu(xp, b2n1_ref)
        h = mm(b2w1_ref[...], h)                                       # (8, L)
        h = bn_relu(h, b2n2_ref)
        new2 = conv3x3(h, b2w2_ref, sh_half, m3_ref)                   # (4, L)

        # ---- norm_last + ReLU + AvgPool(8) + classifier -------------------
        feat = bn_relu(jnp.concatenate([xp, new2], axis=0), nln_ref)   # (10, L)
        pooled = mm(feat, avg_ref[...])                                # (10, Nc)
        out_ref[...] = mm(wc_ref[...], pooled) + bc_ref[...]

    return kernel


# ---------------------------------------------------------------------------
# Parameter preparation: fold BN to per-channel scale/shift, re-pack 3x3
# weights as (Cout, 9*Cin) (tap-major), keep everything f32, no kron.
# ---------------------------------------------------------------------------
def prepare_params(params, eps=1e-5):
    f32 = jnp.float32

    def bn_pair(bn):
        s = bn["gamma"] / jnp.sqrt(bn["var"] + eps)
        b = bn["beta"] - bn["mean"] * s
        return jnp.stack([s, b], axis=0)[:, :, None].astype(f32)       # (2, C, 1)

    def w3x3(w):                                # (Cout, Cin, 3, 3) -> (Cout, 9*Cin)
        co, ci = w.shape[0], w.shape[1]
        return jnp.transpose(w, (0, 2, 3, 1)).reshape(co, 9 * ci).astype(f32)

    p = params
    out = {"wi": w3x3(p["init_conv_w"])}

    b1 = p["block1_layer1"]
    out["b1n1"] = bn_pair(b1["bn1"])
    out["b1w1"] = b1["conv1_w"][:, :, 0, 0].astype(f32)
    out["b1n2"] = bn_pair(b1["bn2"])
    out["b1w2"] = w3x3(b1["conv2_w"])

    tr = p["trans1"]
    out["trn"] = bn_pair(tr["bn"])
    out["trw"] = tr["conv_w"][:, :, 0, 0].astype(f32)

    pool = tr["pool"]
    C = pool["maxgate"].shape[0]
    out["mg"] = pool["maxgate"].reshape(C, 9).astype(f32)
    out["mb"] = pool["mb"][:, None].astype(f32)
    out["pc"] = jnp.transpose(pool["pconvs"][:, 0], (3, 0, 1, 2)).reshape(4, C, 9).astype(f32)
    out["pb"] = jnp.transpose(pool["pbs"], (1, 0))[:, :, None].astype(f32)      # (4, C, 1)
    out["pg"] = jnp.transpose(pool["pgates"][:, 0], (3, 0, 1, 2)).reshape(6, C, 9).astype(f32)
    out["gb"] = jnp.transpose(pool["gbs"], (1, 0))[:, :, None].astype(f32)      # (6, C, 1)

    b2 = p["block2_layer1"]
    out["b2n1"] = bn_pair(b2["bn1"])
    out["b2w1"] = b2["conv1_w"][:, :, 0, 0].astype(f32)
    out["b2n2"] = bn_pair(b2["bn2"])
    out["b2w2"] = w3x3(b2["conv2_w"])

    out["nln"] = bn_pair(p["norm_last"])
    out["wc"] = p["classifier_w"].astype(f32)
    out["bc"] = p["classifier_b"][:, None].astype(f32)
    return out


_W_ORDER = ("wi", "b1n1", "b1w1", "b1n2", "b1w2", "trn", "trw",
            "mg", "mb", "pc", "pb", "pg", "gb",
            "b2n1", "b2w1", "b2n2", "b2w2", "nln", "wc", "bc")


@partial(jax.jit, static_argnames=("n_per_block",))
def densenet_forward(x_nchw, prepped, consts, *, n_per_block=1):
    """DenseNetCmaxGatedB2 forward. x_nchw: (N, 3, 16, 16) -> (N, 10) logits."""
    N, Cin, H, W = x_nchw.shape
    assert N % n_per_block == 0
    G = N // n_per_block
    S = H * W
    L = n_per_block * S
    num_classes = prepped["wc"].shape[0]
    assert consts["avg"].shape == (L, n_per_block)

    x = x_nchw.astype(jnp.float32).reshape(G, n_per_block, Cin, S)
    x = jnp.transpose(x, (0, 2, 1, 3)).reshape(G, Cin, L)

    const_args = [consts["m1"], consts["m2"], consts["neg2"], consts["m3"], consts["avg"]]
    w_args = [prepped[k] for k in _W_ORDER]

    def full_spec(a):
        return pl.BlockSpec(a.shape, lambda b, _nd=a.ndim: (0,) * _nd)

    in_specs = [pl.BlockSpec((None, Cin, L), lambda b: (b, 0, 0))]
    in_specs += [full_spec(a) for a in const_args]
    in_specs += [full_spec(a) for a in w_args]
    out_specs = pl.BlockSpec((None, num_classes, n_per_block), lambda b: (b, 0, 0))

    matmul_flops = 2 * L * (8 * 27 + 8 * 8 + 4 * 72 + 6 * 12 + 8 * 6 + 4 * 72
                            + 10 * n_per_block) + 2 * num_classes * num_classes * n_per_block
    vector_flops = 2 * L * 9 * (3 + 8 + 8 + 8 + 6 * 14)
    bytes_accessed = (x.size * 4
                      + sum(int(a.size) * a.dtype.itemsize for a in const_args + w_args)
                      + G * num_classes * n_per_block * 4)

    out = pl.pallas_call(
        make_kernel(H, W, n_per_block),
        grid=(G,),
        in_specs=in_specs,
        out_specs=out_specs,
        out_shape=jax.ShapeDtypeStruct((G, num_classes, n_per_block), jnp.float32),
        compiler_params=pltpu.CompilerParams(dimension_semantics=("parallel",)),
        cost_estimate=pl.CostEstimate(flops=int(G * (matmul_flops + vector_flops)),
                                      transcendentals=0,
                                      bytes_accessed=int(bytes_accessed)),
    )(x, *const_args, *w_args)

    return jnp.transpose(out, (0, 2, 1)).reshape(N, num_classes)


# ---------------------------------------------------------------------------
# Pure-JAX (XLA) reference mirroring the PyTorch module, for validation.
# ---------------------------------------------------------------------------
def reference_forward(x, params, eps=1e-5):
    hi = jax.lax.Precision.HIGHEST

    def bn(h, q):
        s = q["gamma"] / jnp.sqrt(q["var"] + eps)
        t = q["beta"] - q["mean"] * s
        return h * s[None, :, None, None] + t[None, :, None, None]

    def relu(h):
        return jnp.maximum(h, 0.0)

    def conv(h, w, b=None, stride=1, padding=0, groups=1):
        o = jax.lax.conv_general_dilated(
            h, w, window_strides=(stride, stride),
            padding=[(padding, padding), (padding, padding)],
            dimension_numbers=("NCHW", "OIHW", "NCHW"),
            feature_group_count=groups, precision=hi)
        if b is not None:
            o = o + b[None, :, None, None]
        return o

    p = params
    a1 = conv(x, p["init_conv_w"], padding=1)
    b1 = p["block1_layer1"]
    h = conv(relu(bn(a1, b1["bn1"])), b1["conv1_w"])
    new1 = conv(relu(bn(h, b1["bn2"])), b1["conv2_w"], padding=1)
    cat1 = jnp.concatenate([a1, new1], axis=1)

    tr = p["trans1"]
    xt = conv(relu(bn(cat1, tr["bn"])), tr["conv_w"])
    pool = tr["pool"]
    C = xt.shape[1]
    mx = jax.lax.reduce_window(xt, -jnp.inf, jax.lax.max,
                               (1, 1, 3, 3), (1, 1, 2, 2),
                               [(0, 0), (0, 0), (1, 1), (1, 1)])
    out = mx * conv(xt, pool["maxgate"], pool["mb"], stride=2, padding=1, groups=C)
    leaves = []
    for l in range(4):
        g = conv(xt, pool["pgates"][..., l], pool["gbs"][:, l], stride=2, padding=1, groups=C)
        v = conv(xt, pool["pconvs"][..., l], pool["pbs"][:, l], stride=2, padding=1, groups=C)
        leaves.append(g * v)
    node0, node1 = leaves[0] + leaves[1], leaves[2] + leaves[3]
    g1 = conv(node0, pool["pgates"][..., 4], pool["gbs"][:, 4], stride=1, padding=1, groups=C)
    g2 = conv(node1, pool["pgates"][..., 5], pool["gbs"][:, 5], stride=1, padding=1, groups=C)
    xp = out + node0 * g1 + node1 * g2

    b2 = p["block2_layer1"]
    h = conv(relu(bn(xp, b2["bn1"])), b2["conv1_w"])
    new2 = conv(relu(bn(h, b2["bn2"])), b2["conv2_w"], padding=1)
    feat = relu(bn(jnp.concatenate([xp, new2], axis=1), p["norm_last"]))
    pooled = jnp.mean(feat, axis=(2, 3))
    return jnp.dot(pooled, p["classifier_w"].T, precision=hi) + p["classifier_b"]


# ------------------------------- parameters --------------------------------
def init_params(key):
    keys = iter(jax.random.split(key, 16))

    def normal(shape, std):
        return std * jax.random.normal(next(keys), shape, dtype=jnp.float32)

    def bn(c):
        return {"gamma": jnp.ones((c,), jnp.float32),
                "beta": jnp.zeros((c,), jnp.float32),
                "mean": jnp.zeros((c,), jnp.float32),
                "var": jnp.ones((c,), jnp.float32)}

    C = 6  # transition / cmaxgb2 channels
    return {
        "init_conv_w": normal((8, 3, 3, 3), math.sqrt(2.0 / (3 * 3 * 8))),
        "block1_layer1": {
            "bn1": bn(8),
            "conv1_w": normal((8, 8, 1, 1), math.sqrt(2.0 / 8)),
            "bn2": bn(8),
            "conv2_w": normal((4, 8, 3, 3), math.sqrt(2.0 / (3 * 3 * 4))),
        },
        "trans1": {
            "bn": bn(12),
            "conv_w": normal((6, 12, 1, 1), math.sqrt(2.0 / 6)),
            "pool": {
                "maxgate": normal((C, 1, 3, 3), math.sqrt(2.0 / (3 * 3 * C))),
                "mb": jnp.zeros((C,), jnp.float32),
                "pconvs": normal((C, 1, 3, 3, 4), math.sqrt(2.0 / (3 * 3 * C))),
                "pbs": jnp.zeros((C, 4), jnp.float32),
                "pgates": normal((C, 1, 3, 3, 6), math.sqrt(2.0 / (3 * 3 * C))),
                "gbs": jnp.zeros((C, 6), jnp.float32),
            },
        },
        "block2_layer1": {
            "bn1": bn(6),
            "conv1_w": normal((8, 6, 1, 1), math.sqrt(2.0 / 8)),
            "bn2": bn(8),
            "conv2_w": normal((4, 8, 3, 3), math.sqrt(2.0 / (3 * 3 * 4))),
        },
        "norm_last": bn(10),
        "classifier_w": normal((10, 10), 0.1),
        "classifier_b": jnp.zeros((10,), jnp.float32),
    }


if __name__ == "__main__":
    key = jax.random.PRNGKey(0)
    pkey, xkey = jax.random.split(key)
    N = 2
    H = W = 16
    params = init_params(pkey)
    prepped = prepare_params(params)
    consts = build_masks(H, W, n_per_block=1)
    x = jax.random.normal(xkey, (N, 3, H, W), dtype=jnp.float32)  # NCHW input

    out = densenet_forward(x, prepped, consts, n_per_block=1)
    out = jax.block_until_ready(out)

    ref = reference_forward(x, params)
    assert out.shape == (N, 10)
    assert bool(jnp.all(jnp.isfinite(out)))
    err = float(jnp.max(jnp.abs(out - ref)))
    assert err < 3e-2, f"kernel/reference mismatch: max abs err {err}"
    print("KERNEL_OK")
</pallas_src>

<mosaic_0001>
module attributes {stable_mosaic.version = 11 : i64} {
  func.func @kernel(%arg0: i32, %arg1: memref<1x3x256xf32, #tpu.memory_space<vmem>>, %arg2: memref<9x1x256xf32, #tpu.memory_space<vmem>>, %arg3: memref<9x1x256xf32, #tpu.memory_space<vmem>>, %arg4: memref<9x1x256xf32, #tpu.memory_space<vmem>>, %arg5: memref<9x1x256xf32, #tpu.memory_space<vmem>>, %arg6: memref<256x1xf32, #tpu.memory_space<vmem>>, %arg7: memref<8x27xf32, #tpu.memory_space<vmem>>, %arg8: memref<2x8x1xf32, #tpu.memory_space<vmem>>, %arg9: memref<8x8xf32, #tpu.memory_space<vmem>>, %arg10: memref<2x8x1xf32, #tpu.memory_space<vmem>>, %arg11: memref<4x72xf32, #tpu.memory_space<vmem>>, %arg12: memref<2x12x1xf32, #tpu.memory_space<vmem>>, %arg13: memref<6x12xf32, #tpu.memory_space<vmem>>, %arg14: memref<6x9xf32, #tpu.memory_space<vmem>>, %arg15: memref<6x1xf32, #tpu.memory_space<vmem>>, %arg16: memref<4x6x9xf32, #tpu.memory_space<vmem>>, %arg17: memref<4x6x1xf32, #tpu.memory_space<vmem>>, %arg18: memref<6x6x9xf32, #tpu.memory_space<vmem>>, %arg19: memref<6x6x1xf32, #tpu.memory_space<vmem>>, %arg20: memref<2x6x1xf32, #tpu.memory_space<vmem>>, %arg21: memref<8x6xf32, #tpu.memory_space<vmem>>, %arg22: memref<2x8x1xf32, #tpu.memory_space<vmem>>, %arg23: memref<4x72xf32, #tpu.memory_space<vmem>>, %arg24: memref<2x10x1xf32, #tpu.memory_space<vmem>>, %arg25: memref<10x10xf32, #tpu.memory_space<vmem>>, %arg26: memref<10x1xf32, #tpu.memory_space<vmem>>, %arg27: memref<1x10x1xf32, #tpu.memory_space<vmem>>) attributes {dimension_semantics = [#tpu.dimension_semantics<parallel>], iteration_bounds = array<i64: 2>, scalar_prefetch = 0 : i64, scratch_operands = 0 : i64, tpu.core_type = #tpu.core_type<tc>, window_params = [{transform_indices = @transform_0, window_bounds = array<i64: 1, 3, 256>}, {pipeline_mode = #tpu.pipeline_mode<synchronous>, transform_indices = @transform_1, window_bounds = array<i64: 9, 1, 256>}, {pipeline_mode = #tpu.pipeline_mode<synchronous>, transform_indices = @transform_2, window_bounds = array<i64: 9, 1, 256>}, {pipeline_mode = #tpu.pipeline_mode<synchronous>, transform_indices = @transform_3, window_bounds = array<i64: 9, 1, 256>}, {pipeline_mode = #tpu.pipeline_mode<synchronous>, transform_indices = @transform_4, window_bounds = array<i64: 9, 1, 256>}, {pipeline_mode = #tpu.pipeline_mode<synchronous>, transform_indices = @transform_5, window_bounds = array<i64: 256, 1>}, {pipeline_mode = #tpu.pipeline_mode<synchronous>, transform_indices = @transform_6, window_bounds = array<i64: 8, 27>}, {pipeline_mode = #tpu.pipeline_mode<synchronous>, transform_indices = @transform_7, window_bounds = array<i64: 2, 8, 1>}, {pipeline_mode = #tpu.pipeline_mode<synchronous>, transform_indices = @transform_8, window_bounds = array<i64: 8, 8>}, {pipeline_mode = #tpu.pipeline_mode<synchronous>, transform_indices = @transform_9, window_bounds = array<i64: 2, 8, 1>}, {pipeline_mode = #tpu.pipeline_mode<synchronous>, transform_indices = @transform_10, window_bounds = array<i64: 4, 72>}, {pipeline_mode = #tpu.pipeline_mode<synchronous>, transform_indices = @transform_11, window_bounds = array<i64: 2, 12, 1>}, {pipeline_mode = #tpu.pipeline_mode<synchronous>, transform_indices = @transform_12, window_bounds = array<i64: 6, 12>}, {pipeline_mode = #tpu.pipeline_mode<synchronous>, transform_indices = @transform_13, window_bounds = array<i64: 6, 9>}, {pipeline_mode = #tpu.pipeline_mode<synchronous>, transform_indices = @transform_14, window_bounds = array<i64: 6, 1>}, {pipeline_mode = #tpu.pipeline_mode<synchronous>, transform_indices = @transform_15, window_bounds = array<i64: 4, 6, 9>}, {pipeline_mode = #tpu.pipeline_mode<synchronous>, transform_indices = @transform_16, window_bounds = array<i64: 4, 6, 1>}, {pipeline_mode = #tpu.pipeline_mode<synchronous>, transform_indices = @transform_17, window_bounds = array<i64: 6, 6, 9>}, {pipeline_mode = #tpu.pipeline_mode<synchronous>, transform_indices = @transform_18, window_bounds = array<i64: 6, 6, 1>}, {pipeline_mode = #tpu.pipeline_mode<synchronous>, transform_indices = @transform_19, window_bounds = array<i64: 2, 6, 1>}, {pipeline_mode = #tpu.pipeline_mode<synchronous>, transform_indices = @transform_20, window_bounds = array<i64: 8, 6>}, {pipeline_mode = #tpu.pipeline_mode<synchronous>, transform_indices = @transform_21, window_bounds = array<i64: 2, 8, 1>}, {pipeline_mode = #tpu.pipeline_mode<synchronous>, transform_indices = @transform_22, window_bounds = array<i64: 4, 72>}, {pipeline_mode = #tpu.pipeline_mode<synchronous>, transform_indices = @transform_23, window_bounds = array<i64: 2, 10, 1>}, {pipeline_mode = #tpu.pipeline_mode<synchronous>, transform_indices = @transform_24, window_bounds = array<i64: 10, 10>}, {pipeline_mode = #tpu.pipeline_mode<synchronous>, transform_indices = @transform_25, window_bounds = array<i64: 10, 1>}, {transform_indices = @transform_26, window_bounds = array<i64: 1, 10, 1>}]} {
    %c0 = arith.constant 0 : index
    %c0_0 = arith.constant 0 : index
    %c0_1 = arith.constant 0 : index
    %0 = vector.load %arg1[%c0, %c0_0, %c0_1] : memref<1x3x256xf32, #tpu.memory_space<vmem>>, vector<1x3x256xf32>
    %1 = vector.shape_cast %0 : vector<1x3x256xf32> to vector<3x256xf32>
    %c17_i32 = arith.constant 17 : i32
    %2 = tpu.dynamic_rotate %1 by %c17_i32 dim 1 : vector<3x256xf32>, i32 -> vector<3x256xf32>
    %c0_2 = arith.constant 0 : index
    %c0_3 = arith.constant 0 : index
    %c0_4 = arith.constant 0 : index
    %3 = vector.load %arg2[%c0_2, %c0_3, %c0_4] : memref<9x1x256xf32, #tpu.memory_space<vmem>>, vector<1x1x256xf32>
    %4 = vector.shape_cast %3 : vector<1x1x256xf32> to vector<1x256xf32>
    %5 = vector.broadcast %4 : vector<1x256xf32> to vector<3x256xf32>
    %6 = arith.mulf %2, %5 : vector<3x256xf32>
    %c16_i32 = arith.constant 16 : i32
    %7 = tpu.dynamic_rotate %1 by %c16_i32 dim 1 : vector<3x256xf32>, i32 -> vector<3x256xf32>
    %c1 = arith.constant 1 : index
    %c0_5 = arith.constant 0 : index
    %c0_6 = arith.constant 0 : index
    %8 = vector.load %arg2[%c1, %c0_5, %c0_6] : memref<9x1x256xf32, #tpu.memory_space<vmem>>, vector<1x1x256xf32>
    %9 = vector.shape_cast %8 : vector<1x1x256xf32> to vector<1x256xf32>
    %10 = vector.broadcast %9 : vector<1x256xf32> to vector<3x256xf32>
    %11 = arith.mulf %7, %10 : vector<3x256xf32>
    %c15_i32 = arith.constant 15 : i32
    %12 = tpu.dynamic_rotate %1 by %c15_i32 dim 1 : vector<3x256xf32>, i32 -> vector<3x256xf32>
    %c2 = arith.constant 2 : index
    %c0_7 = arith.constant 0 : index
    %c0_8 = arith.constant 0 : index
    %13 = vector.load %arg2[%c2, %c0_7, %c0_8] : memref<9x1x256xf32, #tpu.memory_space<vmem>>, vector<1x1x256xf32>
    %14 = vector.shape_cast %13 : vector<1x1x256xf32> to vector<1x256xf32>
    %15 = vector.broadcast %14 : vector<1x256xf32> to vector<3x256xf32>
    %16 = arith.mulf %12, %15 : vector<3x256xf32>
    %c1_i32 = arith.constant 1 : i32
    %17 = tpu.dynamic_rotate %1 by %c1_i32 dim 1 : vector<3x256xf32>, i32 -> vector<3x256xf32>
    %c3 = arith.constant 3 : index
    %c0_9 = arith.constant 0 : index
    %c0_10 = arith.constant 0 : index
    %18 = vector.load %arg2[%c3, %c0_9, %c0_10] : memref<9x1x256xf32, #tpu.memory_space<vmem>>, vector<1x1x256xf32>
    %19 = vector.shape_cast %18 : vector<1x1x256xf32> to vector<1x256xf32>
    %20 = vector.broadcast %19 : vector<1x256xf32> to vector<3x256xf32>
    %21 = arith.mulf %17, %20 : vector<3x256xf32>
    %c4 = arith.constant 4 : index
    %c0_11 = arith.constant 0 : index
    %c0_12 = arith.constant 0 : index
    %22 = vector.load %arg2[%c4, %c0_11, %c0_12] : memref<9x1x256xf32, #tpu.memory_space<vmem>>, vector<1x1x256xf32>
    %23 = vector.shape_cast %22 : vector<1x1x256xf32> to vector<1x256xf32>
    %24 = vector.broadcast %23 : vector<1x256xf32> to vector<3x256xf32>
    %25 = arith.mulf %1, %24 : vector<3x256xf32>
    %c255_i32 = arith.constant 255 : i32
    %26 = tpu.dynamic_rotate %1 by %c255_i32 dim 1 : vector<3x256xf32>, i32 -> vector<3x256xf32>
    %c5 = arith.constant 5 : index
    %c0_13 = arith.constant 0 : index
    %c0_14 = arith.constant 0 : index
    %27 = vector.load %arg2[%c5, %c0_13, %c0_14] : memref<9x1x256xf32, #tpu.memory_space<vmem>>, vector<1x1x256xf32>
    %28 = vector.shape_cast %27 : vector<1x1x256xf32> to vector<1x256xf32>
    %29 = vector.broadcast %28 : vector<1x256xf32> to vector<3x256xf32>
    %30 = arith.mulf %26, %29 : vector<3x256xf32>
    %c241_i32 = arith.constant 241 : i32
    %31 = tpu.dynamic_rotate %1 by %c241_i32 dim 1 : vector<3x256xf32>, i32 -> vector<3x256xf32>
    %c6 = arith.constant 6 : index
    %c0_15 = arith.constant 0 : index
    %c0_16 = arith.constant 0 : index
    %32 = vector.load %arg2[%c6, %c0_15, %c0_16] : memref<9x1x256xf32, #tpu.memory_space<vmem>>, vector<1x1x256xf32>
    %33 = vector.shape_cast %32 : vector<1x1x256xf32> to vector<1x256xf32>
    %34 = vector.broadcast %33 : vector<1x256xf32> to vector<3x256xf32>
    %35 = arith.mulf %31, %34 : vector<3x256xf32>
    %c240_i32 = arith.constant 240 : i32
    %36 = tpu.dynamic_rotate %1 by %c240_i32 dim 1 : vector<3x256xf32>, i32 -> vector<3x256xf32>
    %c7 = arith.constant 7 : index
    %c0_17 = arith.constant 0 : index
    %c0_18 = arith.constant 0 : index
    %37 = vector.load %arg2[%c7, %c0_17, %c0_18] : memref<9x1x256xf32, #tpu.memory_space<vmem>>, vector<1x1x256xf32>
    %38 = vector.shape_cast %37 : vector<1x1x256xf32> to vector<1x256xf32>
    %39 = vector.broadcast %38 : vector<1x256xf32> to vector<3x256xf32>
    %40 = arith.mulf %36, %39 : vector<3x256xf32>
    %c239_i32 = arith.constant 239 : i32
    %41 = tpu.dynamic_rotate %1 by %c239_i32 dim 1 : vector<3x256xf32>, i32 -> vector<3x256xf32>
    %c8 = arith.constant 8 : index
    %c0_19 = arith.constant 0 : index
    %c0_20 = arith.constant 0 : index
    %42 = vector.load %arg2[%c8, %c0_19, %c0_20] : memref<9x1x256xf32, #tpu.memory_space<vmem>>, vector<1x1x256xf32>
    %43 = vector.shape_cast %42 : vector<1x1x256xf32> to vector<1x256xf32>
    %44 = vector.broadcast %43 : vector<1x256xf32> to vector<3x256xf32>
    %45 = arith.mulf %41, %44 : vector<3x256xf32>
    %46 = tpu.concatenate %6, %11, %16, %21, %25, %30, %35, %40, %45 in 0 : vector<3x256xf32>, vector<3x256xf32>, vector<3x256xf32>, vector<3x256xf32>, vector<3x256xf32>, vector<3x256xf32>, vector<3x256xf32>, vector<3x256xf32>, vector<3x256xf32> -> vector<27x256xf32>
    %c0_21 = arith.constant 0 : index
    %c0_22 = arith.constant 0 : index
    %47 = vector.load %arg7[%c0_21, %c0_22] : memref<8x27xf32, #tpu.memory_space<vmem>>, vector<8x27xf32>
    %cst = arith.constant dense<0.000000e+00> : vector<8x256xf32>
    %48 = tpu.matmul %47, %46, %cst {dimension_numbers = #tpu.dot_dimension_numbers<[1], [0], [0], [1], [0, 0, 1, 1], [], []>} : vector<8x27xf32>, vector<27x256xf32>, vector<8x256xf32> -> vector<8x256xf32>
    %c0_23 = arith.constant 0 : index
    %c0_24 = arith.constant 0 : index
    %c0_25 = arith.constant 0 : index
    %49 = vector.load %arg8[%c0_23, %c0_24, %c0_25] : memref<2x8x1xf32, #tpu.memory_space<vmem>>, vector<1x8x1xf32>
    %50 = vector.shape_cast %49 : vector<1x8x1xf32> to vector<8x1xf32>
    %51 = vector.broadcast %50 : vector<8x1xf32> to vector<8x256xf32>
    %52 = arith.mulf %48, %51 : vector<8x256xf32>
    %c1_26 = arith.constant 1 : index
    %c0_27 = arith.constant 0 : index
    %c0_28 = arith.constant 0 : index
    %53 = vector.load %arg8[%c1_26, %c0_27, %c0_28] : memref<2x8x1xf32, #tpu.memory_space<vmem>>, vector<1x8x1xf32>
    %54 = vector.shape_cast %53 : vector<1x8x1xf32> to vector<8x1xf32>
    %55 = vector.broadcast %54 : vector<8x1xf32> to vector<8x256xf32>
    %56 = arith.addf %52, %55 : vector<8x256xf32>
    %cst_29 = arith.constant 0.000000e+00 : f32
    %57 = vector.broadcast %cst_29 : f32 to vector<8x256xf32>
    %58 = arith.maximumf %56, %57 : vector<8x256xf32>
    %c0_30 = arith.constant 0 : index
    %c0_31 = arith.constant 0 : index
    %59 = vector.load %arg9[%c0_30, %c0_31] : memref<8x8xf32, #tpu.memory_space<vmem>>, vector<8x8xf32>
    %cst_32 = arith.constant dense<0.000000e+00> : vector<8x256xf32>
    %60 = tpu.matmul %59, %58, %cst_32 {dimension_numbers = #tpu.dot_dimension_numbers<[1], [0], [0], [1], [0, 0, 1, 1], [], []>} : vector<8x8xf32>, vector<8x256xf32>, vector<8x256xf32> -> vector<8x256xf32>
    %c0_33 = arith.constant 0 : index
    %c0_34 = arith.constant 0 : index
    %c0_35 = arith.constant 0 : index
    %61 = vector.load %arg10[%c0_33, %c0_34, %c0_35] : memref<2x8x1xf32, #tpu.memory_space<vmem>>, vector<1x8x1xf32>
    %62 = vector.shape_cast %61 : vector<1x8x1xf32> to vector<8x1xf32>
    %63 = vector.broadcast %62 : vector<8x1xf32> to vector<8x256xf32>
    %64 = arith.mulf %60, %63 : vector<8x256xf32>
    %c1_36 = arith.constant 1 : index
    %c0_37 = arith.constant 0 : index
    %c0_38 = arith.constant 0 : index
    %65 = vector.load %arg10[%c1_36, %c0_37, %c0_38] : memref<2x8x1xf32, #tpu.memory_space<vmem>>, vector<1x8x1xf32>
    %66 = vector.shape_cast %65 : vector<1x8x1xf32> to vector<8x1xf32>
    %67 = vector.broadcast %66 : vector<8x1xf32> to vector<8x256xf32>
    %68 = arith.addf %64, %67 : vector<8x256xf32>
    %cst_39 = arith.constant 0.000000e+00 : f32
    %69 = vector.broadcast %cst_39 : f32 to vector<8x256xf32>
    %70 = arith.maximumf %68, %69 : vector<8x256xf32>
    %c17_i32_40 = arith.constant 17 : i32
    %71 = tpu.dynamic_rotate %70 by %c17_i32_40 dim 1 : vector<8x256xf32>, i32 -> vector<8x256xf32>
    %c0_41 = arith.constant 0 : index
    %c0_42 = arith.constant 0 : index
    %c0_43 = arith.constant 0 : index
    %72 = vector.load %arg2[%c0_41, %c0_42, %c0_43] : memref<9x1x256xf32, #tpu.memory_space<vmem>>, vector<1x1x256xf32>
    %73 = vector.shape_cast %72 : vector<1x1x256xf32> to vector<1x256xf32>
    %74 = vector.broadcast %73 : vector<1x256xf32> to vector<8x256xf32>
    %75 = arith.mulf %71, %74 : vector<8x256xf32>
    %c16_i32_44 = arith.constant 16 : i32
    %76 = tpu.dynamic_rotate %70 by %c16_i32_44 dim 1 : vector<8x256xf32>, i32 -> vector<8x256xf32>
    %c1_45 = arith.constant 1 : index
    %c0_46 = arith.constant 0 : index
    %c0_47 = arith.constant 0 : index
    %77 = vector.load %arg2[%c1_45, %c0_46, %c0_47] : memref<9x1x256xf32, #tpu.memory_space<vmem>>, vector<1x1x256xf32>
    %78 = vector.shape_cast %77 : vector<1x1x256xf32> to vector<1x256xf32>
    %79 = vector.broadcast %78 : vector<1x256xf32> to vector<8x256xf32>
    %80 = arith.mulf %76, %79 : vector<8x256xf32>
    %c15_i32_48 = arith.constant 15 : i32
    %81 = tpu.dynamic_rotate %70 by %c15_i32_48 dim 1 : vector<8x256xf32>, i32 -> vector<8x256xf32>
    %c2_49 = arith.constant 2 : index
    %c0_50 = arith.constant 0 : index
    %c0_51 = arith.constant 0 : index
    %82 = vector.load %arg2[%c2_49, %c0_50, %c0_51] : memref<9x1x256xf32, #tpu.memory_space<vmem>>, vector<1x1x256xf32>
    %83 = vector.shape_cast %82 : vector<1x1x256xf32> to vector<1x256xf32>
    %84 = vector.broadcast %83 : vector<1x256xf32> to vector<8x256xf32>
    %85 = arith.mulf %81, %84 : vector<8x256xf32>
    %c1_i32_52 = arith.constant 1 : i32
    %86 = tpu.dynamic_rotate %70 by %c1_i32_52 dim 1 : vector<8x256xf32>, i32 -> vector<8x256xf32>
    %c3_53 = arith.constant 3 : index
    %c0_54 = arith.constant 0 : index
    %c0_55 = arith.constant 0 : index
    %87 = vector.load %arg2[%c3_53, %c0_54, %c0_55] : memref<9x1x256xf32, #tpu.memory_space<vmem>>, vector<1x1x256xf32>
    %88 = vector.shape_cast %87 : vector<1x1x256xf32> to vector<1x256xf32>
    %89 = vector.broadcast %88 : vector<1x256xf32> to vector<8x256xf32>
    %90 = arith.mulf %86, %89 : vector<8x256xf32>
    %c4_56 = arith.constant 4 : index
    %c0_57 = arith.constant 0 : index
    %c0_58 = arith.constant 0 : index
    %91 = vector.load %arg2[%c4_56, %c0_57, %c0_58] : memref<9x1x256xf32, #tpu.memory_space<vmem>>, vector<1x1x256xf32>
    %92 = vector.shape_cast %91 : vector<1x1x256xf32> to vector<1x256xf32>
    %93 = vector.broadcast %92 : vector<1x256xf32> to vector<8x256xf32>
    %94 = arith.mulf %70, %93 : vector<8x256xf32>
    %c255_i32_59 = arith.constant 255 : i32
    %95 = tpu.dynamic_rotate %70 by %c255_i32_59 dim 1 : vector<8x256xf32>, i32 -> vector<8x256xf32>
    %c5_60 = arith.constant 5 : index
    %c0_61 = arith.constant 0 : index
    %c0_62 = arith.constant 0 : index
    %96 = vector.load %arg2[%c5_60, %c0_61, %c0_62] : memref<9x1x256xf32, #tpu.memory_space<vmem>>, vector<1x1x256xf32>
    %97 = vector.shape_cast %96 : vector<1x1x256xf32> to vector<1x256xf32>
    %98 = vector.broadcast %97 : vector<1x256xf32> to vector<8x256xf32>
    %99 = arith.mulf %95, %98 : vector<8x256xf32>
    %c241_i32_63 = arith.constant 241 : i32
    %100 = tpu.dynamic_rotate %70 by %c241_i32_63 dim 1 : vector<8x256xf32>, i32 -> vector<8x256xf32>
    %c6_64 = arith.constant 6 : index
    %c0_65 = arith.constant 0 : index
    %c0_66 = arith.constant 0 : index
    %101 = vector.load %arg2[%c6_64, %c0_65, %c0_66] : memref<9x1x256xf32, #tpu.memory_space<vmem>>, vector<1x1x256xf32>
    %102 = vector.shape_cast %101 : vector<1x1x256xf32> to vector<1x256xf32>
    %103 = vector.broadcast %102 : vector<1x256xf32> to vector<8x256xf32>
    %104 = arith.mulf %100, %103 : vector<8x256xf32>
    %c240_i32_67 = arith.constant 240 : i32
    %105 = tpu.dynamic_rotate %70 by %c240_i32_67 dim 1 : vector<8x256xf32>, i32 -> vector<8x256xf32>
    %c7_68 = arith.constant 7 : index
    %c0_69 = arith.constant 0 : index
    %c0_70 = arith.constant 0 : index
    %106 = vector.load %arg2[%c7_68, %c0_69, %c0_70] : memref<9x1x256xf32, #tpu.memory_space<vmem>>, vector<1x1x256xf32>
    %107 = vector.shape_cast %106 : vector<1x1x256xf32> to vector<1x256xf32>
    %108 = vector.broadcast %107 : vector<1x256xf32> to vector<8x256xf32>
    %109 = arith.mulf %105, %108 : vector<8x256xf32>
    %c239_i32_71 = arith.constant 239 : i32
    %110 = tpu.dynamic_rotate %70 by %c239_i32_71 dim 1 : vector<8x256xf32>, i32 -> vector<8x256xf32>
    %c8_72 = arith.constant 8 : index
    %c0_73 = arith.constant 0 : index
    %c0_74 = arith.constant 0 : index
    %111 = vector.load %arg2[%c8_72, %c0_73, %c0_74] : memref<9x1x256xf32, #tpu.memory_space<vmem>>, vector<1x1x256xf32>
    %112 = vector.shape_cast %111 : vector<1x1x256xf32> to vector<1x256xf32>
    %113 = vector.broadcast %112 : vector<1x256xf32> to vector<8x256xf32>
    %114 = arith.mulf %110, %113 : vector<8x256xf32>
    %115 = tpu.concatenate %75, %80, %85, %90, %94, %99, %104, %109, %114 in 0 : vector<8x256xf32>, vector<8x256xf32>, vector<8x256xf32>, vector<8x256xf32>, vector<8x256xf32>, vector<8x256xf32>, vector<8x256xf32>, vector<8x256xf32>, vector<8x256xf32> -> vector<72x256xf32>
    %c0_75 = arith.constant 0 : index
    %c0_76 = arith.constant 0 : index
    %116 = vector.load %arg11[%c0_75, %c0_76] : memref<4x72xf32, #tpu.memory_space<vmem>>, vector<4x72xf32>
    %cst_77 = arith.constant dense<0.000000e+00> : vector<4x256xf32>
    %117 = tpu.matmul %116, %115, %cst_77 {dimension_numbers = #tpu.dot_dimension_numbers<[1], [0], [0], [1], [0, 0, 1, 1], [], []>} : vector<4x72xf32>, vector<72x256xf32>, vector<4x256xf32> -> vector<4x256xf32>
    %118 = tpu.concatenate %48, %117 in 0 : vector<8x256xf32>, vector<4x256xf32> -> vector<12x256xf32>
    %c0_78 = arith.constant 0 : index
    %c0_79 = arith.constant 0 : index
    %119 = vector.load %arg13[%c0_78, %c0_79] : memref<6x12xf32, #tpu.memory_space<vmem>>, vector<6x12xf32>
    %c0_80 = arith.constant 0 : index
    %c0_81 = arith.constant 0 : index
    %c0_82 = arith.constant 0 : index
    %120 = vector.load %arg12[%c0_80, %c0_81, %c0_82] : memref<2x12x1xf32, #tpu.memory_space<vmem>>, vector<1x12x1xf32>
    %121 = vector.shape_cast %120 : vector<1x12x1xf32> to vector<12x1xf32>
    %122 = vector.broadcast %121 : vector<12x1xf32> to vector<12x256xf32>
    %123 = arith.mulf %118, %122 : vector<12x256xf32>
    %c1_83 = arith.constant 1 : index
    %c0_84 = arith.constant 0 : index
    %c0_85 = arith.constant 0 : index
    %124 = vector.load %arg12[%c1_83, %c0_84, %c0_85] : memref<2x12x1xf32, #tpu.memory_space<vmem>>, vector<1x12x1xf32>
    %125 = vector.shape_cast %124 : vector<1x12x1xf32> to vector<12x1xf32>
    %126 = vector.broadcast %125 : vector<12x1xf32> to vector<12x256xf32>
    %127 = arith.addf %123, %126 : vector<12x256xf32>
    %cst_86 = arith.constant 0.000000e+00 : f32
    %128 = vector.broadcast %cst_86 : f32 to vector<12x256xf32>
    %129 = arith.maximumf %127, %128 : vector<12x256xf32>
    %cst_87 = arith.constant dense<0.000000e+00> : vector<6x256xf32>
    %130 = tpu.matmul %119, %129, %cst_87 {dimension_numbers = #tpu.dot_dimension_numbers<[1], [0], [0], [1], [0, 0, 1, 1], [], []>} : vector<6x12xf32>, vector<12x256xf32>, vector<6x256xf32> -> vector<6x256xf32>
    %c17_i32_88 = arith.constant 17 : i32
    %131 = tpu.dynamic_rotate %130 by %c17_i32_88 dim 1 : vector<6x256xf32>, i32 -> vector<6x256xf32>
    %c0_89 = arith.constant 0 : index
    %c0_90 = arith.constant 0 : index
    %c0_91 = arith.constant 0 : index
    %132 = vector.load %arg3[%c0_89, %c0_90, %c0_91] : memref<9x1x256xf32, #tpu.memory_space<vmem>>, vector<1x1x256xf32>
    %133 = vector.shape_cast %132 : vector<1x1x256xf32> to vector<1x256xf32>
    %134 = vector.broadcast %133 : vector<1x256xf32> to vector<6x256xf32>
    %135 = arith.mulf %131, %134 : vector<6x256xf32>
    %c16_i32_92 = arith.constant 16 : i32
    %136 = tpu.dynamic_rotate %130 by %c16_i32_92 dim 1 : vector<6x256xf32>, i32 -> vector<6x256xf32>
    %c1_93 = arith.constant 1 : index
    %c0_94 = arith.constant 0 : index
    %c0_95 = arith.constant 0 : index
    %137 = vector.load %arg3[%c1_93, %c0_94, %c0_95] : memref<9x1x256xf32, #tpu.memory_space<vmem>>, vector<1x1x256xf32>
    %138 = vector.shape_cast %137 : vector<1x1x256xf32> to vector<1x256xf32>
    %139 = vector.broadcast %138 : vector<1x256xf32> to vector<6x256xf32>
    %140 = arith.mulf %136, %139 : vector<6x256xf32>
    %c15_i32_96 = arith.constant 15 : i32
    %141 = tpu.dynamic_rotate %130 by %c15_i32_96 dim 1 : vector<6x256xf32>, i32 -> vector<6x256xf32>
    %c2_97 = arith.constant 2 : index
    %c0_98 = arith.constant 0 : index
    %c0_99 = arith.constant 0 : index
    %142 = vector.load %arg3[%c2_97, %c0_98, %c0_99] : memref<9x1x256xf32, #tpu.memory_space<vmem>>, vector<1x1x256xf32>
    %143 = vector.shape_cast %142 : vector<1x1x256xf32> to vector<1x256xf32>
    %144 = vector.broadcast %143 : vector<1x256xf32> to vector<6x256xf32>
    %145 = arith.mulf %141, %144 : vector<6x256xf32>
    %c1_i32_100 = arith.constant 1 : i32
    %146 = tpu.dynamic_rotate %130 by %c1_i32_100 dim 1 : vector<6x256xf32>, i32 -> vector<6x256xf32>
    %c3_101 = arith.constant 3 : index
    %c0_102 = arith.constant 0 : index
    %c0_103 = arith.constant 0 : index
    %147 = vector.load %arg3[%c3_101, %c0_102, %c0_103] : memref<9x1x256xf32, #tpu.memory_space<vmem>>, vector<1x1x256xf32>
    %148 = vector.shape_cast %147 : vector<1x1x256xf32> to vector<1x256xf32>
    %149 = vector.broadcast %148 : vector<1x256xf32> to vector<6x256xf32>
    %150 = arith.mulf %146, %149 : vector<6x256xf32>
    %c4_104 = arith.constant 4 : index
    %c0_105 = arith.constant 0 : index
    %c0_106 = arith.constant 0 : index
    %151 = vector.load %arg3[%c4_104, %c0_105, %c0_106] : memref<9x1x256xf32, #tpu.memory_space<vmem>>, vector<1x1x256xf32>
    %152 = vector.shape_cast %151 : vector<1x1x256xf32> to vector<1x256xf32>
    %153 = vector.broadcast %152 : vector<1x256xf32> to vector<6x256xf32>
    %154 = arith.mulf %130, %153 : vector<6x256xf32>
    %c255_i32_107 = arith.constant 255 : i32
    %155 = tpu.dynamic_rotate %130 by %c255_i32_107 dim 1 : vector<6x256xf32>, i32 -> vector<6x256xf32>
    %c5_108 = arith.constant 5 : index
    %c0_109 = arith.constant 0 : index
    %c0_110 = arith.constant 0 : index
    %156 = vector.load %arg3[%c5_108, %c0_109, %c0_110] : memref<9x1x256xf32, #tpu.memory_space<vmem>>, vector<1x1x256xf32>
    %157 = vector.shape_cast %156 : vector<1x1x256xf32> to vector<1x256xf32>
    %158 = vector.broadcast %157 : vector<1x256xf32> to vector<6x256xf32>
    %159 = arith.mulf %155, %158 : vector<6x256xf32>
    %c241_i32_111 = arith.constant 241 : i32
    %160 = tpu.dynamic_rotate %130 by %c241_i32_111 dim 1 : vector<6x256xf32>, i32 -> vector<6x256xf32>
    %c6_112 = arith.constant 6 : index
    %c0_113 = arith.constant 0 : index
    %c0_114 = arith.constant 0 : index
    %161 = vector.load %arg3[%c6_112, %c0_113, %c0_114] : memref<9x1x256xf32, #tpu.memory_space<vmem>>, vector<1x1x256xf32>
    %162 = vector.shape_cast %161 : vector<1x1x256xf32> to vector<1x256xf32>
    %163 = vector.broadcast %162 : vector<1x256xf32> to vector<6x256xf32>
    %164 = arith.mulf %160, %163 : vector<6x256xf32>
    %c240_i32_115 = arith.constant 240 : i32
    %165 = tpu.dynamic_rotate %130 by %c240_i32_115 dim 1 : vector<6x256xf32>, i32 -> vector<6x256xf32>
    %c7_116 = arith.constant 7 : index
    %c0_117 = arith.constant 0 : index
    %c0_118 = arith.constant 0 : index
    %166 = vector.load %arg3[%c7_116, %c0_117, %c0_118] : memref<9x1x256xf32, #tpu.memory_space<vmem>>, vector<1x1x256xf32>
    %167 = vector.shape_cast %166 : vector<1x1x256xf32> to vector<1x256xf32>
    %168 = vector.broadcast %167 : vector<1x256xf32> to vector<6x256xf32>
    %169 = arith.mulf %165, %168 : vector<6x256xf32>
    %c239_i32_119 = arith.constant 239 : i32
    %170 = tpu.dynamic_rotate %130 by %c239_i32_119 dim 1 : vector<6x256xf32>, i32 -> vector<6x256xf32>
    %c8_120 = arith.constant 8 : index
    %c0_121 = arith.constant 0 : index
    %c0_122 = arith.constant 0 : index
    %171 = vector.load %arg3[%c8_120, %c0_121, %c0_122] : memref<9x1x256xf32, #tpu.memory_space<vmem>>, vector<1x1x256xf32>
    %172 = vector.shape_cast %171 : vector<1x1x256xf32> to vector<1x256xf32>
    %173 = vector.broadcast %172 : vector<1x256xf32> to vector<6x256xf32>
    %174 = arith.mulf %170, %173 : vector<6x256xf32>
    %c0_123 = arith.constant 0 : index
    %c0_124 = arith.constant 0 : index
    %c0_125 = arith.constant 0 : index
    %175 = vector.load %arg4[%c0_123, %c0_124, %c0_125] : memref<9x1x256xf32, #tpu.memory_space<vmem>>, vector<1x1x256xf32>
    %176 = vector.shape_cast %175 : vector<1x1x256xf32> to vector<1x256xf32>
    %177 = vector.broadcast %176 : vector<1x256xf32> to vector<6x256xf32>
    %178 = arith.addf %135, %177 : vector<6x256xf32>
    %c1_126 = arith.constant 1 : index
    %c0_127 = arith.constant 0 : index
    %c0_128 = arith.constant 0 : index
    %179 = vector.load %arg4[%c1_126, %c0_127, %c0_128] : memref<9x1x256xf32, #tpu.memory_space<vmem>>, vector<1x1x256xf32>
    %180 = vector.shape_cast %179 : vector<1x1x256xf32> to vector<1x256xf32>
    %181 = vector.broadcast %180 : vector<1x256xf32> to vector<6x256xf32>
    %182 = arith.addf %140, %181 : vector<6x256xf32>
    %183 = arith.maximumf %178, %182 : vector<6x256xf32>
    %c2_129 = arith.constant 2 : index
    %c0_130 = arith.constant 0 : index
    %c0_131 = arith.constant 0 : index
    %184 = vector.load %arg4[%c2_129, %c0_130, %c0_131] : memref<9x1x256xf32, #tpu.memory_space<vmem>>, vector<1x1x256xf32>
    %185 = vector.shape_cast %184 : vector<1x1x256xf32> to vector<1x256xf32>
    %186 = vector.broadcast %185 : vector<1x256xf32> to vector<6x256xf32>
    %187 = arith.addf %145, %186 : vector<6x256xf32>
    %188 = arith.maximumf %183, %187 : vector<6x256xf32>
    %c3_132 = arith.constant 3 : index
    %c0_133 = arith.constant 0 : index
    %c0_134 = arith.constant 0 : index
    %189 = vector.load %arg4[%c3_132, %c0_133, %c0_134] : memref<9x1x256xf32, #tpu.memory_space<vmem>>, vector<1x1x256xf32>
    %190 = vector.shape_cast %189 : vector<1x1x256xf32> to vector<1x256xf32>
    %191 = vector.broadcast %190 : vector<1x256xf32> to vector<6x256xf32>
    %192 = arith.addf %150, %191 : vector<6x256xf32>
    %193 = arith.maximumf %188, %192 : vector<6x256xf32>
    %c4_135 = arith.constant 4 : index
    %c0_136 = arith.constant 0 : index
    %c0_137 = arith.constant 0 : index
    %194 = vector.load %arg4[%c4_135, %c0_136, %c0_137] : memref<9x1x256xf32, #tpu.memory_space<vmem>>, vector<1x1x256xf32>
    %195 = vector.shape_cast %194 : vector<1x1x256xf32> to vector<1x256xf32>
    %196 = vector.broadcast %195 : vector<1x256xf32> to vector<6x256xf32>
    %197 = arith.addf %154, %196 : vector<6x256xf32>
    %198 = arith.maximumf %193, %197 : vector<6x256xf32>
    %c5_138 = arith.constant 5 : index
    %c0_139 = arith.constant 0 : index
    %c0_140 = arith.constant 0 : index
    %199 = vector.load %arg4[%c5_138, %c0_139, %c0_140] : memref<9x1x256xf32, #tpu.memory_space<vmem>>, vector<1x1x256xf32>
    %200 = vector.shape_cast %199 : vector<1x1x256xf32> to vector<1x256xf32>
    %201 = vector.broadcast %200 : vector<1x256xf32> to vector<6x256xf32>
    %202 = arith.addf %159, %201 : vector<6x256xf32>
    %203 = arith.maximumf %198, %202 : vector<6x256xf32>
    %c6_141 = arith.constant 6 : index
    %c0_142 = arith.constant 0 : index
    %c0_143 = arith.constant 0 : index
    %204 = vector.load %arg4[%c6_141, %c0_142, %c0_143] : memref<9x1x256xf32, #tpu.memory_space<vmem>>, vector<1x1x256xf32>
    %205 = vector.shape_cast %204 : vector<1x1x256xf32> to vector<1x256xf32>
    %206 = vector.broadcast %205 : vector<1x256xf32> to vector<6x256xf32>
    %207 = arith.addf %164, %206 : vector<6x256xf32>
    %208 = arith.maximumf %203, %207 : vector<6x256xf32>
    %c7_144 = arith.constant 7 : index
    %c0_145 = arith.constant 0 : index
    %c0_146 = arith.constant 0 : index
    %209 = vector.load %arg4[%c7_144, %c0_145, %c0_146] : memref<9x1x256xf32, #tpu.memory_space<vmem>>, vector<1x1x256xf32>
    %210 = vector.shape_cast %209 : vector<1x1x256xf32> to vector<1x256xf32>
    %211 = vector.broadcast %210 : vector<1x256xf32> to vector<6x256xf32>
    %212 = arith.addf %169, %211 : vector<6x256xf32>
    %213 = arith.maximumf %208, %212 : vector<6x256xf32>
    %c8_147 = arith.constant 8 : index
    %c0_148 = arith.constant 0 : index
    %c0_149 = arith.constant 0 : index
    %214 = vector.load %arg4[%c8_147, %c0_148, %c0_149] : memref<9x1x256xf32, #tpu.memory_space<vmem>>, vector<1x1x256xf32>
    %215 = vector.shape_cast %214 : vector<1x1x256xf32> to vector<1x256xf32>
    %216 = vector.broadcast %215 : vector<1x256xf32> to vector<6x256xf32>
    %217 = arith.addf %174, %216 : vector<6x256xf32>
    %218 = arith.maximumf %213, %217 : vector<6x256xf32>
    %c0_150 = arith.constant 0 : index
    %c0_151 = arith.constant 0 : index
    %219 = vector.load %arg14[%c0_150, %c0_151] : memref<6x9xf32, #tpu.memory_space<vmem>>, vector<6x9xf32>
    %c0_152 = arith.constant 0 : index
    %c0_153 = arith.constant 0 : index
    %220 = vector.load %arg15[%c0_152, %c0_153] : memref<6x1xf32, #tpu.memory_space<vmem>>, vector<6x1xf32>
    %221 = vector.extract_strided_slice %219 {offsets = [0, 0], sizes = [6, 1], strides = [1, 1]} : vector<6x9xf32> to vector<6x1xf32>
    %222 = vector.broadcast %221 : vector<6x1xf32> to vector<6x256xf32>
    %223 = arith.mulf %222, %135 : vector<6x256xf32>
    %224 = vector.broadcast %220 : vector<6x1xf32> to vector<6x256xf32>
    %225 = arith.addf %224, %223 : vector<6x256xf32>
    %226 = vector.extract_strided_slice %219 {offsets = [0, 1], sizes = [6, 1], strides = [1, 1]} : vector<6x9xf32> to vector<6x1xf32>
    %227 = vector.broadcast %226 : vector<6x1xf32> to vector<6x256xf32>
    %228 = arith.mulf %227, %140 : vector<6x256xf32>
    %229 = arith.addf %225, %228 : vector<6x256xf32>
    %230 = vector.extract_strided_slice %219 {offsets = [0, 2], sizes = [6, 1], strides = [1, 1]} : vector<6x9xf32> to vector<6x1xf32>
    %231 = vector.broadcast %230 : vector<6x1xf32> to vector<6x256xf32>
    %232 = arith.mulf %231, %145 : vector<6x256xf32>
    %233 = arith.addf %229, %232 : vector<6x256xf32>
    %234 = vector.extract_strided_slice %219 {offsets = [0, 3], sizes = [6, 1], strides = [1, 1]} : vector<6x9xf32> to vector<6x1xf32>
    %235 = vector.broadcast %234 : vector<6x1xf32> to vector<6x256xf32>
    %236 = arith.mulf %235, %150 : vector<6x256xf32>
    %237 = arith.addf %233, %236 : vector<6x256xf32>
    %238 = vector.extract_strided_slice %219 {offsets = [0, 4], sizes = [6, 1], strides = [1, 1]} : vector<6x9xf32> to vector<6x1xf32>
    %239 = vector.broadcast %238 : vector<6x1xf32> to vector<6x256xf32>
    %240 = arith.mulf %239, %154 : vector<6x256xf32>
    %241 = arith.addf %237, %240 : vector<6x256xf32>
    %242 = vector.extract_strided_slice %219 {offsets = [0, 5], sizes = [6, 1], strides = [1, 1]} : vector<6x9xf32> to vector<6x1xf32>
    %243 = vector.broadcast %242 : vector<6x1xf32> to vector<6x256xf32>
    %244 = arith.mulf %243, %159 : vector<6x256xf32>
    %245 = arith.addf %241, %244 : vector<6x256xf32>
    %246 = vector.extract_strided_slice %219 {offsets = [0, 6], sizes = [6, 1], strides = [1, 1]} : vector<6x9xf32> to vector<6x1xf32>
    %247 = vector.broadcast %246 : vector<6x1xf32> to vector<6x256xf32>
    %248 = arith.mulf %247, %164 : vector<6x256xf32>
    %249 = arith.addf %245, %248 : vector<6x256xf32>
    %250 = vector.extract_strided_slice %219 {offsets = [0, 7], sizes = [6, 1], strides = [1, 1]} : vector<6x9xf32> to vector<6x1xf32>
    %251 = vector.broadcast %250 : vector<6x1xf32> to vector<6x256xf32>
    %252 = arith.mulf %251, %169 : vector<6x256xf32>
    %253 = arith.addf %249, %252 : vector<6x256xf32>
    %254 = vector.extract_strided_slice %219 {offsets = [0, 8], sizes = [6, 1], strides = [1, 1]} : vector<6x9xf32> to vector<6x1xf32>
    %255 = vector.broadcast %254 : vector<6x1xf32> to vector<6x256xf32>
    %256 = arith.mulf %255, %174 : vector<6x256xf32>
    %257 = arith.addf %253, %256 : vector<6x256xf32>
    %258 = arith.mulf %218, %257 : vector<6x256xf32>
    %c0_154 = arith.constant 0 : index
    %c0_155 = arith.constant 0 : index
    %c0_156 = arith.constant 0 : index
    %259 = vector.load %arg18[%c0_154, %c0_155, %c0_156] : memref<6x6x9xf32, #tpu.memory_space<vmem>>, vector<1x6x9xf32>
    %260 = vector.shape_cast %259 : vector<1x6x9xf32> to vector<6x9xf32>
    %c0_157 = arith.constant 0 : index
    %c0_158 = arith.constant 0 : index
    %c0_159 = arith.constant 0 : index
    %261 = vector.load %arg19[%c0_157, %c0_158, %c0_159] : memref<6x6x1xf32, #tpu.memory_space<vmem>>, vector<1x6x1xf32>
    %262 = vector.shape_cast %261 : vector<1x6x1xf32> to vector<6x1xf32>
    %263 = vector.extract_strided_slice %260 {offsets = [0, 0], sizes = [6, 1], strides = [1, 1]} : vector<6x9xf32> to vector<6x1xf32>
    %264 = vector.broadcast %263 : vector<6x1xf32> to vector<6x256xf32>
    %265 = arith.mulf %264, %135 : vector<6x256xf32>
    %266 = vector.broadcast %262 : vector<6x1xf32> to vector<6x256xf32>
    %267 = arith.addf %266, %265 : vector<6x256xf32>
    %268 = vector.extract_strided_slice %260 {offsets = [0, 1], sizes = [6, 1], strides = [1, 1]} : vector<6x9xf32> to vector<6x1xf32>
    %269 = vector.broadcast %268 : vector<6x1xf32> to vector<6x256xf32>
    %270 = arith.mulf %269, %140 : vector<6x256xf32>
    %271 = arith.addf %267, %270 : vector<6x256xf32>
    %272 = vector.extract_strided_slice %260 {offsets = [0, 2], sizes = [6, 1], strides = [1, 1]} : vector<6x9xf32> to vector<6x1xf32>
    %273 = vector.broadcast %272 : vector<6x1xf32> to vector<6x256xf32>
    %274 = arith.mulf %273, %145 : vector<6x256xf32>
    %275 = arith.addf %271, %274 : vector<6x256xf32>
    %276 = vector.extract_strided_slice %260 {offsets = [0, 3], sizes = [6, 1], strides = [1, 1]} : vector<6x9xf32> to vector<6x1xf32>
    %277 = vector.broadcast %276 : vector<6x1xf32> to vector<6x256xf32>
    %278 = arith.mulf %277, %150 : vector<6x256xf32>
    %279 = arith.addf %275, %278 : vector<6x256xf32>
    %280 = vector.extract_strided_slice %260 {offsets = [0, 4], sizes = [6, 1], strides = [1, 1]} : vector<6x9xf32> to vector<6x1xf32>
    %281 = vector.broadcast %280 : vector<6x1xf32> to vector<6x256xf32>
    %282 = arith.mulf %281, %154 : vector<6x256xf32>
    %283 = arith.addf %279, %282 : vector<6x256xf32>
    %284 = vector.extract_strided_slice %260 {offsets = [0, 5], sizes = [6, 1], strides = [1, 1]} : vector<6x9xf32> to vector<6x1xf32>
    %285 = vector.broadcast %284 : vector<6x1xf32> to vector<6x256xf32>
    %286 = arith.mulf %285, %159 : vector<6x256xf32>
    %287 = arith.addf %283, %286 : vector<6x256xf32>
    %288 = vector.extract_strided_slice %260 {offsets = [0, 6], sizes = [6, 1], strides = [1, 1]} : vector<6x9xf32> to vector<6x1xf32>
    %289 = vector.broadcast %288 : vector<6x1xf32> to vector<6x256xf32>
    %290 = arith.mulf %289, %164 : vector<6x256xf32>
    %291 = arith.addf %287, %290 : vector<6x256xf32>
    %292 = vector.extract_strided_slice %260 {offsets = [0, 7], sizes = [6, 1], strides = [1, 1]} : vector<6x9xf32> to vector<6x1xf32>
    %293 = vector.broadcast %292 : vector<6x1xf32> to vector<6x256xf32>
    %294 = arith.mulf %293, %169 : vector<6x256xf32>
    %295 = arith.addf %291, %294 : vector<6x256xf32>
    %296 = vector.extract_strided_slice %260 {offsets = [0, 8], sizes = [6, 1], strides = [1, 1]} : vector<6x9xf32> to vector<6x1xf32>
    %297 = vector.broadcast %296 : vector<6x1xf32> to vector<6x256xf32>
    %298 = arith.mulf %297, %174 : vector<6x256xf32>
    %299 = arith.addf %295, %298 : vector<6x256xf32>
    %c0_160 = arith.constant 0 : index
    %c0_161 = arith.constant 0 : index
    %c0_162 = arith.constant 0 : index
    %300 = vector.load %arg16[%c0_160, %c0_161, %c0_162] : memref<4x6x9xf32, #tpu.memory_space<vmem>>, vector<1x6x9xf32>
    %301 = vector.shape_cast %300 : vector<1x6x9xf32> to vector<6x9xf32>
    %c0_163 = arith.constant 0 : index
    %c0_164 = arith.constant 0 : index
    %c0_165 = arith.constant 0 : index
    %302 = vector.load %arg17[%c0_163, %c0_164, %c0_165] : memref<4x6x1xf32, #tpu.memory_space<vmem>>, vector<1x6x1xf32>
    %303 = vector.shape_cast %302 : vector<1x6x1xf32> to vector<6x1xf32>
    %304 = vector.extract_strided_slice %301 {offsets = [0, 0], sizes = [6, 1], strides = [1, 1]} : vector<6x9xf32> to vector<6x1xf32>
    %305 = vector.broadcast %304 : vector<6x1xf32> to vector<6x256xf32>
    %306 = arith.mulf %305, %135 : vector<6x256xf32>
    %307 = vector.broadcast %303 : vector<6x1xf32> to vector<6x256xf32>
    %308 = arith.addf %307, %306 : vector<6x256xf32>
    %309 = vector.extract_strided_slice %301 {offsets = [0, 1], sizes = [6, 1], strides = [1, 1]} : vector<6x9xf32> to vector<6x1xf32>
    %310 = vector.broadcast %309 : vector<6x1xf32> to vector<6x256xf32>
    %311 = arith.mulf %310, %140 : vector<6x256xf32>
    %312 = arith.addf %308, %311 : vector<6x256xf32>
    %313 = vector.extract_strided_slice %301 {offsets = [0, 2], sizes = [6, 1], strides = [1, 1]} : vector<6x9xf32> to vector<6x1xf32>
    %314 = vector.broadcast %313 : vector<6x1xf32> to vector<6x256xf32>
    %315 = arith.mulf %314, %145 : vector<6x256xf32>
    %316 = arith.addf %312, %315 : vector<6x256xf32>
    %317 = vector.extract_strided_slice %301 {offsets = [0, 3], sizes = [6, 1], strides = [1, 1]} : vector<6x9xf32> to vector<6x1xf32>
    %318 = vector.broadcast %317 : vector<6x1xf32> to vector<6x256xf32>
    %319 = arith.mulf %318, %150 : vector<6x256xf32>
    %320 = arith.addf %316, %319 : vector<6x256xf32>
    %321 = vector.extract_strided_slice %301 {offsets = [0, 4], sizes = [6, 1], strides = [1, 1]} : vector<6x9xf32> to vector<6x1xf32>
    %322 = vector.broadcast %321 : vector<6x1xf32> to vector<6x256xf32>
    %323 = arith.mulf %322, %154 : vector<6x256xf32>
    %324 = arith.addf %320, %323 : vector<6x256xf32>
    %325 = vector.extract_strided_slice %301 {offsets = [0, 5], sizes = [6, 1], strides = [1, 1]} : vector<6x9xf32> to vector<6x1xf32>
    %326 = vector.broadcast %325 : vector<6x1xf32> to vector<6x256xf32>
    %327 = arith.mulf %326, %159 : vector<6x256xf32>
    %328 = arith.addf %324, %327 : vector<6x256xf32>
    %329 = vector.extract_strided_slice %301 {offsets = [0, 6], sizes = [6, 1], strides = [1, 1]} : vector<6x9xf32> to vector<6x1xf32>
    %330 = vector.broadcast %329 : vector<6x1xf32> to vector<6x256xf32>
    %331 = arith.mulf %330, %164 : vector<6x256xf32>
    %332 = arith.addf %328, %331 : vector<6x256xf32>
    %333 = vector.extract_strided_slice %301 {offsets = [0, 7], sizes = [6, 1], strides = [1, 1]} : vector<6x9xf32> to vector<6x1xf32>
    %334 = vector.broadcast %333 : vector<6x1xf32> to vector<6x256xf32>
    %335 = arith.mulf %334, %169 : vector<6x256xf32>
    %336 = arith.addf %332, %335 : vector<6x256xf32>
    %337 = vector.extract_strided_slice %301 {offsets = [0, 8], sizes = [6, 1], strides = [1, 1]} : vector<6x9xf32> to vector<6x1xf32>
    %338 = vector.broadcast %337 : vector<6x1xf32> to vector<6x256xf32>
    %339 = arith.mulf %338, %174 : vector<6x256xf32>
    %340 = arith.addf %336, %339 : vector<6x256xf32>
    %341 = arith.mulf %299, %340 : vector<6x256xf32>
    %c1_166 = arith.constant 1 : index
    %c0_167 = arith.constant 0 : index
    %c0_168 = arith.constant 0 : index
    %342 = vector.load %arg18[%c1_166, %c0_167, %c0_168] : memref<6x6x9xf32, #tpu.memory_space<vmem>>, vector<1x6x9xf32>
    %343 = vector.shape_cast %342 : vector<1x6x9xf32> to vector<6x9xf32>
    %c1_169 = arith.constant 1 : index
    %c0_170 = arith.constant 0 : index
    %c0_171 = arith.constant 0 : index
    %344 = vector.load %arg19[%c1_169, %c0_170, %c0_171] : memref<6x6x1xf32, #tpu.memory_space<vmem>>, vector<1x6x1xf32>
    %345 = vector.shape_cast %344 : vector<1x6x1xf32> to vector<6x1xf32>
    %346 = vector.extract_strided_slice %343 {offsets = [0, 0], sizes = [6, 1], strides = [1, 1]} : vector<6x9xf32> to vector<6x1xf32>
    %347 = vector.broadcast %346 : vector<6x1xf32> to vector<6x256xf32>
    %348 = arith.mulf %347, %135 : vector<6x256xf32>
    %349 = vector.broadcast %345 : vector<6x1xf32> to vector<6x256xf32>
    %350 = arith.addf %349, %348 : vector<6x256xf32>
    %351 = vector.extract_strided_slice %343 {offsets = [0, 1], sizes = [6, 1], strides = [1, 1]} : vector<6x9xf32> to vector<6x1xf32>
    %352 = vector.broadcast %351 : vector<6x1xf32> to vector<6x256xf32>
    %353 = arith.mulf %352, %140 : vector<6x256xf32>
    %354 = arith.addf %350, %353 : vector<6x256xf32>
    %355 = vector.extract_strided_slice %343 {offsets = [0, 2], sizes = [6, 1], strides = [1, 1]} : vector<6x9xf32> to vector<6x1xf32>
    %356 = vector.broadcast %355 : vector<6x1xf32> to vector<6x256xf32>
    %357 = arith.mulf %356, %145 : vector<6x256xf32>
    %358 = arith.addf %354, %357 : vector<6x256xf32>
    %359 = vector.extract_strided_slice %343 {offsets = [0, 3], sizes = [6, 1], strides = [1, 1]} : vector<6x9xf32> to vector<6x1xf32>
    %360 = vector.broadcast %359 : vector<6x1xf32> to vector<6x256xf32>
    %361 = arith.mulf %360, %150 : vector<6x256xf32>
    %362 = arith.addf %358, %361 : vector<6x256xf32>
    %363 = vector.extract_strided_slice %343 {offsets = [0, 4], sizes = [6, 1], strides = [1, 1]} : vector<6x9xf32> to vector<6x1xf32>
    %364 = vector.broadcast %363 : vector<6x1xf32> to vector<6x256xf32>
    %365 = arith.mulf %364, %154 : vector<6x256xf32>
    %366 = arith.addf %362, %365 : vector<6x256xf32>
    %367 = vector.extract_strided_slice %343 {offsets = [0, 5], sizes = [6, 1], strides = [1, 1]} : vector<6x9xf32> to vector<6x1xf32>
    %368 = vector.broadcast %367 : vector<6x1xf32> to vector<6x256xf32>
    %369 = arith.mulf %368, %159 : vector<6x256xf32>
    %370 = arith.addf %366, %369 : vector<6x256xf32>
    %371 = vector.extract_strided_slice %343 {offsets = [0, 6], sizes = [6, 1], strides = [1, 1]} : vector<6x9xf32> to vector<6x1xf32>
    %372 = vector.broadcast %371 : vector<6x1xf32> to vector<6x256xf32>
    %373 = arith.mulf %372, %164 : vector<6x256xf32>
    %374 = arith.addf %370, %373 : vector<6x256xf32>
    %375 = vector.extract_strided_slice %343 {offsets = [0, 7], sizes = [6, 1], strides = [1, 1]} : vector<6x9xf32> to vector<6x1xf32>
    %376 = vector.broadcast %375 : vector<6x1xf32> to vector<6x256xf32>
    %377 = arith.mulf %376, %169 : vector<6x256xf32>
    %378 = arith.addf %374, %377 : vector<6x256xf32>
    %379 = vector.extract_strided_slice %343 {offsets = [0, 8], sizes = [6, 1], strides = [1, 1]} : vector<6x9xf32> to vector<6x1xf32>
    %380 = vector.broadcast %379 : vector<6x1xf32> to vector<6x256xf32>
    %381 = arith.mulf %380, %174 : vector<6x256xf32>
    %382 = arith.addf %378, %381 : vector<6x256xf32>
    %c1_172 = arith.constant 1 : index
    %c0_173 = arith.constant 0 : index
    %c0_174 = arith.constant 0 : index
    %383 = vector.load %arg16[%c1_172, %c0_173, %c0_174] : memref<4x6x9xf32, #tpu.memory_space<vmem>>, vector<1x6x9xf32>
    %384 = vector.shape_cast %383 : vector<1x6x9xf32> to vector<6x9xf32>
    %c1_175 = arith.constant 1 : index
    %c0_176 = arith.constant 0 : index
    %c0_177 = arith.constant 0 : index
    %385 = vector.load %arg17[%c1_175, %c0_176, %c0_177] : memref<4x6x1xf32, #tpu.memory_space<vmem>>, vector<1x6x1xf32>
    %386 = vector.shape_cast %385 : vector<1x6x1xf32> to vector<6x1xf32>
    %387 = vector.extract_strided_slice %384 {offsets = [0, 0], sizes = [6, 1], strides = [1, 1]} : vector<6x9xf32> to vector<6x1xf32>
    %388 = vector.broadcast %387 : vector<6x1xf32> to vector<6x256xf32>
    %389 = arith.mulf %388, %135 : vector<6x256xf32>
    %390 = vector.broadcast %386 : vector<6x1xf32> to vector<6x256xf32>
    %391 = arith.addf %390, %389 : vector<6x256xf32>
    %392 = vector.extract_strided_slice %384 {offsets = [0, 1], sizes = [6, 1], strides = [1, 1]} : vector<6x9xf32> to vector<6x1xf32>
    %393 = vector.broadcast %392 : vector<6x1xf32> to vector<6x256xf32>
    %394 = arith.mulf %393, %140 : vector<6x256xf32>
    %395 = arith.addf %391, %394 : vector<6x256xf32>
    %396 = vector.extract_strided_slice %384 {offsets = [0, 2], sizes = [6, 1], strides = [1, 1]} : vector<6x9xf32> to vector<6x1xf32>
    %397 = vector.broadcast %396 : vector<6x1xf32> to vector<6x256xf32>
    %398 = arith.mulf %397, %145 : vector<6x256xf32>
    %399 = arith.addf %395, %398 : vector<6x256xf32>
    %400 = vector.extract_strided_slice %384 {offsets = [0, 3], sizes = [6, 1], strides = [1, 1]} : vector<6x9xf32> to vector<6x1xf32>
    %401 = vector.broadcast %400 : vector<6x1xf32> to vector<6x256xf32>
    %402 = arith.mulf %401, %150 : vector<6x256xf32>
    %403 = arith.addf %399, %402 : vector<6x256xf32>
    %404 = vector.extract_strided_slice %384 {offsets = [0, 4], sizes = [6, 1], strides = [1, 1]} : vector<6x9xf32> to vector<6x1xf32>
    %405 = vector.broadcast %404 : vector<6x1xf32> to vector<6x256xf32>
    %406 = arith.mulf %405, %154 : vector<6x256xf32>
    %407 = arith.addf %403, %406 : vector<6x256xf32>
    %408 = vector.extract_strided_slice %384 {offsets = [0, 5], sizes = [6, 1], strides = [1, 1]} : vector<6x9xf32> to vector<6x1xf32>
    %409 = vector.broadcast %408 : vector<6x1xf32> to vector<6x256xf32>
    %410 = arith.mulf %409, %159 : vector<6x256xf32>
    %411 = arith.addf %407, %410 : vector<6x256xf32>
    %412 = vector.extract_strided_slice %384 {offsets = [0, 6], sizes = [6, 1], strides = [1, 1]} : vector<6x9xf32> to vector<6x1xf32>
    %413 = vector.broadcast %412 : vector<6x1xf32> to vector<6x256xf32>
    %414 = arith.mulf %413, %164 : vector<6x256xf32>
    %415 = arith.addf %411, %414 : vector<6x256xf32>
    %416 = vector.extract_strided_slice %384 {offsets = [0, 7], sizes = [6, 1], strides = [1, 1]} : vector<6x9xf32> to vector<6x1xf32>
    %417 = vector.broadcast %416 : vector<6x1xf32> to vector<6x256xf32>
    %418 = arith.mulf %417, %169 : vector<6x256xf32>
    %419 = arith.addf %415, %418 : vector<6x256xf32>
    %420 = vector.extract_strided_slice %384 {offsets = [0, 8], sizes = [6, 1], strides = [1, 1]} : vector<6x9xf32> to vector<6x1xf32>
    %421 = vector.broadcast %420 : vector<6x1xf32> to vector<6x256xf32>
    %422 = arith.mulf %421, %174 : vector<6x256xf32>
    %423 = arith.addf %419, %422 : vector<6x256xf32>
    %424 = arith.mulf %382, %423 : vector<6x256xf32>
    %c2_178 = arith.constant 2 : index
    %c0_179 = arith.constant 0 : index
    %c0_180 = arith.constant 0 : index
    %425 = vector.load %arg18[%c2_178, %c0_179, %c0_180] : memref<6x6x9xf32, #tpu.memory_space<vmem>>, vector<1x6x9xf32>
    %426 = vector.shape_cast %425 : vector<1x6x9xf32> to vector<6x9xf32>
    %c2_181 = arith.constant 2 : index
    %c0_182 = arith.constant 0 : index
    %c0_183 = arith.constant 0 : index
    %427 = vector.load %arg19[%c2_181, %c0_182, %c0_183] : memref<6x6x1xf32, #tpu.memory_space<vmem>>, vector<1x6x1xf32>
    %428 = vector.shape_cast %427 : vector<1x6x1xf32> to vector<6x1xf32>
    %429 = vector.extract_strided_slice %426 {offsets = [0, 0], sizes = [6, 1], strides = [1, 1]} : vector<6x9xf32> to vector<6x1xf32>
    %430 = vector.broadcast %429 : vector<6x1xf32> to vector<6x256xf32>
    %431 = arith.mulf %430, %135 : vector<6x256xf32>
    %432 = vector.broadcast %428 : vector<6x1xf32> to vector<6x256xf32>
    %433 = arith.addf %432, %431 : vector<6x256xf32>
    %434 = vector.extract_strided_slice %426 {offsets = [0, 1], sizes = [6, 1], strides = [1, 1]} : vector<6x9xf32> to vector<6x1xf32>
    %435 = vector.broadcast %434 : vector<6x1xf32> to vector<6x256xf32>
    %436 = arith.mulf %435, %140 : vector<6x256xf32>
    %437 = arith.addf %433, %436 : vector<6x256xf32>
    %438 = vector.extract_strided_slice %426 {offsets = [0, 2], sizes = [6, 1], strides = [1, 1]} : vector<6x9xf32> to vector<6x1xf32>
    %439 = vector.broadcast %438 : vector<6x1xf32> to vector<6x256xf32>
    %440 = arith.mulf %439, %145 : vector<6x256xf32>
    %441 = arith.addf %437, %440 : vector<6x256xf32>
    %442 = vector.extract_strided_slice %426 {offsets = [0, 3], sizes = [6, 1], strides = [1, 1]} : vector<6x9xf32> to vector<6x1xf32>
    %443 = vector.broadcast %442 : vector<6x1xf32> to vector<6x256xf32>
    %444 = arith.mulf %443, %150 : vector<6x256xf32>
    %445 = arith.addf %441, %444 : vector<6x256xf32>
    %446 = vector.extract_strided_slice %426 {offsets = [0, 4], sizes = [6, 1], strides = [1, 1]} : vector<6x9xf32> to vector<6x1xf32>
    %447 = vector.broadcast %446 : vector<6x1xf32> to vector<6x256xf32>
    %448 = arith.mulf %447, %154 : vector<6x256xf32>
    %449 = arith.addf %445, %448 : vector<6x256xf32>
    %450 = vector.extract_strided_slice %426 {offsets = [0, 5], sizes = [6, 1], strides = [1, 1]} : vector<6x9xf32> to vector<6x1xf32>
    %451 = vector.broadcast %450 : vector<6x1xf32> to vector<6x256xf32>
    %452 = arith.mulf %451, %159 : vector<6x256xf32>
    %453 = arith.addf %449, %452 : vector<6x256xf32>
    %454 = vector.extract_strided_slice %426 {offsets = [0, 6], sizes = [6, 1], strides = [1, 1]} : vector<6x9xf32> to vector<6x1xf32>
    %455 = vector.broadcast %454 : vector<6x1xf32> to vector<6x256xf32>
    %456 = arith.mulf %455, %164 : vector<6x256xf32>
    %457 = arith.addf %453, %456 : vector<6x256xf32>
    %458 = vector.extract_strided_slice %426 {offsets = [0, 7], sizes = [6, 1], strides = [1, 1]} : vector<6x9xf32> to vector<6x1xf32>
    %459 = vector.broadcast %458 : vector<6x1xf32> to vector<6x256xf32>
    %460 = arith.mulf %459, %169 : vector<6x256xf32>
    %461 = arith.addf %457, %460 : vector<6x256xf32>
    %462 = vector.extract_strided_slice %426 {offsets = [0, 8], sizes = [6, 1], strides = [1, 1]} : vector<6x9xf32> to vector<6x1xf32>
    %463 = vector.broadcast %462 : vector<6x1xf32> to vector<6x256xf32>
    %464 = arith.mulf %463, %174 : vector<6x256xf32>
    %465 = arith.addf %461, %464 : vector<6x256xf32>
    %c2_184 = arith.constant 2 : index
    %c0_185 = arith.constant 0 : index
    %c0_186 = arith.constant 0 : index
    %466 = vector.load %arg16[%c2_184, %c0_185, %c0_186] : memref<4x6x9xf32, #tpu.memory_space<vmem>>, vector<1x6x9xf32>
    %467 = vector.shape_cast %466 : vector<1x6x9xf32> to vector<6x9xf32>
    %c2_187 = arith.constant 2 : index
    %c0_188 = arith.constant 0 : index
    %c0_189 = arith.constant 0 : index
    %468 = vector.load %arg17[%c2_187, %c0_188, %c0_189] : memref<4x6x1xf32, #tpu.memory_space<vmem>>, vector<1x6x1xf32>
    %469 = vector.shape_cast %468 : vector<1x6x1xf32> to vector<6x1xf32>
    %470 = vector.extract_strided_slice %467 {offsets = [0, 0], sizes = [6, 1], strides = [1, 1]} : vector<6x9xf32> to vector<6x1xf32>
    %471 = vector.broadcast %470 : vector<6x1xf32> to vector<6x256xf32>
    %472 = arith.mulf %471, %135 : vector<6x256xf32>
    %473 = vector.broadcast %469 : vector<6x1xf32> to vector<6x256xf32>
    %474 = arith.addf %473, %472 : vector<6x256xf32>
    %475 = vector.extract_strided_slice %467 {offsets = [0, 1], sizes = [6, 1], strides = [1, 1]} : vector<6x9xf32> to vector<6x1xf32>
    %476 = vector.broadcast %475 : vector<6x1xf32> to vector<6x256xf32>
    %477 = arith.mulf %476, %140 : vector<6x256xf32>
    %478 = arith.addf %474, %477 : vector<6x256xf32>
    %479 = vector.extract_strided_slice %467 {offsets = [0, 2], sizes = [6, 1], strides = [1, 1]} : vector<6x9xf32> to vector<6x1xf32>
    %480 = vector.broadcast %479 : vector<6x1xf32> to vector<6x256xf32>
    %481 = arith.mulf %480, %145 : vector<6x256xf32>
    %482 = arith.addf %478, %481 : vector<6x256xf32>
    %483 = vector.extract_strided_slice %467 {offsets = [0, 3], sizes = [6, 1], strides = [1, 1]} : vector<6x9xf32> to vector<6x1xf32>
    %484 = vector.broadcast %483 : vector<6x1xf32> to vector<6x256xf32>
    %485 = arith.mulf %484, %150 : vector<6x256xf32>
    %486 = arith.addf %482, %485 : vector<6x256xf32>
    %487 = vector.extract_strided_slice %467 {offsets = [0, 4], sizes = [6, 1], strides = [1, 1]} : vector<6x9xf32> to vector<6x1xf32>
    %488 = vector.broadcast %487 : vector<6x1xf32> to vector<6x256xf32>
    %489 = arith.mulf %488, %154 : vector<6x256xf32>
    %490 = arith.addf %486, %489 : vector<6x256xf32>
    %491 = vector.extract_strided_slice %467 {offsets = [0, 5], sizes = [6, 1], strides = [1, 1]} : vector<6x9xf32> to vector<6x1xf32>
    %492 = vector.broadcast %491 : vector<6x1xf32> to vector<6x256xf32>
    %493 = arith.mulf %492, %159 : vector<6x256xf32>
    %494 = arith.addf %490, %493 : vector<6x256xf32>
    %495 = vector.extract_strided_slice %467 {offsets = [0, 6], sizes = [6, 1], strides = [1, 1]} : vector<6x9xf32> to vector<6x1xf32>
    %496 = vector.broadcast %495 : vector<6x1xf32> to vector<6x256xf32>
    %497 = arith.mulf %496, %164 : vector<6x256xf32>
    %498 = arith.addf %494, %497 : vector<6x256xf32>
    %499 = vector.extract_strided_slice %467 {offsets = [0, 7], sizes = [6, 1], strides = [1, 1]} : vector<6x9xf32> to vector<6x1xf32>
    %500 = vector.broadcast %499 : vector<6x1xf32> to vector<6x256xf32>
    %501 = arith.mulf %500, %169 : vector<6x256xf32>
    %502 = arith.addf %498, %501 : vector<6x256xf32>
    %503 = vector.extract_strided_slice %467 {offsets = [0, 8], sizes = [6, 1], strides = [1, 1]} : vector<6x9xf32> to vector<6x1xf32>
    %504 = vector.broadcast %503 : vector<6x1xf32> to vector<6x256xf32>
    %505 = arith.mulf %504, %174 : vector<6x256xf32>
    %506 = arith.addf %502, %505 : vector<6x256xf32>
    %507 = arith.mulf %465, %506 : vector<6x256xf32>
    %c3_190 = arith.constant 3 : index
    %c0_191 = arith.constant 0 : index
    %c0_192 = arith.constant 0 : index
    %508 = vector.load %arg18[%c3_190, %c0_191, %c0_192] : memref<6x6x9xf32, #tpu.memory_space<vmem>>, vector<1x6x9xf32>
    %509 = vector.shape_cast %508 : vector<1x6x9xf32> to vector<6x9xf32>
    %c3_193 = arith.constant 3 : index
    %c0_194 = arith.constant 0 : index
    %c0_195 = arith.constant 0 : index
    %510 = vector.load %arg19[%c3_193, %c0_194, %c0_195] : memref<6x6x1xf32, #tpu.memory_space<vmem>>, vector<1x6x1xf32>
    %511 = vector.shape_cast %510 : vector<1x6x1xf32> to vector<6x1xf32>
    %512 = vector.extract_strided_slice %509 {offsets = [0, 0], sizes = [6, 1], strides = [1, 1]} : vector<6x9xf32> to vector<6x1xf32>
    %513 = vector.broadcast %512 : vector<6x1xf32> to vector<6x256xf32>
    %514 = arith.mulf %513, %135 : vector<6x256xf32>
    %515 = vector.broadcast %511 : vector<6x1xf32> to vector<6x256xf32>
    %516 = arith.addf %515, %514 : vector<6x256xf32>
    %517 = vector.extract_strided_slice %509 {offsets = [0, 1], sizes = [6, 1], strides = [1, 1]} : vector<6x9xf32> to vector<6x1xf32>
    %518 = vector.broadcast %517 : vector<6x1xf32> to vector<6x256xf32>
    %519 = arith.mulf %518, %140 : vector<6x256xf32>
    %520 = arith.addf %516, %519 : vector<6x256xf32>
    %521 = vector.extract_strided_slice %509 {offsets = [0, 2], sizes = [6, 1], strides = [1, 1]} : vector<6x9xf32> to vector<6x1xf32>
    %522 = vector.broadcast %521 : vector<6x1xf32> to vector<6x256xf32>
    %523 = arith.mulf %522, %145 : vector<6x256xf32>
    %524 = arith.addf %520, %523 : vector<6x256xf32>
    %525 = vector.extract_strided_slice %509 {offsets = [0, 3], sizes = [6, 1], strides = [1, 1]} : vector<6x9xf32> to vector<6x1xf32>
    %526 = vector.broadcast %525 : vector<6x1xf32> to vector<6x256xf32>
    %527 = arith.mulf %526, %150 : vector<6x256xf32>
    %528 = arith.addf %524, %527 : vector<6x256xf32>
    %529 = vector.extract_strided_slice %509 {offsets = [0, 4], sizes = [6, 1], strides = [1, 1]} : vector<6x9xf32> to vector<6x1xf32>
    %530 = vector.broadcast %529 : vector<6x1xf32> to vector<6x256xf32>
    %531 = arith.mulf %530, %154 : vector<6x256xf32>
    %532 = arith.addf %528, %531 : vector<6x256xf32>
    %533 = vector.extract_strided_slice %509 {offsets = [0, 5], sizes = [6, 1], strides = [1, 1]} : vector<6x9xf32> to vector<6x1xf32>
    %534 = vector.broadcast %533 : vector<6x1xf32> to vector<6x256xf32>
    %535 = arith.mulf %534, %159 : vector<6x256xf32>
    %536 = arith.addf %532, %535 : vector<6x256xf32>
    %537 = vector.extract_strided_slice %509 {offsets = [0, 6], sizes = [6, 1], strides = [1, 1]} : vector<6x9xf32> to vector<6x1xf32>
    %538 = vector.broadcast %537 : vector<6x1xf32> to vector<6x256xf32>
    %539 = arith.mulf %538, %164 : vector<6x256xf32>
    %540 = arith.addf %536, %539 : vector<6x256xf32>
    %541 = vector.extract_strided_slice %509 {offsets = [0, 7], sizes = [6, 1], strides = [1, 1]} : vector<6x9xf32> to vector<6x1xf32>
    %542 = vector.broadcast %541 : vector<6x1xf32> to vector<6x256xf32>
    %543 = arith.mulf %542, %169 : vector<6x256xf32>
    %544 = arith.addf %540, %543 : vector<6x256xf32>
    %545 = vector.extract_strided_slice %509 {offsets = [0, 8], sizes = [6, 1], strides = [1, 1]} : vector<6x9xf32> to vector<6x1xf32>
    %546 = vector.broadcast %545 : vector<6x1xf32> to vector<6x256xf32>
    %547 = arith.mulf %546, %174 : vector<6x256xf32>
    %548 = arith.addf %544, %547 : vector<6x256xf32>
    %c3_196 = arith.constant 3 : index
    %c0_197 = arith.constant 0 : index
    %c0_198 = arith.constant 0 : index
    %549 = vector.load %arg16[%c3_196, %c0_197, %c0_198] : memref<4x6x9xf32, #tpu.memory_space<vmem>>, vector<1x6x9xf32>
    %550 = vector.shape_cast %549 : vector<1x6x9xf32> to vector<6x9xf32>
    %c3_199 = arith.constant 3 : index
    %c0_200 = arith.constant 0 : index
    %c0_201 = arith.constant 0 : index
    %551 = vector.load %arg17[%c3_199, %c0_200, %c0_201] : memref<4x6x1xf32, #tpu.memory_space<vmem>>, vector<1x6x1xf32>
    %552 = vector.shape_cast %551 : vector<1x6x1xf32> to vector<6x1xf32>
    %553 = vector.extract_strided_slice %550 {offsets = [0, 0], sizes = [6, 1], strides = [1, 1]} : vector<6x9xf32> to vector<6x1xf32>
    %554 = vector.broadcast %553 : vector<6x1xf32> to vector<6x256xf32>
    %555 = arith.mulf %554, %135 : vector<6x256xf32>
    %556 = vector.broadcast %552 : vector<6x1xf32> to vector<6x256xf32>
    %557 = arith.addf %556, %555 : vector<6x256xf32>
    %558 = vector.extract_strided_slice %550 {offsets = [0, 1], sizes = [6, 1], strides = [1, 1]} : vector<6x9xf32> to vector<6x1xf32>
    %559 = vector.broadcast %558 : vector<6x1xf32> to vector<6x256xf32>
    %560 = arith.mulf %559, %140 : vector<6x256xf32>
    %561 = arith.addf %557, %560 : vector<6x256xf32>
    %562 = vector.extract_strided_slice %550 {offsets = [0, 2], sizes = [6, 1], strides = [1, 1]} : vector<6x9xf32> to vector<6x1xf32>
    %563 = vector.broadcast %562 : vector<6x1xf32> to vector<6x256xf32>
    %564 = arith.mulf %563, %145 : vector<6x256xf32>
    %565 = arith.addf %561, %564 : vector<6x256xf32>
    %566 = vector.extract_strided_slice %550 {offsets = [0, 3], sizes = [6, 1], strides = [1, 1]} : vector<6x9xf32> to vector<6x1xf32>
    %567 = vector.broadcast %566 : vector<6x1xf32> to vector<6x256xf32>
    %568 = arith.mulf %567, %150 : vector<6x256xf32>
    %569 = arith.addf %565, %568 : vector<6x256xf32>
    %570 = vector.extract_strided_slice %550 {offsets = [0, 4], sizes = [6, 1], strides = [1, 1]} : vector<6x9xf32> to vector<6x1xf32>
    %571 = vector.broadcast %570 : vector<6x1xf32> to vector<6x256xf32>
    %572 = arith.mulf %571, %154 : vector<6x256xf32>
    %573 = arith.addf %569, %572 : vector<6x256xf32>
    %574 = vector.extract_strided_slice %550 {offsets = [0, 5], sizes = [6, 1], strides = [1, 1]} : vector<6x9xf32> to vector<6x1xf32>
    %575 = vector.broadcast %574 : vector<6x1xf32> to vector<6x256xf32>
    %576 = arith.mulf %575, %159 : vector<6x256xf32>
    %577 = arith.addf %573, %576 : vector<6x256xf32>
    %578 = vector.extract_strided_slice %550 {offsets = [0, 6], sizes = [6, 1], strides = [1, 1]} : vector<6x9xf32> to vector<6x1xf32>
    %579 = vector.broadcast %578 : vector<6x1xf32> to vector<6x256xf32>
    %580 = arith.mulf %579, %164 : vector<6x256xf32>
    %581 = arith.addf %577, %580 : vector<6x256xf32>
    %582 = vector.extract_strided_slice %550 {offsets = [0, 7], sizes = [6, 1], strides = [1, 1]} : vector<6x9xf32> to vector<6x1xf32>
    %583 = vector.broadcast %582 : vector<6x1xf32> to vector<6x256xf32>
    %584 = arith.mulf %583, %169 : vector<6x256xf32>
    %585 = arith.addf %581, %584 : vector<6x256xf32>
    %586 = vector.extract_strided_slice %550 {offsets = [0, 8], sizes = [6, 1], strides = [1, 1]} : vector<6x9xf32> to vector<6x1xf32>
    %587 = vector.broadcast %586 : vector<6x1xf32> to vector<6x256xf32>
    %588 = arith.mulf %587, %174 : vector<6x256xf32>
    %589 = arith.addf %585, %588 : vector<6x256xf32>
    %590 = arith.mulf %548, %589 : vector<6x256xf32>
    %591 = arith.addf %341, %424 : vector<6x256xf32>
    %592 = arith.addf %507, %590 : vector<6x256xf32>
    %c34_i32 = arith.constant 34 : i32
    %593 = tpu.dynamic_rotate %591 by %c34_i32 dim 1 : vector<6x256xf32>, i32 -> vector<6x256xf32>
    %c0_202 = arith.constant 0 : index
    %c0_203 = arith.constant 0 : index
    %c0_204 = arith.constant 0 : index
    %594 = vector.load %arg5[%c0_202, %c0_203, %c0_204] : memref<9x1x256xf32, #tpu.memory_space<vmem>>, vector<1x1x256xf32>
    %595 = vector.shape_cast %594 : vector<1x1x256xf32> to vector<1x256xf32>
    %596 = vector.broadcast %595 : vector<1x256xf32> to vector<6x256xf32>
    %597 = arith.mulf %593, %596 : vector<6x256xf32>
    %c32_i32 = arith.constant 32 : i32
    %598 = tpu.dynamic_rotate %591 by %c32_i32 dim 1 : vector<6x256xf32>, i32 -> vector<6x256xf32>
    %c1_205 = arith.constant 1 : index
    %c0_206 = arith.constant 0 : index
    %c0_207 = arith.constant 0 : index
    %599 = vector.load %arg5[%c1_205, %c0_206, %c0_207] : memref<9x1x256xf32, #tpu.memory_space<vmem>>, vector<1x1x256xf32>
    %600 = vector.shape_cast %599 : vector<1x1x256xf32> to vector<1x256xf32>
    %601 = vector.broadcast %600 : vector<1x256xf32> to vector<6x256xf32>
    %602 = arith.mulf %598, %601 : vector<6x256xf32>
    %c30_i32 = arith.constant 30 : i32
    %603 = tpu.dynamic_rotate %591 by %c30_i32 dim 1 : vector<6x256xf32>, i32 -> vector<6x256xf32>
    %c2_208 = arith.constant 2 : index
    %c0_209 = arith.constant 0 : index
    %c0_210 = arith.constant 0 : index
    %604 = vector.load %arg5[%c2_208, %c0_209, %c0_210] : memref<9x1x256xf32, #tpu.memory_space<vmem>>, vector<1x1x256xf32>
    %605 = vector.shape_cast %604 : vector<1x1x256xf32> to vector<1x256xf32>
    %606 = vector.broadcast %605 : vector<1x256xf32> to vector<6x256xf32>
    %607 = arith.mulf %603, %606 : vector<6x256xf32>
    %c2_i32 = arith.constant 2 : i32
    %608 = tpu.dynamic_rotate %591 by %c2_i32 dim 1 : vector<6x256xf32>, i32 -> vector<6x256xf32>
    %c3_211 = arith.constant 3 : index
    %c0_212 = arith.constant 0 : index
    %c0_213 = arith.constant 0 : index
    %609 = vector.load %arg5[%c3_211, %c0_212, %c0_213] : memref<9x1x256xf32, #tpu.memory_space<vmem>>, vector<1x1x256xf32>
    %610 = vector.shape_cast %609 : vector<1x1x256xf32> to vector<1x256xf32>
    %611 = vector.broadcast %610 : vector<1x256xf32> to vector<6x256xf32>
    %612 = arith.mulf %608, %611 : vector<6x256xf32>
    %c4_214 = arith.constant 4 : index
    %c0_215 = arith.constant 0 : index
    %c0_216 = arith.constant 0 : index
    %613 = vector.load %arg5[%c4_214, %c0_215, %c0_216] : memref<9x1x256xf32, #tpu.memory_space<vmem>>, vector<1x1x256xf32>
    %614 = vector.shape_cast %613 : vector<1x1x256xf32> to vector<1x256xf32>
    %615 = vector.broadcast %614 : vector<1x256xf32> to vector<6x256xf32>
    %616 = arith.mulf %591, %615 : vector<6x256xf32>
    %c254_i32 = arith.constant 254 : i32
    %617 = tpu.dynamic_rotate %591 by %c254_i32 dim 1 : vector<6x256xf32>, i32 -> vector<6x256xf32>
    %c5_217 = arith.constant 5 : index
    %c0_218 = arith.constant 0 : index
    %c0_219 = arith.constant 0 : index
    %618 = vector.load %arg5[%c5_217, %c0_218, %c0_219] : memref<9x1x256xf32, #tpu.memory_space<vmem>>, vector<1x1x256xf32>
    %619 = vector.shape_cast %618 : vector<1x1x256xf32> to vector<1x256xf32>
    %620 = vector.broadcast %619 : vector<1x256xf32> to vector<6x256xf32>
    %621 = arith.mulf %617, %620 : vector<6x256xf32>
    %c226_i32 = arith.constant 226 : i32
    %622 = tpu.dynamic_rotate %591 by %c226_i32 dim 1 : vector<6x256xf32>, i32 -> vector<6x256xf32>
    %c6_220 = arith.constant 6 : index
    %c0_221 = arith.constant 0 : index
    %c0_222 = arith.constant 0 : index
    %623 = vector.load %arg5[%c6_220, %c0_221, %c0_222] : memref<9x1x256xf32, #tpu.memory_space<vmem>>, vector<1x1x256xf32>
    %624 = vector.shape_cast %623 : vector<1x1x256xf32> to vector<1x256xf32>
    %625 = vector.broadcast %624 : vector<1x256xf32> to vector<6x256xf32>
    %626 = arith.mulf %622, %625 : vector<6x256xf32>
    %c224_i32 = arith.constant 224 : i32
    %627 = tpu.dynamic_rotate %591 by %c224_i32 dim 1 : vector<6x256xf32>, i32 -> vector<6x256xf32>
    %c7_223 = arith.constant 7 : index
    %c0_224 = arith.constant 0 : index
    %c0_225 = arith.constant 0 : index
    %628 = vector.load %arg5[%c7_223, %c0_224, %c0_225] : memref<9x1x256xf32, #tpu.memory_space<vmem>>, vector<1x1x256xf32>
    %629 = vector.shape_cast %628 : vector<1x1x256xf32> to vector<1x256xf32>
    %630 = vector.broadcast %629 : vector<1x256xf32> to vector<6x256xf32>
    %631 = arith.mulf %627, %630 : vector<6x256xf32>
    %c222_i32 = arith.constant 222 : i32
    %632 = tpu.dynamic_rotate %591 by %c222_i32 dim 1 : vector<6x256xf32>, i32 -> vector<6x256xf32>
    %c8_226 = arith.constant 8 : index
    %c0_227 = arith.constant 0 : index
    %c0_228 = arith.constant 0 : index
    %633 = vector.load %arg5[%c8_226, %c0_227, %c0_228] : memref<9x1x256xf32, #tpu.memory_space<vmem>>, vector<1x1x256xf32>
    %634 = vector.shape_cast %633 : vector<1x1x256xf32> to vector<1x256xf32>
    %635 = vector.broadcast %634 : vector<1x256xf32> to vector<6x256xf32>
    %636 = arith.mulf %632, %635 : vector<6x256xf32>
    %c34_i32_229 = arith.constant 34 : i32
    %637 = tpu.dynamic_rotate %592 by %c34_i32_229 dim 1 : vector<6x256xf32>, i32 -> vector<6x256xf32>
    %c0_230 = arith.constant 0 : index
    %c0_231 = arith.constant 0 : index
    %c0_232 = arith.constant 0 : index
    %638 = vector.load %arg5[%c0_230, %c0_231, %c0_232] : memref<9x1x256xf32, #tpu.memory_space<vmem>>, vector<1x1x256xf32>
    %639 = vector.shape_cast %638 : vector<1x1x256xf32> to vector<1x256xf32>
    %640 = vector.broadcast %639 : vector<1x256xf32> to vector<6x256xf32>
    %641 = arith.mulf %637, %640 : vector<6x256xf32>
    %c32_i32_233 = arith.constant 32 : i32
    %642 = tpu.dynamic_rotate %592 by %c32_i32_233 dim 1 : vector<6x256xf32>, i32 -> vector<6x256xf32>
    %c1_234 = arith.constant 1 : index
    %c0_235 = arith.constant 0 : index
    %c0_236 = arith.constant 0 : index
    %643 = vector.load %arg5[%c1_234, %c0_235, %c0_236] : memref<9x1x256xf32, #tpu.memory_space<vmem>>, vector<1x1x256xf32>
    %644 = vector.shape_cast %643 : vector<1x1x256xf32> to vector<1x256xf32>
    %645 = vector.broadcast %644 : vector<1x256xf32> to vector<6x256xf32>
    %646 = arith.mulf %642, %645 : vector<6x256xf32>
    %c30_i32_237 = arith.constant 30 : i32
    %647 = tpu.dynamic_rotate %592 by %c30_i32_237 dim 1 : vector<6x256xf32>, i32 -> vector<6x256xf32>
    %c2_238 = arith.constant 2 : index
    %c0_239 = arith.constant 0 : index
    %c0_240 = arith.constant 0 : index
    %648 = vector.load %arg5[%c2_238, %c0_239, %c0_240] : memref<9x1x256xf32, #tpu.memory_space<vmem>>, vector<1x1x256xf32>
    %649 = vector.shape_cast %648 : vector<1x1x256xf32> to vector<1x256xf32>
    %650 = vector.broadcast %649 : vector<1x256xf32> to vector<6x256xf32>
    %651 = arith.mulf %647, %650 : vector<6x256xf32>
    %c2_i32_241 = arith.constant 2 : i32
    %652 = tpu.dynamic_rotate %592 by %c2_i32_241 dim 1 : vector<6x256xf32>, i32 -> vector<6x256xf32>
    %c3_242 = arith.constant 3 : index
    %c0_243 = arith.constant 0 : index
    %c0_244 = arith.constant 0 : index
    %653 = vector.load %arg5[%c3_242, %c0_243, %c0_244] : memref<9x1x256xf32, #tpu.memory_space<vmem>>, vector<1x1x256xf32>
    %654 = vector.shape_cast %653 : vector<1x1x256xf32> to vector<1x256xf32>
    %655 = vector.broadcast %654 : vector<1x256xf32> to vector<6x256xf32>
    %656 = arith.mulf %652, %655 : vector<6x256xf32>
    %c4_245 = arith.constant 4 : index
    %c0_246 = arith.constant 0 : index
    %c0_247 = arith.constant 0 : index
    %657 = vector.load %arg5[%c4_245, %c0_246, %c0_247] : memref<9x1x256xf32, #tpu.memory_space<vmem>>, vector<1x1x256xf32>
    %658 = vector.shape_cast %657 : vector<1x1x256xf32> to vector<1x256xf32>
    %659 = vector.broadcast %658 : vector<1x256xf32> to vector<6x256xf32>
    %660 = arith.mulf %592, %659 : vector<6x256xf32>
    %c254_i32_248 = arith.constant 254 : i32
    %661 = tpu.dynamic_rotate %592 by %c254_i32_248 dim 1 : vector<6x256xf32>, i32 -> vector<6x256xf32>
    %c5_249 = arith.constant 5 : index
    %c0_250 = arith.constant 0 : index
    %c0_251 = arith.constant 0 : index
    %662 = vector.load %arg5[%c5_249, %c0_250, %c0_251] : memref<9x1x256xf32, #tpu.memory_space<vmem>>, vector<1x1x256xf32>
    %663 = vector.shape_cast %662 : vector<1x1x256xf32> to vector<1x256xf32>
    %664 = vector.broadcast %663 : vector<1x256xf32> to vector<6x256xf32>
    %665 = arith.mulf %661, %664 : vector<6x256xf32>
    %c226_i32_252 = arith.constant 226 : i32
    %666 = tpu.dynamic_rotate %592 by %c226_i32_252 dim 1 : vector<6x256xf32>, i32 -> vector<6x256xf32>
    %c6_253 = arith.constant 6 : index
    %c0_254 = arith.constant 0 : index
    %c0_255 = arith.constant 0 : index
    %667 = vector.load %arg5[%c6_253, %c0_254, %c0_255] : memref<9x1x256xf32, #tpu.memory_space<vmem>>, vector<1x1x256xf32>
    %668 = vector.shape_cast %667 : vector<1x1x256xf32> to vector<1x256xf32>
    %669 = vector.broadcast %668 : vector<1x256xf32> to vector<6x256xf32>
    %670 = arith.mulf %666, %669 : vector<6x256xf32>
    %c224_i32_256 = arith.constant 224 : i32
    %671 = tpu.dynamic_rotate %592 by %c224_i32_256 dim 1 : vector<6x256xf32>, i32 -> vector<6x256xf32>
    %c7_257 = arith.constant 7 : index
    %c0_258 = arith.constant 0 : index
    %c0_259 = arith.constant 0 : index
    %672 = vector.load %arg5[%c7_257, %c0_258, %c0_259] : memref<9x1x256xf32, #tpu.memory_space<vmem>>, vector<1x1x256xf32>
    %673 = vector.shape_cast %672 : vector<1x1x256xf32> to vector<1x256xf32>
    %674 = vector.broadcast %673 : vector<1x256xf32> to vector<6x256xf32>
    %675 = arith.mulf %671, %674 : vector<6x256xf32>
    %c222_i32_260 = arith.constant 222 : i32
    %676 = tpu.dynamic_rotate %592 by %c222_i32_260 dim 1 : vector<6x256xf32>, i32 -> vector<6x256xf32>
    %c8_261 = arith.constant 8 : index
    %c0_262 = arith.constant 0 : index
    %c0_263 = arith.constant 0 : index
    %677 = vector.load %arg5[%c8_261, %c0_262, %c0_263] : memref<9x1x256xf32, #tpu.memory_space<vmem>>, vector<1x1x256xf32>
    %678 = vector.shape_cast %677 : vector<1x1x256xf32> to vector<1x256xf32>
    %679 = vector.broadcast %678 : vector<1x256xf32> to vector<6x256xf32>
    %680 = arith.mulf %676, %679 : vector<6x256xf32>
    %c4_264 = arith.constant 4 : index
    %c0_265 = arith.constant 0 : index
    %c0_266 = arith.constant 0 : index
    %681 = vector.load %arg18[%c4_264, %c0_265, %c0_266] : memref<6x6x9xf32, #tpu.memory_space<vmem>>, vector<1x6x9xf32>
    %682 = vector.shape_cast %681 : vector<1x6x9xf32> to vector<6x9xf32>
    %c4_267 = arith.constant 4 : index
    %c0_268 = arith.constant 0 : index
    %c0_269 = arith.constant 0 : index
    %683 = vector.load %arg19[%c4_267, %c0_268, %c0_269] : memref<6x6x1xf32, #tpu.memory_space<vmem>>, vector<1x6x1xf32>
    %684 = vector.shape_cast %683 : vector<1x6x1xf32> to vector<6x1xf32>
    %685 = vector.extract_strided_slice %682 {offsets = [0, 0], sizes = [6, 1], strides = [1, 1]} : vector<6x9xf32> to vector<6x1xf32>
    %686 = vector.broadcast %685 : vector<6x1xf32> to vector<6x256xf32>
    %687 = arith.mulf %686, %597 : vector<6x256xf32>
    %688 = vector.broadcast %684 : vector<6x1xf32> to vector<6x256xf32>
    %689 = arith.addf %688, %687 : vector<6x256xf32>
    %690 = vector.extract_strided_slice %682 {offsets = [0, 1], sizes = [6, 1], strides = [1, 1]} : vector<6x9xf32> to vector<6x1xf32>
    %691 = vector.broadcast %690 : vector<6x1xf32> to vector<6x256xf32>
    %692 = arith.mulf %691, %602 : vector<6x256xf32>
    %693 = arith.addf %689, %692 : vector<6x256xf32>
    %694 = vector.extract_strided_slice %682 {offsets = [0, 2], sizes = [6, 1], strides = [1, 1]} : vector<6x9xf32> to vector<6x1xf32>
    %695 = vector.broadcast %694 : vector<6x1xf32> to vector<6x256xf32>
    %696 = arith.mulf %695, %607 : vector<6x256xf32>
    %697 = arith.addf %693, %696 : vector<6x256xf32>
    %698 = vector.extract_strided_slice %682 {offsets = [0, 3], sizes = [6, 1], strides = [1, 1]} : vector<6x9xf32> to vector<6x1xf32>
    %699 = vector.broadcast %698 : vector<6x1xf32> to vector<6x256xf32>
    %700 = arith.mulf %699, %612 : vector<6x256xf32>
    %701 = arith.addf %697, %700 : vector<6x256xf32>
    %702 = vector.extract_strided_slice %682 {offsets = [0, 4], sizes = [6, 1], strides = [1, 1]} : vector<6x9xf32> to vector<6x1xf32>
    %703 = vector.broadcast %702 : vector<6x1xf32> to vector<6x256xf32>
    %704 = arith.mulf %703, %616 : vector<6x256xf32>
    %705 = arith.addf %701, %704 : vector<6x256xf32>
    %706 = vector.extract_strided_slice %682 {offsets = [0, 5], sizes = [6, 1], strides = [1, 1]} : vector<6x9xf32> to vector<6x1xf32>
    %707 = vector.broadcast %706 : vector<6x1xf32> to vector<6x256xf32>
    %708 = arith.mulf %707, %621 : vector<6x256xf32>
    %709 = arith.addf %705, %708 : vector<6x256xf32>
    %710 = vector.extract_strided_slice %682 {offsets = [0, 6], sizes = [6, 1], strides = [1, 1]} : vector<6x9xf32> to vector<6x1xf32>
    %711 = vector.broadcast %710 : vector<6x1xf32> to vector<6x256xf32>
    %712 = arith.mulf %711, %626 : vector<6x256xf32>
    %713 = arith.addf %709, %712 : vector<6x256xf32>
    %714 = vector.extract_strided_slice %682 {offsets = [0, 7], sizes = [6, 1], strides = [1, 1]} : vector<6x9xf32> to vector<6x1xf32>
    %715 = vector.broadcast %714 : vector<6x1xf32> to vector<6x256xf32>
    %716 = arith.mulf %715, %631 : vector<6x256xf32>
    %717 = arith.addf %713, %716 : vector<6x256xf32>
    %718 = vector.extract_strided_slice %682 {offsets = [0, 8], sizes = [6, 1], strides = [1, 1]} : vector<6x9xf32> to vector<6x1xf32>
    %719 = vector.broadcast %718 : vector<6x1xf32> to vector<6x256xf32>
    %720 = arith.mulf %719, %636 : vector<6x256xf32>
    %721 = arith.addf %717, %720 : vector<6x256xf32>
    %722 = arith.mulf %591, %721 : vector<6x256xf32>
    %723 = arith.addf %258, %722 : vector<6x256xf32>
    %c5_270 = arith.constant 5 : index
    %c0_271 = arith.constant 0 : index
    %c0_272 = arith.constant 0 : index
    %724 = vector.load %arg18[%c5_270, %c0_271, %c0_272] : memref<6x6x9xf32, #tpu.memory_space<vmem>>, vector<1x6x9xf32>
    %725 = vector.shape_cast %724 : vector<1x6x9xf32> to vector<6x9xf32>
    %c5_273 = arith.constant 5 : index
    %c0_274 = arith.constant 0 : index
    %c0_275 = arith.constant 0 : index
    %726 = vector.load %arg19[%c5_273, %c0_274, %c0_275] : memref<6x6x1xf32, #tpu.memory_space<vmem>>, vector<1x6x1xf32>
    %727 = vector.shape_cast %726 : vector<1x6x1xf32> to vector<6x1xf32>
    %728 = vector.extract_strided_slice %725 {offsets = [0, 0], sizes = [6, 1], strides = [1, 1]} : vector<6x9xf32> to vector<6x1xf32>
    %729 = vector.broadcast %728 : vector<6x1xf32> to vector<6x256xf32>
    %730 = arith.mulf %729, %641 : vector<6x256xf32>
    %731 = vector.broadcast %727 : vector<6x1xf32> to vector<6x256xf32>
    %732 = arith.addf %731, %730 : vector<6x256xf32>
    %733 = vector.extract_strided_slice %725 {offsets = [0, 1], sizes = [6, 1], strides = [1, 1]} : vector<6x9xf32> to vector<6x1xf32>
    %734 = vector.broadcast %733 : vector<6x1xf32> to vector<6x256xf32>
    %735 = arith.mulf %734, %646 : vector<6x256xf32>
    %736 = arith.addf %732, %735 : vector<6x256xf32>
    %737 = vector.extract_strided_slice %725 {offsets = [0, 2], sizes = [6, 1], strides = [1, 1]} : vector<6x9xf32> to vector<6x1xf32>
    %738 = vector.broadcast %737 : vector<6x1xf32> to vector<6x256xf32>
    %739 = arith.mulf %738, %651 : vector<6x256xf32>
    %740 = arith.addf %736, %739 : vector<6x256xf32>
    %741 = vector.extract_strided_slice %725 {offsets = [0, 3], sizes = [6, 1], strides = [1, 1]} : vector<6x9xf32> to vector<6x1xf32>
    %742 = vector.broadcast %741 : vector<6x1xf32> to vector<6x256xf32>
    %743 = arith.mulf %742, %656 : vector<6x256xf32>
    %744 = arith.addf %740, %743 : vector<6x256xf32>
    %745 = vector.extract_strided_slice %725 {offsets = [0, 4], sizes = [6, 1], strides = [1, 1]} : vector<6x9xf32> to vector<6x1xf32>
    %746 = vector.broadcast %745 : vector<6x1xf32> to vector<6x256xf32>
    %747 = arith.mulf %746, %660 : vector<6x256xf32>
    %748 = arith.addf %744, %747 : vector<6x256xf32>
    %749 = vector.extract_strided_slice %725 {offsets = [0, 5], sizes = [6, 1], strides = [1, 1]} : vector<6x9xf32> to vector<6x1xf32>
    %750 = vector.broadcast %749 : vector<6x1xf32> to vector<6x256xf32>
    %751 = arith.mulf %750, %665 : vector<6x256xf32>
    %752 = arith.addf %748, %751 : vector<6x256xf32>
    %753 = vector.extract_strided_slice %725 {offsets = [0, 6], sizes = [6, 1], strides = [1, 1]} : vector<6x9xf32> to vector<6x1xf32>
    %754 = vector.broadcast %753 : vector<6x1xf32> to vector<6x256xf32>
    %755 = arith.mulf %754, %670 : vector<6x256xf32>
    %756 = arith.addf %752, %755 : vector<6x256xf32>
    %757 = vector.extract_strided_slice %725 {offsets = [0, 7], sizes = [6, 1], strides = [1, 1]} : vector<6x9xf32> to vector<6x1xf32>
    %758 = vector.broadcast %757 : vector<6x1xf32> to vector<6x256xf32>
    %759 = arith.mulf %758, %675 : vector<6x256xf32>
    %760 = arith.addf %756, %759 : vector<6x256xf32>
    %761 = vector.extract_strided_slice %725 {offsets = [0, 8], sizes = [6, 1], strides = [1, 1]} : vector<6x9xf32> to vector<6x1xf32>
    %762 = vector.broadcast %761 : vector<6x1xf32> to vector<6x256xf32>
    %763 = arith.mulf %762, %680 : vector<6x256xf32>
    %764 = arith.addf %760, %763 : vector<6x256xf32>
    %765 = arith.mulf %592, %764 : vector<6x256xf32>
    %766 = arith.addf %723, %765 : vector<6x256xf32>
    %c0_276 = arith.constant 0 : index
    %c0_277 = arith.constant 0 : index
    %c0_278 = arith.constant 0 : index
    %767 = vector.load %arg20[%c0_276, %c0_277, %c0_278] : memref<2x6x1xf32, #tpu.memory_space<vmem>>, vector<1x6x1xf32>
    %768 = vector.shape_cast %767 : vector<1x6x1xf32> to vector<6x1xf32>
    %769 = vector.broadcast %768 : vector<6x1xf32> to vector<6x256xf32>
    %770 = arith.mulf %766, %769 : vector<6x256xf32>
    %c1_279 = arith.constant 1 : index
    %c0_280 = arith.constant 0 : index
    %c0_281 = arith.constant 0 : index
    %771 = vector.load %arg20[%c1_279, %c0_280, %c0_281] : memref<2x6x1xf32, #tpu.memory_space<vmem>>, vector<1x6x1xf32>
    %772 = vector.shape_cast %771 : vector<1x6x1xf32> to vector<6x1xf32>
    %773 = vector.broadcast %772 : vector<6x1xf32> to vector<6x256xf32>
    %774 = arith.addf %770, %773 : vector<6x256xf32>
    %cst_282 = arith.constant 0.000000e+00 : f32
    %775 = vector.broadcast %cst_282 : f32 to vector<6x256xf32>
    %776 = arith.maximumf %774, %775 : vector<6x256xf32>
    %c0_283 = arith.constant 0 : index
    %c0_284 = arith.constant 0 : index
    %777 = vector.load %arg21[%c0_283, %c0_284] : memref<8x6xf32, #tpu.memory_space<vmem>>, vector<8x6xf32>
    %cst_285 = arith.constant dense<0.000000e+00> : vector<8x256xf32>
    %778 = tpu.matmul %777, %776, %cst_285 {dimension_numbers = #tpu.dot_dimension_numbers<[1], [0], [0], [1], [0, 0, 1, 1], [], []>} : vector<8x6xf32>, vector<6x256xf32>, vector<8x256xf32> -> vector<8x256xf32>
    %c0_286 = arith.constant 0 : index
    %c0_287 = arith.constant 0 : index
    %c0_288 = arith.constant 0 : index
    %779 = vector.load %arg22[%c0_286, %c0_287, %c0_288] : memref<2x8x1xf32, #tpu.memory_space<vmem>>, vector<1x8x1xf32>
    %780 = vector.shape_cast %779 : vector<1x8x1xf32> to vector<8x1xf32>
    %781 = vector.broadcast %780 : vector<8x1xf32> to vector<8x256xf32>
    %782 = arith.mulf %778, %781 : vector<8x256xf32>
    %c1_289 = arith.constant 1 : index
    %c0_290 = arith.constant 0 : index
    %c0_291 = arith.constant 0 : index
    %783 = vector.load %arg22[%c1_289, %c0_290, %c0_291] : memref<2x8x1xf32, #tpu.memory_space<vmem>>, vector<1x8x1xf32>
    %784 = vector.shape_cast %783 : vector<1x8x1xf32> to vector<8x1xf32>
    %785 = vector.broadcast %784 : vector<8x1xf32> to vector<8x256xf32>
    %786 = arith.addf %782, %785 : vector<8x256xf32>
    %cst_292 = arith.constant 0.000000e+00 : f32
    %787 = vector.broadcast %cst_292 : f32 to vector<8x256xf32>
    %788 = arith.maximumf %786, %787 : vector<8x256xf32>
    %c34_i32_293 = arith.constant 34 : i32
    %789 = tpu.dynamic_rotate %788 by %c34_i32_293 dim 1 : vector<8x256xf32>, i32 -> vector<8x256xf32>
    %c0_294 = arith.constant 0 : index
    %c0_295 = arith.constant 0 : index
    %c0_296 = arith.constant 0 : index
    %790 = vector.load %arg5[%c0_294, %c0_295, %c0_296] : memref<9x1x256xf32, #tpu.memory_space<vmem>>, vector<1x1x256xf32>
    %791 = vector.shape_cast %790 : vector<1x1x256xf32> to vector<1x256xf32>
    %792 = vector.broadcast %791 : vector<1x256xf32> to vector<8x256xf32>
    %793 = arith.mulf %789, %792 : vector<8x256xf32>
    %c32_i32_297 = arith.constant 32 : i32
    %794 = tpu.dynamic_rotate %788 by %c32_i32_297 dim 1 : vector<8x256xf32>, i32 -> vector<8x256xf32>
    %c1_298 = arith.constant 1 : index
    %c0_299 = arith.constant 0 : index
    %c0_300 = arith.constant 0 : index
    %795 = vector.load %arg5[%c1_298, %c0_299, %c0_300] : memref<9x1x256xf32, #tpu.memory_space<vmem>>, vector<1x1x256xf32>
    %796 = vector.shape_cast %795 : vector<1x1x256xf32> to vector<1x256xf32>
    %797 = vector.broadcast %796 : vector<1x256xf32> to vector<8x256xf32>
    %798 = arith.mulf %794, %797 : vector<8x256xf32>
    %c30_i32_301 = arith.constant 30 : i32
    %799 = tpu.dynamic_rotate %788 by %c30_i32_301 dim 1 : vector<8x256xf32>, i32 -> vector<8x256xf32>
    %c2_302 = arith.constant 2 : index
    %c0_303 = arith.constant 0 : index
    %c0_304 = arith.constant 0 : index
    %800 = vector.load %arg5[%c2_302, %c0_303, %c0_304] : memref<9x1x256xf32, #tpu.memory_space<vmem>>, vector<1x1x256xf32>
    %801 = vector.shape_cast %800 : vector<1x1x256xf32> to vector<1x256xf32>
    %802 = vector.broadcast %801 : vector<1x256xf32> to vector<8x256xf32>
    %803 = arith.mulf %799, %802 : vector<8x256xf32>
    %c2_i32_305 = arith.constant 2 : i32
    %804 = tpu.dynamic_rotate %788 by %c2_i32_305 dim 1 : vector<8x256xf32>, i32 -> vector<8x256xf32>
    %c3_306 = arith.constant 3 : index
    %c0_307 = arith.constant 0 : index
    %c0_308 = arith.constant 0 : index
    %805 = vector.load %arg5[%c3_306, %c0_307, %c0_308] : memref<9x1x256xf32, #tpu.memory_space<vmem>>, vector<1x1x256xf32>
    %806 = vector.shape_cast %805 : vector<1x1x256xf32> to vector<1x256xf32>
    %807 = vector.broadcast %806 : vector<1x256xf32> to vector<8x256xf32>
    %808 = arith.mulf %804, %807 : vector<8x256xf32>
    %c4_309 = arith.constant 4 : index
    %c0_310 = arith.constant 0 : index
    %c0_311 = arith.constant 0 : index
    %809 = vector.load %arg5[%c4_309, %c0_310, %c0_311] : memref<9x1x256xf32, #tpu.memory_space<vmem>>, vector<1x1x256xf32>
    %810 = vector.shape_cast %809 : vector<1x1x256xf32> to vector<1x256xf32>
    %811 = vector.broadcast %810 : vector<1x256xf32> to vector<8x256xf32>
    %812 = arith.mulf %788, %811 : vector<8x256xf32>
    %c254_i32_312 = arith.constant 254 : i32
    %813 = tpu.dynamic_rotate %788 by %c254_i32_312 dim 1 : vector<8x256xf32>, i32 -> vector<8x256xf32>
    %c5_313 = arith.constant 5 : index
    %c0_314 = arith.constant 0 : index
    %c0_315 = arith.constant 0 : index
    %814 = vector.load %arg5[%c5_313, %c0_314, %c0_315] : memref<9x1x256xf32, #tpu.memory_space<vmem>>, vector<1x1x256xf32>
    %815 = vector.shape_cast %814 : vector<1x1x256xf32> to vector<1x256xf32>
    %816 = vector.broadcast %815 : vector<1x256xf32> to vector<8x256xf32>
    %817 = arith.mulf %813, %816 : vector<8x256xf32>
    %c226_i32_316 = arith.constant 226 : i32
    %818 = tpu.dynamic_rotate %788 by %c226_i32_316 dim 1 : vector<8x256xf32>, i32 -> vector<8x256xf32>
    %c6_317 = arith.constant 6 : index
    %c0_318 = arith.constant 0 : index
    %c0_319 = arith.constant 0 : index
    %819 = vector.load %arg5[%c6_317, %c0_318, %c0_319] : memref<9x1x256xf32, #tpu.memory_space<vmem>>, vector<1x1x256xf32>
    %820 = vector.shape_cast %819 : vector<1x1x256xf32> to vector<1x256xf32>
    %821 = vector.broadcast %820 : vector<1x256xf32> to vector<8x256xf32>
    %822 = arith.mulf %818, %821 : vector<8x256xf32>
    %c224_i32_320 = arith.constant 224 : i32
    %823 = tpu.dynamic_rotate %788 by %c224_i32_320 dim 1 : vector<8x256xf32>, i32 -> vector<8x256xf32>
    %c7_321 = arith.constant 7 : index
    %c0_322 = arith.constant 0 : index
    %c0_323 = arith.constant 0 : index
    %824 = vector.load %arg5[%c7_321, %c0_322, %c0_323] : memref<9x1x256xf32, #tpu.memory_space<vmem>>, vector<1x1x256xf32>
    %825 = vector.shape_cast %824 : vector<1x1x256xf32> to vector<1x256xf32>
    %826 = vector.broadcast %825 : vector<1x256xf32> to vector<8x256xf32>
    %827 = arith.mulf %823, %826 : vector<8x256xf32>
    %c222_i32_324 = arith.constant 222 : i32
    %828 = tpu.dynamic_rotate %788 by %c222_i32_324 dim 1 : vector<8x256xf32>, i32 -> vector<8x256xf32>
    %c8_325 = arith.constant 8 : index
    %c0_326 = arith.constant 0 : index
    %c0_327 = arith.constant 0 : index
    %829 = vector.load %arg5[%c8_325, %c0_326, %c0_327] : memref<9x1x256xf32, #tpu.memory_space<vmem>>, vector<1x1x256xf32>
    %830 = vector.shape_cast %829 : vector<1x1x256xf32> to vector<1x256xf32>
    %831 = vector.broadcast %830 : vector<1x256xf32> to vector<8x256xf32>
    %832 = arith.mulf %828, %831 : vector<8x256xf32>
    %833 = tpu.concatenate %793, %798, %803, %808, %812, %817, %822, %827, %832 in 0 : vector<8x256xf32>, vector<8x256xf32>, vector<8x256xf32>, vector<8x256xf32>, vector<8x256xf32>, vector<8x256xf32>, vector<8x256xf32>, vector<8x256xf32>, vector<8x256xf32> -> vector<72x256xf32>
    %c0_328 = arith.constant 0 : index
    %c0_329 = arith.constant 0 : index
    %834 = vector.load %arg23[%c0_328, %c0_329] : memref<4x72xf32, #tpu.memory_space<vmem>>, vector<4x72xf32>
    %cst_330 = arith.constant dense<0.000000e+00> : vector<4x256xf32>
    %835 = tpu.matmul %834, %833, %cst_330 {dimension_numbers = #tpu.dot_dimension_numbers<[1], [0], [0], [1], [0, 0, 1, 1], [], []>} : vector<4x72xf32>, vector<72x256xf32>, vector<4x256xf32> -> vector<4x256xf32>
    %836 = tpu.concatenate %766, %835 in 0 : vector<6x256xf32>, vector<4x256xf32> -> vector<10x256xf32>
    %c0_331 = arith.constant 0 : index
    %c0_332 = arith.constant 0 : index
    %c0_333 = arith.constant 0 : index
    %837 = vector.load %arg24[%c0_331, %c0_332, %c0_333] : memref<2x10x1xf32, #tpu.memory_space<vmem>>, vector<1x10x1xf32>
    %838 = vector.shape_cast %837 : vector<1x10x1xf32> to vector<10x1xf32>
    %839 = vector.broadcast %838 : vector<10x1xf32> to vector<10x256xf32>
    %840 = arith.mulf %836, %839 : vector<10x256xf32>
    %c1_334 = arith.constant 1 : index
    %c0_335 = arith.constant 0 : index
    %c0_336 = arith.constant 0 : index
    %841 = vector.load %arg24[%c1_334, %c0_335, %c0_336] : memref<2x10x1xf32, #tpu.memory_space<vmem>>, vector<1x10x1xf32>
    %842 = vector.shape_cast %841 : vector<1x10x1xf32> to vector<10x1xf32>
    %843 = vector.broadcast %842 : vector<10x1xf32> to vector<10x256xf32>
    %844 = arith.addf %840, %843 : vector<10x256xf32>
    %cst_337 = arith.constant 0.000000e+00 : f32
    %845 = vector.broadcast %cst_337 : f32 to vector<10x256xf32>
    %846 = arith.maximumf %844, %845 : vector<10x256xf32>
    %c0_338 = arith.constant 0 : index
    %c0_339 = arith.constant 0 : index
    %847 = vector.load %arg6[%c0_338, %c0_339] : memref<256x1xf32, #tpu.memory_space<vmem>>, vector<256x1xf32>
    %cst_340 = arith.constant dense<0.000000e+00> : vector<10x1xf32>
    %848 = tpu.matmul %846, %847, %cst_340 {dimension_numbers = #tpu.dot_dimension_numbers<[1], [0], [0], [1], [0, 0, 1, 1], [], []>} : vector<10x256xf32>, vector<256x1xf32>, vector<10x1xf32> -> vector<10x1xf32>
    %c0_341 = arith.constant 0 : index
    %c0_342 = arith.constant 0 : index
    %849 = vector.load %arg25[%c0_341, %c0_342] : memref<10x10xf32, #tpu.memory_space<vmem>>, vector<10x10xf32>
    %cst_343 = arith.constant dense<0.000000e+00> : vector<10x1xf32>
    %850 = tpu.matmul %849, %848, %cst_343 {dimension_numbers = #tpu.dot_dimension_numbers<[1], [0], [0], [1], [0, 0, 1, 1], [], []>} : vector<10x10xf32>, vector<10x1xf32>, vector<10x1xf32> -> vector<10x1xf32>
    %c0_344 = arith.constant 0 : index
    %c0_345 = arith.constant 0 : index
    %851 = vector.load %arg26[%c0_344, %c0_345] : memref<10x1xf32, #tpu.memory_space<vmem>>, vector<10x1xf32>
    %852 = arith.addf %850, %851 : vector<10x1xf32>
    %c0_346 = arith.constant 0 : index
    %c0_347 = arith.constant 0 : index
    %c0_348 = arith.constant 0 : index
    %853 = vector.load %arg27[%c0_346, %c0_347, %c0_348] : memref<1x10x1xf32, #tpu.memory_space<vmem>>, vector<1x10x1xf32>
    %854 = vector.shape_cast %853 : vector<1x10x1xf32> to vector<10x1xf32>
    %855 = vector.shape_cast %852 : vector<10x1xf32> to vector<1x10x1xf32>
    tpu.vector_store %arg27[%c0_346, %c0_347, %c0_348], %855 {strides = array<i32>} : memref<1x10x1xf32, #tpu.memory_space<vmem>>, vector<1x10x1xf32>,
    return
  }
  func.func @transform_0(%arg0: i32) -> (i32, i32, i32) {
    %c0_i32 = arith.constant 0 : i32
    %c0_i32_0 = arith.constant 0 : i32
    %c0_i32_1 = arith.constant 0 : i32
    return %arg0, %c0_i32, %c0_i32_0 : i32, i32, i32
  }
  func.func @transform_1(%arg0: i32) -> (i32, i32, i32) {
    %c0_i32 = arith.constant 0 : i32
    %c0_i32_0 = arith.constant 0 : i32
    %c0_i32_1 = arith.constant 0 : i32
    %c0_i32_2 = arith.constant 0 : i32
    return %c0_i32, %c0_i32_0, %c0_i32_1 : i32, i32, i32
  }
  func.func @transform_2(%arg0: i32) -> (i32, i32, i32) {
    %c0_i32 = arith.constant 0 : i32
    %c0_i32_0 = arith.constant 0 : i32
    %c0_i32_1 = arith.constant 0 : i32
    %c0_i32_2 = arith.constant 0 : i32
    return %c0_i32, %c0_i32_0, %c0_i32_1 : i32, i32, i32
  }
  func.func @transform_3(%arg0: i32) -> (i32, i32, i32) {
    %c0_i32 = arith.constant 0 : i32
    %c0_i32_0 = arith.constant 0 : i32
    %c0_i32_1 = arith.constant 0 : i32
    %c0_i32_2 = arith.constant 0 : i32
    return %c0_i32, %c0_i32_0, %c0_i32_1 : i32, i32, i32
  }
  func.func @transform_4(%arg0: i32) -> (i32, i32, i32) {
    %c0_i32 = arith.constant 0 : i32
    %c0_i32_0 = arith.constant 0 : i32
    %c0_i32_1 = arith.constant 0 : i32
    %c0_i32_2 = arith.constant 0 : i32
    return %c0_i32, %c0_i32_0, %c0_i32_1 : i32, i32, i32
  }
  func.func @transform_5(%arg0: i32) -> (i32, i32) {
    %c0_i32 = arith.constant 0 : i32
    %c0_i32_0 = arith.constant 0 : i32
    %c0_i32_1 = arith.constant 0 : i32
    return %c0_i32, %c0_i32_0 : i32, i32
  }
  func.func @transform_6(%arg0: i32) -> (i32, i32) {
    %c0_i32 = arith.constant 0 : i32
    %c0_i32_0 = arith.constant 0 : i32
    %c0_i32_1 = arith.constant 0 : i32
    return %c0_i32, %c0_i32_0 : i32, i32
  }
  func.func @transform_7(%arg0: i32) -> (i32, i32, i32) {
    %c0_i32 = arith.constant 0 : i32
    %c0_i32_0 = arith.constant 0 : i32
    %c0_i32_1 = arith.constant 0 : i32
    %c0_i32_2 = arith.constant 0 : i32
    return %c0_i32, %c0_i32_0, %c0_i32_1 : i32, i32, i32
  }
  func.func @transform_8(%arg0: i32) -> (i32, i32) {
    %c0_i32 = arith.constant 0 : i32
    %c0_i32_0 = arith.constant 0 : i32
    %c0_i32_1 = arith.constant 0 : i32
    return %c0_i32, %c0_i32_0 : i32, i32
  }
  func.func @transform_9(%arg0: i32) -> (i32, i32, i32) {
    %c0_i32 = arith.constant 0 : i32
    %c0_i32_0 = arith.constant 0 : i32
    %c0_i32_1 = arith.constant 0 : i32
    %c0_i32_2 = arith.constant 0 : i32
    return %c0_i32, %c0_i32_0, %c0_i32_1 : i32, i32, i32
  }
  func.func @transform_10(%arg0: i32) -> (i32, i32) {
    %c0_i32 = arith.constant 0 : i32
    %c0_i32_0 = arith.constant 0 : i32
    %c0_i32_1 = arith.constant 0 : i32
    return %c0_i32, %c0_i32_0 : i32, i32
  }
  func.func @transform_11(%arg0: i32) -> (i32, i32, i32) {
    %c0_i32 = arith.constant 0 : i32
    %c0_i32_0 = arith.constant 0 : i32
    %c0_i32_1 = arith.constant 0 : i32
    %c0_i32_2 = arith.constant 0 : i32
    return %c0_i32, %c0_i32_0, %c0_i32_1 : i32, i32, i32
  }
  func.func @transform_12(%arg0: i32) -> (i32, i32) {
    %c0_i32 = arith.constant 0 : i32
    %c0_i32_0 = arith.constant 0 : i32
    %c0_i32_1 = arith.constant 0 : i32
    return %c0_i32, %c0_i32_0 : i32, i32
  }
  func.func @transform_13(%arg0: i32) -> (i32, i32) {
    %c0_i32 = arith.constant 0 : i32
    %c0_i32_0 = arith.constant 0 : i32
    %c0_i32_1 = arith.constant 0 : i32
    return %c0_i32, %c0_i32_0 : i32, i32
  }
  func.func @transform_14(%arg0: i32) -> (i32, i32) {
    %c0_i32 = arith.constant 0 : i32
    %c0_i32_0 = arith.constant 0 : i32
    %c0_i32_1 = arith.constant 0 : i32
    return %c0_i32, %c0_i32_0 : i32, i32
  }
  func.func @transform_15(%arg0: i32) -> (i32, i32, i32) {
    %c0_i32 = arith.constant 0 : i32
    %c0_i32_0 = arith.constant 0 : i32
    %c0_i32_1 = arith.constant 0 : i32
    %c0_i32_2 = arith.constant 0 : i32
    return %c0_i32, %c0_i32_0, %c0_i32_1 : i32, i32, i32
  }
  func.func @transform_16(%arg0: i32) -> (i32, i32, i32) {
    %c0_i32 = arith.constant 0 : i32
    %c0_i32_0 = arith.constant 0 : i32
    %c0_i32_1 = arith.constant 0 : i32
    %c0_i32_2 = arith.constant 0 : i32
    return %c0_i32, %c0_i32_0, %c0_i32_1 : i32, i32, i32
  }
  func.func @transform_17(%arg0: i32) -> (i32, i32, i32) {
    %c0_i32 = arith.constant 0 : i32
    %c0_i32_0 = arith.constant 0 : i32
    %c0_i32_1 = arith.constant 0 : i32
    %c0_i32_2 = arith.constant 0 : i32
    return %c0_i32, %c0_i32_0, %c0_i32_1 : i32, i32, i32
  }
  func.func @transform_18(%arg0: i32) -> (i32, i32, i32) {
    %c0_i32 = arith.constant 0 : i32
    %c0_i32_0 = arith.constant 0 : i32
    %c0_i32_1 = arith.constant 0 : i32
    %c0_i32_2 = arith.constant 0 : i32
    return %c0_i32, %c0_i32_0, %c0_i32_1 : i32, i32, i32
  }
  func.func @transform_19(%arg0: i32) -> (i32, i32, i32) {
    %c0_i32 = arith.constant 0 : i32
    %c0_i32_0 = arith.constant 0 : i32
    %c0_i32_1 = arith.constant 0 : i32
    %c0_i32_2 = arith.constant 0 : i32
    return %c0_i32, %c0_i32_0, %c0_i32_1 : i32, i32, i32
  }
  func.func @transform_20(%arg0: i32) -> (i32, i32) {
    %c0_i32 = arith.constant 0 : i32
    %c0_i32_0 = arith.constant 0 : i32
    %c0_i32_1 = arith.constant 0 : i32
    return %c0_i32, %c0_i32_0 : i32, i32
  }
  func.func @transform_21(%arg0: i32) -> (i32, i32, i32) {
    %c0_i32 = arith.constant 0 : i32
    %c0_i32_0 = arith.constant 0 : i32
    %c0_i32_1 = arith.constant 0 : i32
    %c0_i32_2 = arith.constant 0 : i32
    return %c0_i32, %c0_i32_0, %c0_i32_1 : i32, i32, i32
  }
  func.func @transform_22(%arg0: i32) -> (i32, i32) {
    %c0_i32 = arith.constant 0 : i32
    %c0_i32_0 = arith.constant 0 : i32
    %c0_i32_1 = arith.constant 0 : i32
    return %c0_i32, %c0_i32_0 : i32, i32
  }
  func.func @transform_23(%arg0: i32) -> (i32, i32, i32) {
    %c0_i32 = arith.constant 0 : i32
    %c0_i32_0 = arith.constant 0 : i32
    %c0_i32_1 = arith.constant 0 : i32
    %c0_i32_2 = arith.constant 0 : i32
    return %c0_i32, %c0_i32_0, %c0_i32_1 : i32, i32, i32
  }
  func.func @transform_24(%arg0: i32) -> (i32, i32) {
    %c0_i32 = arith.constant 0 : i32
    %c0_i32_0 = arith.constant 0 : i32
    %c0_i32_1 = arith.constant 0 : i32
    return %c0_i32, %c0_i32_0 : i32, i32
  }
  func.func @transform_25(%arg0: i32) -> (i32, i32) {
    %c0_i32 = arith.constant 0 : i32
    %c0_i32_0 = arith.constant 0 : i32
    %c0_i32_1 = arith.constant 0 : i32
    return %c0_i32, %c0_i32_0 : i32, i32
  }
  func.func @transform_26(%arg0: i32) -> (i32, i32, i32) {
    %c0_i32 = arith.constant 0 : i32
    %c0_i32_0 = arith.constant 0 : i32
    %c0_i32_1 = arith.constant 0 : i32
    return %arg0, %c0_i32, %c0_i32_0 : i32, i32, i32
  }
}

</mosaic_0001>

<bundles_post_ra>
// kernel: densenet_forward.1
= control target key start
LH: loop header
LB: loop body
LE: loop exit
PB: predicated region body
PF: predicated region fallthrough
CT: control target
= control target key end

     0   :  { %s4041_s27 = smov 0   ;;  %s6157_s0 = inlined_call_operand.vmem [shape: f32[2,3,256], index: 0, kind: input, shape index: {}]   ;;  %s6158_s1 = inlined_call_operand.vmem [shape: f32[9,1,256], index: 1, kind: input, shape index: {}]   ;;  %s6159_s2 = inlined_call_operand.vmem [shape: f32[9,1,256], index: 2, kind: input, shape index: {}]   ;;  %s6160_s3 = inlined_call_operand.vmem [shape: f32[9,1,256], index: 3, kind: input, shape index: {}]   ;;  %s6161_s4 = inlined_call_operand.vmem [shape: f32[9,1,256], index: 4, kind: input, shape index: {}]   ;;  %s6162_s5 = inlined_call_operand.vmem [shape: f32[256,1], index: 5, kind: input, shape index: {}]   ;;  %s6163_s6 = inlined_call_operand.vmem [shape: f32[8,27], index: 6, kind: input, shape index: {}]   ;;  %s6164_s7 = inlined_call_operand.vmem [shape: f32[2,8,1], index: 7, kind: input, shape index: {}]   ;;  %s6165_s8 = inlined_call_operand.vmem [shape: f32[8,8], index: 8, kind: input, shape index: {}]   ;;  %s6166_s9 = inlined_call_operand.vmem [shape: f32[2,8,1], index: 9, kind: input, shape index: {}]   ;;  %s6167_s10 = inlined_call_operand.vmem [shape: f32[4,72], index: 10, kind: input, shape index: {}]   ;;  %s6168_s11 = inlined_call_operand.vmem [shape: f32[2,12,1], index: 11, kind: input, shape index: {}]   ;;  %s6169_s12 = inlined_call_operand.vmem [shape: f32[6,12], index: 12, kind: input, shape index: {}]   ;;  %s6170_s13 = inlined_call_operand.vmem [shape: f32[6,9], index: 13, kind: input, shape index: {}]   ;;  %s6171_s14 = inlined_call_operand.vmem [shape: f32[6,1], index: 14, kind: input, shape index: {}]   ;;  %s6172_s15 = inlined_call_operand.vmem [shape: f32[4,6,9], index: 15, kind: input, shape index: {}]   ;;  %s6173_s16 = inlined_call_operand.vmem [shape: f32[4,6,1], index: 16, kind: input, shape index: {}]   ;;  %s6174_s17 = inlined_call_operand.vmem [shape: f32[6,6,9], index: 17, kind: input, shape index: {}]   ;;  %s6175_s18 = inlined_call_operand.vmem [shape: f32[6,6,1], index: 18, kind: input, shape index: {}]   ;;  %s6176_s19 = inlined_call_operand.vmem [shape: f32[2,6,1], index: 19, kind: input, shape index: {}]   ;;  %s6177_s20 = inlined_call_operand.vmem [shape: f32[8,6], index: 20, kind: input, shape index: {}]   ;;  %s6178_s21 = inlined_call_operand.vmem [shape: f32[2,8,1], index: 21, kind: input, shape index: {}]   ;;  %s6179_s22 = inlined_call_operand.vmem [shape: f32[4,72], index: 22, kind: input, shape index: {}]   ;;  %s6180_s23 = inlined_call_operand.vmem [shape: f32[2,10,1], index: 23, kind: input, shape index: {}]   ;;  %s6181_s24 = inlined_call_operand.vmem [shape: f32[10,10], index: 24, kind: input, shape index: {}]   ;;  %s6182_s25 = inlined_call_operand.vmem [shape: f32[10,1], index: 25, kind: input, shape index: {}]   ;;  %s6183_s26 = inlined_call_operand.vmem [shape: f32[2,10,1], index: 26, kind: output, shape index: {}]  }
   0x1   :  { %6312 = sst [smem:[#allocation84_spill]] %s6157_s0 }
   0x2   :  { %6313 = sst [smem:[#allocation85_spill]] %s6158_s1 }
   0x3   :  { %6314 = sst [smem:[#allocation86_spill]] %s6159_s2 }
   0x4   :  { %6315 = sst [smem:[#allocation87_spill]] %s6160_s3 }
   0x5   :  { %6316 = sst [smem:[#allocation88_spill]] %s6161_s4 }
   0x6   :  { %6317 = sst [smem:[#allocation89_spill]] %s6162_s5 }
   0x7   :  { %6318 = sst [smem:[#allocation90_spill]] %s6163_s6 }
   0x8   :  { %6319 = sst [smem:[#allocation91_spill]] %s6164_s7 }
   0x9   :  { %6320 = sst [smem:[#allocation92_spill]] %s6165_s8 }
   0xa   :  { %6321 = sst [smem:[#allocation93_spill]] %s6166_s9 }
   0xb   :  { %6322 = sst [smem:[#allocation94_spill]] %s6167_s10 }
   0xc   :  { %6323 = sst [smem:[#allocation95_spill]] %s6183_s26 }
   0xd LB: > { %6324 = sst [smem:[#allocation2_spill]] %s3877_s27  ;;  %s3573_s3 = sadd.s32 4294967295, %s3877_s27   ;;  %s3877_s27 = sphi %s4041_s27, %s36_s27  }
   0xe   : > { %p3577_p0 = scmp.ge.s32.totalorder %s3877_s27, 1  ;;  %p712_p1 = scmp.lt.s32.totalorder %s3877_s27, 3 }
  0x10   : > { %p713_p2 = pnand %p3577_p0, %p712_p1 }
  0x12   : > { %716 = sbr.rel (%p713_p2) target bundleno = 2675 (0xa73), region = 124 }
  0x19   : > { %p782_p3 = scmp.lt.s32.totalorder %s3573_s3, 1  ;;  %s6325_s4 = sld [smem:[#allocation84_spill]]  ;;  %v6211_v2 = vmov 0.0   ;;  %v6213_v3 = vmov 0   ;;  %v800_v8 = vlaneseq  ;;  %vm1032_vm5 = vcmask 1040384  }
  0x1a   : > { %s6197_s0 = smov 1   ;;  %s6199_s9 = smov 15   ;;  %1122 = vmatprep.mubr.f32.mxu0 %v6211_v2  ;;  %1380 = vmatprep.mubr.f32.mxu1 %v6211_v2  ;;  %vm1035_vm6 = vcmask 1043456   ;;  %vm1026_vm7 = vcmask 1042432   ;;  %vm1038_vm8 = vcmask 1046528   ;;  %vm1029_vm10 = vcmask 1045504  }
  0x1b   : > { %s6569_s3 = smov (!%p782_p3, %s3573_s3), 1  ;;  %s6201_s30 = smov 16   ;;  %3827 = vset.pattern.permute.xlu0 %v6213_v3  ;;  %3828 = vset.pattern.permute.xlu1 %v6213_v3  ;;  %v808_v9 = vshrl.u32 %v800_v8, 7  ;;  %v4099_v10 = vand.u32 127, %v800_v8  ;;  %vm1041_vm12 = vcmask 1041408   ;;  %vm1044_vm14 = vcmask 1044480  }
  0x1c   : > { %s3655_s7 = sshll.u32 %s6569_s3, 3  ;;  %s6195_s2 = smov 127   ;;  %vm3889_vm15 = vmmov 1  }
  0x1d   : > { %s6203_s5 = smov 17   ;;  %s6193_s10 = smov 113   ;;  %6328 = vst [vmem:[#allocation3_spill] sm:$0xff] %v4099_v10  ;;  %v4104_v14 = vsub.s32 0, %v808_v9  ;;  %v4106_v15 = vsub.s32 1, %v808_v9  ;;  %vm867_vm0 = vcmp.lt.s32.totalorder %v4099_v10, 1 }
  0x1e   : > { %s6191_s6 = smov 112   ;;  %s6209_s1 = smov 111   ;;  %vm823_vm1 = vcmp.lt.s32.totalorder %v4099_v10, 16  ;;  %vm845_vm2 = vcmp.lt.s32.totalorder %v4099_v10, 15  ;;  %vm903_vm3 = vcmp.lt.s32.totalorder %v4099_v10, 127  ;;  %vm802_vm4 = vcmp.lt.s32.totalorder %v4099_v10, 17 }
  0x1f   : > { %s786_s29 = scalar_lea.vmem %s6325_s4, %s3655_s7  ;;  %s6326_s8 = sld [smem:[#allocation91_spill]]  ;;  %vm925_vm9 = vcmp.lt.s32.totalorder %v4099_v10, 113  ;;  %vm947_vm11 = vcmp.lt.s32.totalorder %v4099_v10, 112  ;;  %vm969_vm13 = vcmp.lt.s32.totalorder %v4099_v10, 111 }
  0x20   : > { %v4055_v0 = vld [vmem:[%s786_s29] sm:$0x77]  ;;  %s6329_s4 = sld [smem:[#allocation85_spill]]  ;;  %s6330_s29 = sld [smem:[#allocation90_spill]] }
  0x21   : > { %863 = vrot.lane.b32.xlu1 %v4055_v0, %s6197_s0  ;;  %841 = vrot.lane.b32.xlu0 %v4055_v0, %s6199_s9  ;;  %v794_v1 = vcombine.high %v4055_v0, %v4055_v0  ;;  %s6336_s7 = smov 112   ;;  %s6358_s26 = smov 17  }
  0x22   : > { %s3904_s28 = smov 2  }
  0x25   : > { %819 = vrot.lane.b32.xlu0 %v4055_v0, %s6201_s30  ;;  %865 = vrot.lane.b32.xlu1 %v794_v1, %s6197_s0  ;;  %v1129_v4 = vld [vmem:[%s6326_s8] sm:$0xff]  ;;  %v3593_v5 = vld [vmem:[%s6326_s8 + $0x8] sm:$0xff]  ;;  %s6333_s0 = smov 1   ;;  %s6357_s8 = smov 111  }
  0x26   : > { %v3585_v13 = vld [vmem:[%s6329_s4 + $0x8] sm:$0x3]  ;;  %v3584_v16 = vld [vmem:[%s6329_s4 + $0x6] sm:$0x3]  ;;  %v3583_v17 = vld [vmem:[%s6329_s4 + $0x4] sm:$0x3] }
  0x27   : > { %v4116_v18 = vrot.slane %v3585_v13, %v4104_v14  ;;  %v4119_v19 = vrot.slane %v3585_v13, %v4106_v15  ;;  %v3582_v22 = vld [vmem:[%s6329_s4 + $0x2] sm:$0x3]  ;;  %v4125_v23 = vrot.slane %v3584_v16, %v4104_v14  ;;  %v4128_v24 = vrot.slane %v3584_v16, %v4106_v15  ;;  %v3586_v25 = vld [vmem:[%s6329_s4 + $0xa] sm:$0x3]  ;;  %v805_v32 = vld [vmem:[%s6329_s4] sm:$0x3] }
  0x28   : > { %v4140_v28 = vrot.slane %v3583_v17, %v4104_v14  ;;  %v4143_v29 = vrot.slane %v3583_v17, %v4106_v15  ;;  %v4146_v30 = vrot.slane %v3582_v22, %v4104_v14  ;;  %v4149_v31 = vrot.slane %v3582_v22, %v4106_v15  ;;  %v3587_v53 = vld [vmem:[%s6329_s4 + $0xc] sm:$0x3]  ;;  %v3588_v8 = vld [vmem:[%s6329_s4 + $0xe] sm:$0x3] }
  0x29   : > { %821 = vrot.lane.b32.xlu1 %v794_v1, %s6201_s30  ;;  %843 = vrot.lane.b32.xlu0 %v794_v1, %s6199_s9  ;;  %v896_v33 = vcombine.low %v4116_v18, %v4119_v19  ;;  %v4158_v36 = vrot.slane %v3586_v25, %v4104_v14  ;;  %v4161_v37 = vrot.slane %v3586_v25, %v4106_v15  ;;  %s6334_s9 = smov 127  }
  0x2a   : > { %v4173_v44 = vrot.slane %v805_v32, %v4104_v14  ;;  %v4176_v45 = vrot.slane %v805_v32, %v4106_v15  ;;  %v4196_v62 = vrot.slane %v3587_v53, %v4104_v14  ;;  %v4199_v63 = vrot.slane %v3587_v53, %v4106_v15 }
  0x2b   : > { %v898_v48 = vmul.f32 %v896_v33, %v4055_v0  ;;  %v4215_v22 = vrot.slane %v3588_v8, %v4104_v14  ;;  %v4218_v25 = vrot.slane %v3588_v8, %v4106_v15 }
  0x2d   : > { %901 = vrot.lane.b32.xlu1 %v794_v1, %s6195_s2  ;;  %899 = vrot.lane.b32.xlu0 %v4055_v0, %s6195_s2  ;;  %s6327_s2 = sld [smem:[#allocation93_spill]] }
  0x31   : > { %798 = vrot.lane.b32.xlu1 %v794_v1, %s6203_s5  ;;  %796 = vrot.lane.b32.xlu0 %v4055_v0, %s6203_s5 }
  0x33   : > { %v3595_v6 = vld [vmem:[%s6327_s2 + $0x8] sm:$0xff]  ;;  %v1224_v7 = vld [vmem:[%s6327_s2] sm:$0xff]  ;;  %s6398_s2 = sld [smem:[#allocation87_spill]] }
  0x35   : > { %923 = vrot.lane.b32.xlu1 %v794_v1, %s6193_s10  ;;  %921 = vrot.lane.b32.xlu0 %v4055_v0, %s6193_s10  ;;  %s6331_s10 = sld [smem:[#allocation92_spill]] }
  0x39   : > { %945 = vrot.lane.b32.xlu1 %v794_v1, %s6191_s6  ;;  %943 = vrot.lane.b32.xlu0 %v4055_v0, %s6191_s6  ;;  %s6332_s6 = smov 15  }
  0x3d   : > { %967 = vrot.lane.b32.xlu1 %v794_v1, %s6209_s1  ;;  %965 = vrot.lane.b32.xlu0 %v4055_v0, %s6209_s1  ;;  %v1006_v0 = vcombine.low %v898_v48, %v898_v48 }
  0x41   : > { %1132 = vperm.xlu0 %3827, %v1129_v4   ;;  %1141 = vperm.xlu1 %3828, %v3593_v5  }
  0x45   : > { %1236 = vperm.xlu0 %3827, %v3595_v6   ;;  %1227 = vperm.xlu1 %3828, %v1224_v7  }
  0x93   : > { %v864_v11 = vpop.permute.xlu1 %863  ;;  %v842_v12 = vpop.permute.xlu0 %841 }
  0x97   : > { %v820_v20 = vpop.permute.xlu0 %819  ;;  %v866_v21 = vpop.permute.xlu1 %865 }
  0x98   : > { %v868_v26 = vsel %vm867_vm0, %v864_v11, %v866_v21  ;;  %v869_v27 = vsel %vm867_vm0, %v866_v21, %v864_v11 }
  0x99   : > { %v883_v38 = vmul.f32 %v4125_v23, %v869_v27  ;;  %v884_v39 = vmul.f32 %v4128_v24, %v868_v26 }
  0x9b   : > { %v822_v34 = vpop.permute.xlu1 %821  ;;  %v844_v35 = vpop.permute.xlu0 %843  ;;  %v1001_v54 = vrot.slane %v883_v38, 7  ;;  %v1002_v55 = vrot.slane %v884_v39, 7 }
  0x9c   : > { %v846_v40 = vsel %vm845_vm2, %v842_v12, %v844_v35  ;;  %v847_v41 = vsel %vm845_vm2, %v844_v35, %v842_v12  ;;  %v824_v46 = vsel %vm823_vm1, %v820_v20, %v822_v34  ;;  %v825_v47 = vsel %vm823_vm1, %v822_v34, %v820_v20 }
  0x9d   : > { %v861_v42 = vmul.f32 %v4140_v28, %v847_v41  ;;  %v862_v43 = vmul.f32 %v4143_v29, %v846_v40  ;;  %v839_v58 = vmul.f32 %v4146_v30, %v825_v47  ;;  %v840_v59 = vmul.f32 %v4149_v31, %v824_v46 }
  0x9f   : > { %v995_v49 = vrot.slane %v861_v42, 2  ;;  %v996_v50 = vrot.slane %v862_v43, 2  ;;  %v902_v51 = vpop.permute.xlu1 %901  ;;  %v900_v52 = vpop.permute.xlu0 %899  ;;  %v989_v13 = vrot.slane %v839_v58, 5  ;;  %v990_v16 = vrot.slane %v840_v59, 5 }
  0xa0   : > { %v904_v56 = vsel %vm903_vm3, %v900_v52, %v902_v51  ;;  %v905_v57 = vsel %vm903_vm3, %v902_v51, %v900_v52  ;;  %v3589_v51 = vld [vmem:[%s6329_s4 + $0x10] sm:$0x3]  ;;  %s6337_s4 = sld [smem:[#allocation94_spill]] }
  0xa1   : > { %v919_v60 = vmul.f32 %v4158_v36, %v904_v56  ;;  %v920_v61 = vmul.f32 %v4161_v37, %v905_v57  ;;  %v1034_v7 = vsel %vm1032_vm5, %v996_v50, %v1002_v55  ;;  %v1033_v9 = vsel %vm1032_vm5, %v995_v49, %v1001_v54  ;;  %vm3711_vm5 = vmpackc.low %vm1026_vm7, %vm3889_vm15 }
  0xa2   : > { %v1037_v21 = vsel %vm1035_vm6, %v1034_v7, %v898_v48  ;;  %v1036_v26 = vsel %vm1035_vm6, %v1033_v9, %v1006_v0  ;;  %v4244_v58 = vrot.slane %v3589_v51, %v4104_v14  ;;  %v4247_v59 = vrot.slane %v3589_v51, %v4106_v15 }
  0xa3   : > { %v1010_v1 = vrot.slane %v919_v60, 1  ;;  %v1011_v4 = vrot.slane %v920_v61, 1  ;;  %v799_v5 = vpop.permute.xlu1 %798  ;;  %v797_v6 = vpop.permute.xlu0 %796 }
  0xa4   : > { %v803_v11 = vsel %vm802_vm4, %v797_v6, %v799_v5  ;;  %v804_v12 = vsel %vm802_vm4, %v799_v5, %v797_v6 }
  0xa5   : > { %v817_v17 = vmul.f32 %v4173_v44, %v804_v12  ;;  %v818_v20 = vmul.f32 %v4176_v45, %v803_v11  ;;  %v1040_v34 = vsel %vm1038_vm8, %v1037_v21, %v1011_v4  ;;  %v1039_v38 = vsel %vm1038_vm8, %v1036_v26, %v1010_v1 }
  0xa6   : > { %vm1048_vm8 = vcmask 220160  }
  0xa7   : > { %v924_v27 = vpop.permute.xlu1 %923  ;;  %v922_v32 = vpop.permute.xlu0 %921  ;;  %v1028_v33 = vsel %vm1026_vm7, %v818_v20, %v990_v16  ;;  %v1027_v35 = vsel %vm1026_vm7, %v817_v17, %v989_v13  ;;  %vm1149_vm7 = vcmask 64512  }
  0xa8   : > { %v926_v39 = vsel %vm925_vm9, %v922_v32, %v924_v27  ;;  %v927_v40 = vsel %vm925_vm9, %v924_v27, %v922_v32  ;;  %v1031_v41 = vsel %vm1029_vm10, %v1028_v33, %v996_v50  ;;  %v1030_v42 = vsel %vm1029_vm10, %v1027_v35, %v995_v49 }
  0xa9   : > { %v941_v43 = vmul.f32 %v4196_v62, %v926_v39  ;;  %v942_v46 = vmul.f32 %v4199_v63, %v927_v40  ;;  %v3706_v47 = vpack.c.bf16 %v1040_v34, %v1031_v41  ;;  %v3708_v48 = vpack.c.bf16 %v1039_v38, %v1030_v42  ;;  %v1148_v40 = vld [vmem:[%s6331_s10] sm:$0xff]  ;;  %s6304_s10 = smov 98  }
  0xab   : > { %v946_v52 = vpop.permute.xlu1 %945  ;;  %3707 = vmatprep.subr.bf16.mxu0 %v3706_v47  ;;  %v944_v53 = vpop.permute.xlu0 %943  ;;  %v1016_v54 = vrot.slane %v941_v43, 6  ;;  %v1017_v50 = vrot.slane %v942_v46, 6 }
  0xac   : > { %v948_v49 = vsel %vm947_vm11, %v944_v53, %v946_v52  ;;  %v949_v55 = vsel %vm947_vm11, %v946_v52, %v944_v53  ;;  %3709 = vmatpush1.bf16.msra.mxu0 %v3708_v48 }
  0xad   : > { %v963_v56 = vmul.f32 %v4215_v22, %v948_v49  ;;  %v964_v57 = vmul.f32 %v4218_v25, %v949_v55  ;;  %v1042_v6 = vsel %vm1041_vm12, %v1010_v1, %v1016_v54  ;;  %v1043_v7 = vsel %vm1041_vm12, %v1011_v4, %v1017_v50  ;;  %v1047_v4 = vld [vmem:[%s6330_s29] sm:$0xff]  ;;  %s6335_s29 = smov 113   ;;  %v1389_v49 = vld [vmem:[%s6168_s11 + $0x8] sm:$0xf]  ;;  %v3597_v55 = vld [vmem:[%s6168_s11 + $0x10] sm:$0xff] }
  0xae   : > { %v1388_v50 = vld [vmem:[%s6168_s11] sm:$0xff] }
  0xaf   : > { %v1022_v60 = vrot.slane %v963_v56, 3  ;;  %v1023_v61 = vrot.slane %v964_v57, 3  ;;  %v968_v0 = vpop.permute.xlu1 %967  ;;  %v966_v5 = vpop.permute.xlu0 %965  ;;  %v3598_v56 = vld [vmem:[%s6168_s11 + $0x18] sm:$0xf]  ;;  %v4324_v57 = vld [vmem:[%s6174_s17] sm:$0x3f] }
  0xb0   : > { %v970_v8 = vsel %vm969_vm13, %v966_v5, %v968_v0  ;;  %v971_v9 = vsel %vm969_vm13, %v968_v0, %v966_v5  ;;  %v4341_v0 = vld [vmem:[%s6172_s15 + $0x8] sm:$0x3f]  ;;  %v1921_v5 = vld [vmem:[%s6175_s18] sm:$0x3f] }
  0xb1   : > { %v1045_v11 = vsel %vm1044_vm14, %v1042_v6, %v1022_v60  ;;  %v1046_v12 = vsel %vm1044_vm14, %v1043_v7, %v1023_v61  ;;  %v985_v13 = vmul.f32 %v4244_v58, %v970_v8  ;;  %v986_v16 = vmul.f32 %v4247_v59, %v971_v9  ;;  %v4329_v60 = vld [vmem:[%s6172_s15] sm:$0x3f]  ;;  %v4336_v61 = vld [vmem:[%s6174_s17 + $0x8] sm:$0x3f]  ;;  %v4357_v8 = vld [vmem:[%s6174_s17 + $0x18] sm:$0x3f] }
  0xb2   : > { %v3619_v6 = vld [vmem:[%s6175_s18 + $0x8] sm:$0x3f]  ;;  %v2001_v7 = vld [vmem:[%s6173_s16] sm:$0x3f]  ;;  %v3623_v9 = vld [vmem:[%s6175_s18 + $0x10] sm:$0x3f] }
  0xb3   : > { %v3710_v17 = vpack.c.bf16 %v986_v16, %v1046_v12  ;;  %v3713_v1 = vpack.c.bf16 %v985_v13, %v1045_v11  ;;  %v3629_v11 = vld [vmem:[%s6173_s16 + $0x18] sm:$0x3f]  ;;  %v3890_v12 = vmov 1   ;;  %v3891_v13 = vmov 2   ;;  %v3621_v16 = vld [vmem:[%s6173_s16 + $0x8] sm:$0x3f] }
  0xb4   : > { %vm1312_vm14 = vcmask 588800  }
  0xb5   : > { %3712 = vmatprep.subr.msk.bf16.mxu0 %vm3711_vm5, %v3710_v17  ;;  %v4377_v17 = vld [vmem:[%s6174_s17 + $0x10] sm:$0x3f] }
  0xb6   : > { %3715 = vmatpush1.bf16.msk.msra.mxu0 %vm3711_vm5, %v3713_v1  ;;  %v4384_v1 = vld [vmem:[%s6172_s15 + $0x18] sm:$0x3f]  ;;  %vm3733_vm5 = vmpackc.low %vm1035_vm6, %vm3889_vm15 }
  0xb9   : > { %3592 = vmatmul.mubr.msk.f32.vlgmr.msra.gmra.mrb[0].mxu0 %vm1048_vm8, %v1047_v4  ;;  %v4391_v4 = vld [vmem:[%s6172_s15 + $0x10] sm:$0x3f]  ;;  %vm1425_vm8 = vcmask 97280  }
  0xba   : > { %1217 = vmatprep.mubr.f32.mxu0 %v6211_v2 }
  0xc0   : > { %v1133_v20 = vpop.permute.xlu0 %1132  ;;  %v1142_v32 = vpop.permute.xlu1 %1141 }
  0xc4   : > { %v1228_v41 = vpop.permute.xlu1 %1227  ;;  %v1237_v47 = vpop.permute.xlu0 %1236 }
 0x18c   : > { %v4263_v21 = vpop.f32.mrb[0].mxu0 }
 0x18d   : > { %v1135_v26 = vmul.f32 %v1133_v20, %v4263_v21  ;;  %v4266_v27 = vpop.f32.mrb[1].mxu0 }
 0x18e   : > { %v1136_v33 = vmul.f32 %v1133_v20, %v4266_v27 }
 0x18f   : > { %v1144_v34 = vadd.f32 %v1142_v32, %v1135_v26 }
 0x190   : > { %v1145_v35 = vadd.f32 %v1142_v32, %v1136_v33 }
 0x191   : > { %v1146_v39 = vmax.f32 %v1144_v34, 0.0 }
 0x192   : > { %v1147_v38 = vmax.f32 %v1145_v35, 0.0 }
 0x194   : > { %1153 = vmatprep.subr.mxu0 %v1147_v38 }
 0x195   : > { %1154 = vmatpush1.msra.mxu0 %v1146_v39 }
 0x196   : > { %3594 = vmatmul.mubr.msk.f32.vlgmr.msra.gmra.mrb[2].mxu0 %vm1149_vm7, %v1148_v40  ;;  %vm3787_vm7 = vmpackc.low %vm1041_vm12, %vm3889_vm15  ;;  %vm3516_vm12 = vcmask 1024   ;;  %vm3514_vm15 = vcmask 7168  }
 0x197   : > { %1499 = vmatprep.mubr.f32.mxu0 %v6211_v2 }
 0x269   : > { %v1219_v42 = vpop.f32.mrb[2].mxu0 }
 0x26a   : > { %v1230_v43 = vmul.f32 %v1228_v41, %v1219_v42  ;;  %v1221_v46 = vpop.f32.mrb[3].mxu0 }
 0x26b   : > { %v1231_v48 = vmul.f32 %v1228_v41, %v1221_v46 }
 0x26c   : > { %v1239_v51 = vadd.f32 %v1237_v47, %v1230_v43 }
 0x26d   : > { %v1240_v52 = vadd.f32 %v1237_v47, %v1231_v48 }
 0x26e   : > { %v4273_v53 = vmax.f32 %v1239_v51, 0.0 }
 0x26f   : > { %v4275_v54 = vmax.f32 %v1240_v52, 0.0 }
 0x270   : > { %1243 = vrot.lane.b32.xlu1 %v4273_v53, %s6203_s5 }
 0x271   : > { %1245 = vrot.lane.b32.xlu0 %v4275_v54, %s6203_s5  ;;  %s6306_s5 = smov 94  }
 0x274   : > { %1251 = vrot.lane.b32.xlu1 %v4273_v53, %s6201_s30 }
 0x275   : > { %1253 = vrot.lane.b32.xlu0 %v4275_v54, %s6201_s30  ;;  %s3899_s30 = smov 32  }
 0x278   : > { %1259 = vrot.lane.b32.xlu1 %v4273_v53, %s6332_s6 }
 0x279   : > { %1261 = vrot.lane.b32.xlu0 %v4275_v54, %s6332_s6 }
 0x27c   : > { %1267 = vrot.lane.b32.xlu1 %v4273_v53, %s6333_s0 }
 0x27d   : > { %1269 = vrot.lane.b32.xlu0 %v4275_v54, %s6333_s0 }
 0x280   : > { %1279 = vrot.lane.b32.xlu1 %v4273_v53, %s6334_s9 }
 0x281   : > { %1281 = vrot.lane.b32.xlu0 %v4275_v54, %s6334_s9 }
 0x284   : > { %1287 = vrot.lane.b32.xlu1 %v4273_v53, %s6335_s29 }
 0x285   : > { %1289 = vrot.lane.b32.xlu0 %v4275_v54, %s6335_s29 }
 0x288   : > { %1295 = vrot.lane.b32.xlu1 %v4273_v53, %s6336_s7 }
 0x289   : > { %1297 = vrot.lane.b32.xlu0 %v4275_v54, %s6336_s7 }
 0x28c   : > { %1303 = vrot.lane.b32.xlu1 %v4273_v53, %s6209_s1 }
 0x28d   : > { %1305 = vrot.lane.b32.xlu0 %v4275_v54, %s6209_s1  ;;  %s6360_s1 = smov 16  }
 0x290   : > { %1392 = vperm.xlu1 %3828, %v1388_v50  }
 0x291   : > { %1397 = vperm.xlu0 %3827, %v1389_v49  }
 0x294   : > { %1409 = vperm.xlu1 %3828, %v3597_v55  }
 0x295   : > { %1414 = vperm.xlu0 %3827, %v3598_v56  }
 0x298   : > { %1924 = vperm.xlu1 %3828, %v4324_v57  }
 0x299   : > { %2004 = vperm.xlu0 %3827, %v4329_v60  }
 0x29c   : > { %2088 = vperm.xlu1 %3828, %v4336_v61  }
 0x29d   : > { %2170 = vperm.xlu0 %3827, %v4341_v0  }
 0x2a0   : > { %1931 = vperm.xlu1 %3828, %v1921_v5  }
 0x2a1   : > { %2095 = vperm.xlu0 %3827, %v3619_v6  }
 0x2a4   : > { %2011 = vperm.xlu1 %3828, %v2001_v7  }
 0x2a5   : > { %2420 = vperm.xlu0 %3827, %v4357_v8  }
 0x2a8   : > { %3829 = vset.pattern.permute.xlu1 %v3890_v12 }
 0x2a9   : > { %2261 = vperm.xlu0 %3827, %v3623_v9   ;;  %2017 = vperm.xlu1 %3829, %v4329_v60  }
 0x2ad   : > { %2509 = vperm.xlu0 %3827, %v3629_v11   ;;  %2101 = vperm.xlu1 %3829, %v4336_v61  }
 0x2b1   : > { %3835 = vset.pattern.permute.xlu0 %v3891_v13  ;;  %3830 = vset.pattern.permute.xlu1 %v6213_v3 }
 0x2b2   : > { %2025 = vperm.xlu0 %3835, %v4329_v60   ;;  %2177 = vperm.xlu1 %3830, %v3621_v16  }
 0x2b6   : > { %2275 = vperm.xlu0 %3835, %v4377_v17   ;;  %2254 = vperm.xlu1 %3830, %v4377_v17  }
 0x2ba   : > { %2523 = vperm.xlu0 %3835, %v4384_v1   ;;  %2336 = vperm.xlu1 %3830, %v4391_v4  }
 0x2be   : > { %2502 = vperm.xlu1 %3830, %v4384_v1  }
 0x2c2   : > { %3831 = vset.pattern.permute.xlu1 %v3891_v13 }
 0x2c3   : > { %1945 = vperm.xlu1 %3831, %v4324_v57  }
 0x2c7   : > { %2109 = vperm.xlu1 %3831, %v4336_v61  }
 0x2cb   : > { %2191 = vperm.xlu1 %3831, %v4341_v0  }
 0x2cf   : > { %3832 = vset.pattern.permute.xlu1 %v3890_v12 }
 0x2d0   : > { %2267 = vperm.xlu1 %3832, %v4377_v17  }
 0x2d4   : > { %3833 = vset.pattern.permute.xlu1 %v6213_v3 }
 0x2e2   : > { %v1244_v20 = vpop.permute.xlu1 %1243 }
 0x2e3   : > { %v1246_v26 = vpop.permute.xlu0 %1245 }
 0x2e4   : > { %v1248_v32 = vsel %vm802_vm4, %v1246_v26, %v1244_v20  ;;  %v1247_v34 = vsel %vm802_vm4, %v1244_v20, %v1246_v26 }
 0x2e5   : > { %v1250_v40 = vmul.f32 %v1247_v34, %v4176_v45  ;;  %v1249_v42 = vmul.f32 %v1248_v32, %v4173_v44 }
 0x2e6   : > { %v1252_v33 = vpop.permute.xlu1 %1251 }
 0x2e7   : > { %v1254_v35 = vpop.permute.xlu0 %1253 }
 0x2e8   : > { %v1256_v38 = vsel %vm823_vm1, %v1254_v35, %v1252_v33  ;;  %v1255_v39 = vsel %vm823_vm1, %v1252_v33, %v1254_v35 }
 0x2e9   : > { %v1258_v41 = vmul.f32 %v1255_v39, %v4149_v31  ;;  %v1257_v43 = vmul.f32 %v1256_v38, %v4146_v30 }
 0x2ea   : > { %v1260_v46 = vpop.permute.xlu1 %1259 }
 0x2eb   : > { %v1262_v47 = vpop.permute.xlu0 %1261  ;;  %v3716_v48 = vpack.c.bf16 %v1258_v41, %v1250_v40  ;;  %v3718_v51 = vpack.c.bf16 %v1257_v43, %v1249_v42 }
 0x2ec   : > { %v1263_v52 = vsel %vm845_vm2, %v1260_v46, %v1262_v47  ;;  %v1264_v50 = vsel %vm845_vm2, %v1262_v47, %v1260_v46 }
 0x2ed   : > { %3717 = vmatprep.subr.bf16.mxu1 %v3716_v48  ;;  %v1265_v44 = vmul.f32 %v1264_v50, %v4140_v28  ;;  %v1266_v55 = vmul.f32 %v1263_v52, %v4143_v29  ;;  %v6212_v52 = vmov 8   ;;  %v3895_v50 = vmov 4  }
 0x2ee   : > { %3719 = vmatpush1.bf16.msra.mxu1 %v3718_v51  ;;  %v1268_v49 = vpop.permute.xlu1 %1267 }
 0x2ef   : > { %v1270_v45 = vpop.permute.xlu0 %1269 }
 0x2f0   : > { %v1271_v31 = vsel %vm867_vm0, %v1268_v49, %v1270_v45  ;;  %v1272_v30 = vsel %vm867_vm0, %v1270_v45, %v1268_v49  ;;  %v4490_v49 = vld [vmem:[%s6170_s13] sm:$0x3f]  ;;  %v3896_v45 = vmov 5  }
 0x2f1   : > { %v1273_v56 = vmul.f32 %v1272_v30, %v4125_v23  ;;  %v1274_v5 = vmul.f32 %v1271_v31, %v4128_v24  ;;  %v1278_v23 = vmul.f32 %v4275_v54, %v4119_v19  ;;  %v1277_v24 = vmul.f32 %v4273_v53, %v4116_v18  ;;  %v4508_v31 = vld [vmem:[%s6174_s17 + $0x20] sm:$0x3f] }
 0x2f2   : > { %v1280_v6 = vpop.permute.xlu1 %1279  ;;  %v6217_v30 = vmov 6  }
 0x2f3   : > { %v1282_v7 = vpop.permute.xlu0 %1281  ;;  %v3720_v9 = vpack.c.bf16 %v1274_v5, %v1266_v55  ;;  %v3722_v11 = vpack.c.bf16 %v1273_v56, %v1265_v44 }
 0x2f4   : > { %v1283_v16 = vsel %vm903_vm3, %v1280_v6, %v1282_v7  ;;  %v1284_v20 = vsel %vm903_vm3, %v1282_v7, %v1280_v6 }
 0x2f5   : > { %v1285_v26 = vmul.f32 %v1283_v16, %v4158_v36  ;;  %v1286_v28 = vmul.f32 %v1284_v20, %v4161_v37  ;;  %3721 = vmatprep.subr.bf16.mxu1 %v3720_v9 }
 0x2f6   : > { %3723 = vmatpush1.bf16.msra.mxu1 %v3722_v11  ;;  %v1288_v29 = vpop.permute.xlu1 %1287 }
 0x2f7   : > { %v1290_v32 = vpop.permute.xlu0 %1289  ;;  %v3724_v33 = vpack.c.bf16 %v1286_v28, %v1278_v23  ;;  %v3726_v34 = vpack.c.bf16 %v1285_v26, %v1277_v24 }
 0x2f8   : > { %v1291_v35 = vsel %vm925_vm9, %v1288_v29, %v1290_v32  ;;  %v1292_v36 = vsel %vm925_vm9, %v1290_v32, %v1288_v29 }
 0x2f9   : > { %3725 = vmatprep.subr.bf16.mxu1 %v3724_v33  ;;  %v1293_v53 = vmul.f32 %v1291_v35, %v4196_v62  ;;  %v1294_v54 = vmul.f32 %v1292_v36, %v4199_v63  ;;  %v1311_v63 = vld [vmem:[%s6337_s4] sm:$0xf]  ;;  %s6308_s4 = smov 96  }
 0x2fa   : > { %v1296_v37 = vpop.permute.xlu1 %1295  ;;  %3727 = vmatpush1.bf16.msra.mxu1 %v3726_v34 }
 0x2fb   : > { %v1298_v38 = vpop.permute.xlu0 %1297 }
 0x2fc   : > { %v1299_v19 = vsel %vm947_vm11, %v1296_v37, %v1298_v38  ;;  %v1300_v18 = vsel %vm947_vm11, %v1298_v38, %v1296_v37  ;;  %v1387_v37 = vld [vmem:[%s6169_s12] sm:$0x3f] }
 0x2fd   : > { %v1301_v39 = vmul.f32 %v1299_v19, %v4215_v22  ;;  %v1302_v40 = vmul.f32 %v1300_v18, %v4218_v25  ;;  %v3625_v22 = vld [vmem:[%s6173_s16 + $0x10] sm:$0x3f]  ;;  %v3627_v25 = vld [vmem:[%s6175_s18 + $0x18] sm:$0x3f]  ;;  %v1839_v18 = vld [vmem:[%s6171_s14] sm:$0x3f] }
 0x2fe   : > { %v1304_v41 = vpop.permute.xlu1 %1303  ;;  %2343 = vperm.xlu1 %3833, %v3625_v22  }
 0x2ff   : > { %v1306_v42 = vpop.permute.xlu0 %1305  ;;  %v3728_v43 = vpack.c.bf16 %v1302_v40, %v1294_v54  ;;  %v3730_v46 = vpack.c.bf16 %v1301_v39, %v1293_v53  ;;  %v4607_v39 = vld [vmem:[%s6174_s17 + $0x28] sm:$0x3f] }
 0x300   : > { %v1308_v47 = vsel %vm969_vm13, %v1306_v42, %v1304_v41  ;;  %v1307_v48 = vsel %vm969_vm13, %v1304_v41, %v1306_v42 }
 0x301   : > { %3729 = vmatprep.subr.bf16.mxu1 %v3728_v43  ;;  %v1310_v51 = vmul.f32 %v1308_v47, %v4247_v59  ;;  %v1309_v62 = vmul.f32 %v1307_v48, %v4244_v58  ;;  %v6215_v58 = vmov 7   ;;  %v3893_v59 = vmov 3  }
 0x302   : > { %3731 = vmatpush1.bf16.msra.mxu1 %v3730_v46  ;;  %2427 = vperm.xlu1 %3833, %v3627_v25  }
 0x303   : > { %1332 = vmatprep.subr.mxu1 %v1310_v51  ;;  %3845 = vset.pattern.permute.xlu0 %v6215_v58 }
 0x304   : > { %2065 = vperm.xlu0 %3845, %v4329_v60  }
 0x306   : > { %1333 = vmatpush1.msra.mxu1 %v1309_v62  ;;  %3834 = vset.pattern.permute.xlu1 %v3890_v12 }
 0x307   : > { %3596 = vmatmul.mubr.msk.f32.vlgmr.msra.gmra.mrb[0].mxu1 %vm1312_vm14, %v1311_v63  ;;  %2433 = vperm.xlu1 %3834, %v4357_v8  }
 0x308   : > { %2315 = vperm.xlu0 %3845, %v4377_v17  }
 0x30b   : > { %2515 = vperm.xlu1 %3834, %v4384_v1  }
 0x30c   : > { %2563 = vperm.xlu0 %3845, %v4384_v1  }
 0x30f   : > { %3836 = vset.pattern.permute.xlu1 %v3893_v59  ;;  %v1393_v44 = vpop.permute.xlu1 %1392 }
 0x310   : > { %1953 = vperm.xlu1 %3836, %v4324_v57   ;;  %3849 = vset.pattern.permute.xlu0 %v6212_v52  ;;  %v1398_v5 = vpop.permute.xlu0 %1397  ;;  %v1400_v6 = vmul.f32 %v1393_v44, %v4263_v21  ;;  %v1401_v7 = vmul.f32 %v1393_v44, %v4266_v27 }
 0x311   : > { %2073 = vperm.xlu0 %3849, %v4329_v60  }
 0x313   : > { %v1410_v55 = vpop.permute.xlu1 %1409 }
 0x314   : > { %2117 = vperm.xlu1 %3836, %v4336_v61   ;;  %v1417_v11 = vadd.f32 %v1410_v55, %v1400_v6  ;;  %v1418_v26 = vadd.f32 %v1410_v55, %v1401_v7  ;;  %v1415_v28 = vpop.permute.xlu0 %1414 }
 0x315   : > { %2405 = vperm.xlu0 %3849, %v4391_v4  }
 0x316   : > { %v1421_v21 = vmax.f32 %v1417_v11, 0.0  ;;  %v1422_v33 = vmax.f32 %v1418_v26, 0.0 }
 0x317   : > { %v4541_v56 = vpop.permute.xlu1 %1924 }
 0x318   : > { %2199 = vperm.xlu1 %3836, %v4341_v0   ;;  %v4640_v63 = vpop.permute.xlu0 %2004 }
 0x319   : > { %3851 = vset.pattern.permute.xlu0 %v3890_v12 }
 0x31a   : > { %1937 = vperm.xlu0 %3851, %v4324_v57  }
 0x31b   : > { %v4550_v9 = vpop.permute.xlu1 %2088 }
 0x31c   : > { %3837 = vset.pattern.permute.xlu1 %v3891_v13  ;;  %v4644_v25 = vpop.permute.xlu0 %2170 }
 0x31d   : > { %2357 = vperm.xlu1 %3837, %v4391_v4  }
 0x31e   : > { %2183 = vperm.xlu0 %3851, %v4341_v0  }
 0x31f   : > { %v4554_v34 = vpop.permute.xlu1 %1931 }
 0x321   : > { %2441 = vperm.xlu1 %3837, %v4357_v8  }
 0x322   : > { %2349 = vperm.xlu0 %3851, %v4391_v4  }
 0x325   : > { %3838 = vset.pattern.permute.xlu1 %v3895_v50 }
 0x326   : > { %1961 = vperm.xlu1 %3838, %v4324_v57   ;;  %1855 = vperm.xlu0 %3851, %v4490_v49  }
 0x32a   : > { %2125 = vperm.xlu1 %3838, %v4336_v61   ;;  %3853 = vset.pattern.permute.xlu0 %v3893_v59 }
 0x32b   : > { %2033 = vperm.xlu0 %3853, %v4329_v60  }
 0x32e   : > { %2207 = vperm.xlu1 %3838, %v4341_v0  }
 0x32f   : > { %2283 = vperm.xlu0 %3853, %v4377_v17  }
 0x332   : > { %3839 = vset.pattern.permute.xlu1 %v3893_v59 }
 0x333   : > { %2365 = vperm.xlu1 %3839, %v4391_v4   ;;  %2531 = vperm.xlu0 %3853, %v4384_v1  }
 0x337   : > { %2449 = vperm.xlu1 %3839, %v4357_v8   ;;  %1871 = vperm.xlu0 %3853, %v4490_v49  }
 0x33b   : > { %3840 = vset.pattern.permute.xlu1 %v3896_v45  ;;  %2875 = vperm.xlu0 %3853, %v4508_v31  }
 0x33c   : > { %1969 = vperm.xlu1 %3840, %v4324_v57  }
 0x33f   : > { %3857 = vset.pattern.permute.xlu0 %v3895_v50 }
 0x340   : > { %2133 = vperm.xlu1 %3840, %v4336_v61   ;;  %2041 = vperm.xlu0 %3857, %v4329_v60  }
 0x344   : > { %2215 = vperm.xlu1 %3840, %v4341_v0   ;;  %2291 = vperm.xlu0 %3857, %v4377_v17  }
 0x348   : > { %3841 = vset.pattern.permute.xlu1 %v3895_v50  ;;  %2539 = vperm.xlu0 %3857, %v4384_v1  }
 0x349   : > { %2373 = vperm.xlu1 %3841, %v4391_v4  }
 0x34c   : > { %1879 = vperm.xlu0 %3857, %v4490_v49  }
 0x34d   : > { %2457 = vperm.xlu1 %3841, %v4357_v8  }
 0x350   : > { %2883 = vperm.xlu0 %3857, %v4508_v31  }
 0x351   : > { %3842 = vset.pattern.permute.xlu1 %v6217_v30 }
 0x352   : > { %1977 = vperm.xlu1 %3842, %v4324_v57  }
 0x354   : > { %3859 = vset.pattern.permute.xlu0 %v3896_v45 }
 0x355   : > { %2049 = vperm.xlu0 %3859, %v4329_v60  }
 0x356   : > { %2141 = vperm.xlu1 %3842, %v4336_v61  }
 0x359   : > { %2299 = vperm.xlu0 %3859, %v4377_v17  }
 0x35a   : > { %2223 = vperm.xlu1 %3842, %v4341_v0  }
 0x35d   : > { %2547 = vperm.xlu0 %3859, %v4384_v1  }
 0x35e   : > { %3843 = vset.pattern.permute.xlu1 %v3896_v45 }
 0x35f   : > { %2381 = vperm.xlu1 %3843, %v4391_v4  }
 0x361   : > { %1887 = vperm.xlu0 %3859, %v4490_v49  }
 0x363   : > { %2465 = vperm.xlu1 %3843, %v4357_v8  }
 0x365   : > { %2891 = vperm.xlu0 %3859, %v4508_v31  }
 0x367   : > { %3844 = vset.pattern.permute.xlu1 %v6215_v58 }
 0x368   : > { %1985 = vperm.xlu1 %3844, %v4324_v57  }
 0x369   : > { %3861 = vset.pattern.permute.xlu0 %v6217_v30 }
 0x36a   : > { %2057 = vperm.xlu0 %3861, %v4329_v60  }
 0x36c   : > { %2149 = vperm.xlu1 %3844, %v4336_v61  }
 0x36e   : > { %2307 = vperm.xlu0 %3861, %v4377_v17  }
 0x370   : > { %2231 = vperm.xlu1 %3844, %v4341_v0  }
 0x372   : > { %2555 = vperm.xlu0 %3861, %v4384_v1  }
 0x374   : > { %3846 = vset.pattern.permute.xlu1 %v6217_v30 }
 0x375   : > { %2389 = vperm.xlu1 %3846, %v4391_v4  }
 0x379   : > { %2473 = vperm.xlu1 %3846, %v4357_v8  }
 0x37d   : > { %3847 = vset.pattern.permute.xlu1 %v6212_v52 }
 0x37e   : > { %1993 = vperm.xlu1 %3847, %v4324_v57   ;;  %v4562_v57 = vpop.permute.xlu1 %2011 }
 0x382   : > { %2157 = vperm.xlu1 %3847, %v4336_v61   ;;  %v4566_v38 = vpop.permute.xlu1 %2017 }
 0x386   : > { %2239 = vperm.xlu1 %3847, %v4341_v0   ;;  %v4571_v61 = vpop.permute.xlu1 %2101 }
 0x38a   : > { %3848 = vset.pattern.permute.xlu1 %v6215_v58  ;;  %v4575_v19 = vpop.permute.xlu1 %2177 }
 0x38b   : > { %2397 = vperm.xlu1 %3848, %v4391_v4  }
 0x38e   : > { %v4578_v0 = vpop.permute.xlu1 %2254 }
 0x38f   : > { %2481 = vperm.xlu1 %3848, %v4357_v8  }
 0x392   : > { %v4583_v4 = vpop.permute.xlu1 %2336 }
 0x393   : > { %3850 = vset.pattern.permute.xlu1 %v6212_v52 }
 0x394   : > { %2323 = vperm.xlu1 %3850, %v4377_v17   ;;  %v3639_v17 = vld [vmem:[%s6175_s18 + $0x20] sm:$0x3f] }
 0x398   : > { %2489 = vperm.xlu1 %3850, %v4357_v8   ;;  %v4591_v8 = vpop.permute.xlu1 %2502 }
 0x39c   : > { %2571 = vperm.xlu1 %3850, %v4384_v1   ;;  %v4593_v53 = vpop.permute.xlu1 %1945 }
 0x3a0   : > { %3852 = vset.pattern.permute.xlu1 %v6213_v3  ;;  %v4597_v1 = vpop.permute.xlu1 %2109 }
 0x3a1   : > { %2846 = vperm.xlu1 %3852, %v4508_v31  }
 0x3a4   : > { %v4602_v54 = vpop.permute.xlu1 %2191 }
 0x3a5   : > { %1849 = vperm.xlu1 %3852, %v1839_v18  }
 0x3a8   : > { %v4610_v40 = vpop.permute.xlu1 %2267 }
 0x3a9   : > { %2853 = vperm.xlu1 %3852, %v3639_v17  }
 0x3ac   : > { %v4615_v41 = vpop.permute.xlu1 %2343 }
 0x3ad   : > { %3854 = vset.pattern.permute.xlu1 %v3890_v12 }
 0x3ae   : > { %2859 = vperm.xlu1 %3854, %v4508_v31  }
 0x3b0   : > { %v4619_v42 = vpop.permute.xlu1 %2427 }
 0x3b2   : > { %3855 = vset.pattern.permute.xlu1 %v3891_v13 }
 0x3b3   : > { %1863 = vperm.xlu1 %3855, %v4490_v49  }
 0x3b7   : > { %2867 = vperm.xlu1 %3855, %v4508_v31  }
 0x3bb   : > { %3856 = vset.pattern.permute.xlu1 %v3890_v12  ;;  %v4623_v12 = vpop.permute.xlu1 %2433 }
 0x3bc   : > { %2945 = vperm.xlu1 %3856, %v4607_v39  }
 0x3bf   : > { %v4626_v43 = vpop.permute.xlu1 %2515 }
 0x3c0   : > { %3858 = vset.pattern.permute.xlu1 %v3891_v13 }
 0x3c1   : > { %2953 = vperm.xlu1 %3858, %v4607_v39  }
 0x3c3   : > { %v4628_v13 = vpop.permute.xlu1 %1953 }
 0x3c5   : > { %3860 = vset.pattern.permute.xlu1 %v3893_v59 }
 0x3c6   : > { %2961 = vperm.xlu1 %3860, %v4607_v39  }
 0x3c7   : > { %v4630_v46 = vpop.permute.xlu1 %2117 }
 0x3ca   : > { %3862 = vset.pattern.permute.xlu1 %v3895_v50  ;;  %v4648_v50 = vpop.permute.xlu0 %2095 }
 0x3cb   : > { %2969 = vperm.xlu1 %3862, %v4607_v39   ;;  %v4632_v47 = vpop.permute.xlu1 %2199 }
 0x3ce   : > { %v4652_v44 = vpop.permute.xlu0 %2420 }
 0x3cf   : > { %3863 = vset.pattern.permute.xlu1 %v3896_v45  ;;  %v4634_v48 = vpop.permute.xlu1 %2357 }
 0x3d3   : > { %v4636_v51 = vpop.permute.xlu1 %2441 }
 0x3d7   : > { %v4638_v62 = vpop.permute.xlu1 %1961 }
 0x3da   : > { %v1382_v60 = vpop.f32.mrb[0].mxu1 }
 0x3db   : > { %v1402_v16 = vmul.f32 %v1398_v5, %v1382_v60  ;;  %v1384_v20 = vpop.f32.mrb[1].mxu1  ;;  %v4642_v22 = vpop.permute.xlu1 %2125 }
 0x3dc   : > { %v1403_v23 = vmul.f32 %v1398_v5, %v1384_v20  ;;  %v4656_v5 = vpop.permute.xlu0 %2261 }
 0x3dd   : > { %v1419_v24 = vadd.f32 %v1415_v28, %v1402_v16 }
 0x3de   : > { %v1420_v29 = vadd.f32 %v1415_v28, %v1403_v23 }
 0x3df   : > { %v1423_v32 = vmax.f32 %v1419_v24, 0.0  ;;  %v4646_v59 = vpop.permute.xlu1 %2207 }
 0x3e0   : > { %v1424_v27 = vmax.f32 %v1420_v29, 0.0  ;;  %v4660_v7 = vpop.permute.xlu0 %2509 }
 0x3e1   : > { %v3735_v35 = vpack.c.bf16 %v1423_v32, %v1421_v21 }
 0x3e2   : > { %v3732_v36 = vpack.c.bf16 %v1424_v27, %v1422_v33 }
 0x3e3   : > { %v4650_v45 = vpop.permute.xlu1 %2365 }
 0x3e4   : > { %3734 = vmatprep.subr.msk.bf16.mxu0 %vm3733_vm5, %v3732_v36  ;;  %6338 = vst [vmem:[#allocation4_spill] sm:$0xff] %v4650_v45  ;;  %v4664_v11 = vpop.permute.xlu0 %2025 }
 0x3e5   : > { %3737 = vmatpush1.bf16.msk.msra.mxu0 %vm3733_vm5, %v3735_v35 }
 0x3e7   : > { %v4654_v55 = vpop.permute.xlu1 %2449 }
 0x3e8   : > { %3601 = vmatmul.mubr.msk.f32.vlgmr.msra.gmra.mrb[4].mxu0 %vm1425_vm8, %v1387_v37  ;;  %6339 = vst [vmem:[#allocation5_spill] sm:$0xff] %v4654_v55  ;;  %v4668_v20 = vpop.permute.xlu0 %2275 }
 0x3e9   : > { %3106 = vmatprep.mubr.f32.mxu0 %v6211_v2 }
 0x3eb   : > { %v4658_v6 = vpop.permute.xlu1 %1969 }
 0x3ec   : > { %6340 = vst [vmem:[#allocation6_spill] sm:$0xff] %v4658_v6  ;;  %v4672_v28 = vpop.permute.xlu0 %2523 }
 0x3ef   : > { %v4662_v60 = vpop.permute.xlu1 %2133 }
 0x3f0   : > { %6341 = vst [vmem:[#allocation7_spill] sm:$0xff] %v4662_v60  ;;  %v4676_v24 = vpop.permute.xlu0 %2065 }
 0x3f1   : > { %6343 = vst [vmem:[#allocation9_spill] sm:$0xff] %v4676_v24 }
 0x3f3   : > { %v4666_v16 = vpop.permute.xlu1 %2215 }
 0x3f4   : > { %6342 = vst [vmem:[#allocation8_spill] sm:$0xff] %v4666_v16  ;;  %v4680_v21 = vpop.permute.xlu0 %2315 }
 0x3f5   : > { %6345 = vst [vmem:[#allocation11_spill] sm:$0xff] %v4680_v21 }
 0x3f7   : > { %v4670_v26 = vpop.permute.xlu1 %2373 }
 0x3f8   : > { %v4684_v33 = vpop.permute.xlu0 %2563 }
 0x3f9   : > { %6347 = vst [vmem:[#allocation13_spill] sm:$0xff] %v4684_v33 }
 0x3fb   : > { %v4674_v23 = vpop.permute.xlu1 %2457 }
 0x3fc   : > { %v4690_v36 = vpop.permute.xlu0 %2073 }
 0x3fd   : > { %6350 = vst [vmem:[#allocation16_spill] sm:$0xff] %v4690_v36 }
 0x3ff   : > { %v4678_v29 = vpop.permute.xlu1 %1977 }
 0x400   : > { %6344 = vst [vmem:[#allocation10_spill] sm:$0xff] %v4678_v29  ;;  %v4694_v18 = vpop.permute.xlu0 %2405 }
 0x401   : > { %6352 = vst [vmem:[#allocation18_spill] sm:$0xff] %v4694_v18 }
 0x403   : > { %v4682_v32 = vpop.permute.xlu1 %2141 }
 0x404   : > { %6346 = vst [vmem:[#allocation12_spill] sm:$0xff] %v4682_v32  ;;  %v4698_v2 = vpop.permute.xlu0 %1937  ;;  %v6369_v32 = vmov 6  }
 0x407   : > { %v4686_v27 = vpop.permute.xlu1 %2223 }
 0x408   : > { %6348 = vst [vmem:[#allocation14_spill] sm:$0xff] %v4686_v27  ;;  %v4702_v3 = vpop.permute.xlu0 %2183 }
 0x40b   : > { %v4688_v35 = vpop.permute.xlu1 %2381 }
 0x40c   : > { %6349 = vst [vmem:[#allocation15_spill] sm:$0xff] %v4688_v35  ;;  %v4706_v30 = vpop.permute.xlu0 %2349 }
 0x40f   : > { %v4692_v37 = vpop.permute.xlu1 %2465 }
 0x410   : > { %6351 = vst [vmem:[#allocation17_spill] sm:$0xff] %v4692_v37  ;;  %v4718_v36 = vpop.permute.xlu0 %1855  ;;  %v6375_v37 = vmov 8  }
 0x411   : > { %6359 = vst [vmem:[#allocation23_spill] sm:$0xff] %v4718_v36 }
 0x413   : > { %v4696_v17 = vpop.permute.xlu1 %1985 }
 0x414   : > { %6353 = vst [vmem:[#allocation19_spill] sm:$0xff] %v4696_v17 }
 0x417   : > { %v4700_v52 = vpop.permute.xlu1 %2149 }
 0x418   : > { %6354 = vst [vmem:[#allocation20_spill] sm:$0xff] %v4700_v52  ;;  %v4726_v52 = vpop.permute.xlu0 %2033 }
 0x41b   : > { %v4704_v58 = vpop.permute.xlu1 %2231 }
 0x41c   : > { %6355 = vst [vmem:[#allocation21_spill] sm:$0xff] %v4704_v58  ;;  %v4738_v36 = vpop.permute.xlu0 %2283 }
 0x41f   : > { %v4708_v33 = vpop.permute.xlu1 %2389 }
 0x420   : > { %6356 = vst [vmem:[#allocation22_spill] sm:$0xff] %v4708_v33 }
 0x423   : > { %v4724_v58 = vpop.permute.xlu1 %2473 }
 0x424   : > { %6361 = vst [vmem:[#allocation24_spill] sm:$0xff] %v4724_v58  ;;  %v4746_v58 = vpop.permute.xlu0 %2531 }
 0x425   : > { %6364 = vst [vmem:[#allocation27_spill] sm:$0xff] %v4746_v58 }
 0x427   : > { %v4732_v24 = vpop.permute.xlu1 %1993 }
 0x428   : > { %6362 = vst [vmem:[#allocation25_spill] sm:$0xff] %v4732_v24  ;;  %v4758_v33 = vpop.permute.xlu0 %1871 }
 0x429   : > { %6366 = vst [vmem:[#allocation29_spill] sm:$0xff] %v4758_v33  ;;  %v6371_v33 = vmov 7  }
 0x42b   : > { %v4744_v17 = vpop.permute.xlu1 %2157 }
 0x42c   : > { %6363 = vst [vmem:[#allocation26_spill] sm:$0xff] %v4744_v17  ;;  %v4765_v17 = vpop.permute.xlu0 %2875 }
 0x42d   : > { %6368 = vst [vmem:[#allocation31_spill] sm:$0xff] %v4765_v17 }
 0x42f   : > { %v4752_v24 = vpop.permute.xlu1 %2239 }
 0x430   : > { %6365 = vst [vmem:[#allocation28_spill] sm:$0xff] %v4752_v24 }
 0x433   : > { %v4760_v27 = vpop.permute.xlu1 %2397 }
 0x434   : > { %6367 = vst [vmem:[#allocation30_spill] sm:$0xff] %v4760_v27  ;;  %v4774_v27 = vpop.permute.xlu0 %2041 }
 0x437   : > { %v4769_v24 = vpop.permute.xlu1 %2481 }
 0x438   : > { %6370 = vst [vmem:[#allocation32_spill] sm:$0xff] %v4769_v24  ;;  %v4784_v17 = vpop.permute.xlu0 %2291 }
 0x43b   : > { %v4777_v29 = vpop.permute.xlu1 %2323 }
 0x43c   : > { %6372 = vst [vmem:[#allocation33_spill] sm:$0xff] %v4777_v29  ;;  %v4790_v35 = vpop.permute.xlu0 %2539 }
 0x43f   : > { %v4786_v24 = vpop.permute.xlu1 %2489 }
 0x440   : > { %6374 = vst [vmem:[#allocation34_spill] sm:$0xff] %v4786_v24  ;;  %v1880_v29 = vpop.permute.xlu0 %1879 }
 0x444   : > { %v4799_v60 = vpop.permute.xlu0 %2883 }
 0x445   : > { %6378 = vst [vmem:[#allocation37_spill] sm:$0xff] %v4799_v60 }
 0x4bb   : > { %v4710_v21 = vpop.f32.mrb[4].mxu0 }
 0x4bc   : > { %1667 = vrot.lane.b32.xlu0 %v4710_v21, %s6357_s8  ;;  %1506 = vrot.lane.b32.xlu1 %v4710_v21, %s6358_s26  ;;  %v4716_v18 = vpop.f32.mrb[5].mxu0 }
 0x4c0   : > { %1526 = vrot.lane.b32.xlu1 %v4710_v21, %s6360_s1  ;;  %1508 = vrot.lane.b32.xlu0 %v4716_v18, %s6358_s26 }
 0x4c4   : > { %1547 = vrot.lane.b32.xlu1 %v4710_v21, %s6332_s6  ;;  %1528 = vrot.lane.b32.xlu0 %v4716_v18, %s6360_s1 }
 0x4c8   : > { %1568 = vrot.lane.b32.xlu1 %v4710_v21, %s6333_s0  ;;  %1549 = vrot.lane.b32.xlu0 %v4716_v18, %s6332_s6  ;;  %s3898_s6 = smov 34  }
 0x4cc   : > { %1604 = vrot.lane.b32.xlu1 %v4710_v21, %s6334_s9  ;;  %1570 = vrot.lane.b32.xlu0 %v4716_v18, %s6333_s0 }
 0x4d0   : > { %1625 = vrot.lane.b32.xlu1 %v4710_v21, %s6335_s29  ;;  %1606 = vrot.lane.b32.xlu0 %v4716_v18, %s6334_s9  ;;  %s3900_s9 = smov 30  }
 0x4d4   : > { %1646 = vrot.lane.b32.xlu1 %v4710_v21, %s6336_s7  ;;  %1627 = vrot.lane.b32.xlu0 %v4716_v18, %s6335_s29  ;;  %s6310_s29 = smov 126  }
 0x4d8   : > { %2977 = vperm.xlu1 %3863, %v4607_v39   ;;  %1648 = vrot.lane.b32.xlu0 %v4716_v18, %s6336_s7  ;;  %s6393_s7 = sld [smem:[#allocation86_spill]] }
 0x4dc   : > { %3865 = vset.pattern.permute.xlu1 %v6369_v32  ;;  %1895 = vperm.xlu0 %3861, %v4490_v49   ;;  %v6373_v32 = vmov 0  }
 0x4dd   : > { %2985 = vperm.xlu1 %3865, %v4607_v39  }
 0x4e0   : > { %2899 = vperm.xlu0 %3861, %v4508_v31  }
 0x4e1   : > { %3867 = vset.pattern.permute.xlu1 %v6371_v33 }
 0x4e2   : > { %2993 = vperm.xlu1 %3867, %v4607_v39  }
 0x4e4   : > { %3864 = vset.pattern.permute.xlu0 %v6371_v33  ;;  %v4793_v33 = vpop.permute.xlu1 %2571 }
 0x4e5   : > { %1903 = vperm.xlu0 %3864, %v4490_v49   ;;  %6376 = vst [vmem:[#allocation35_spill] sm:$0xff] %v4793_v33 }
 0x4e6   : > { %1669 = vrot.lane.b32.xlu1 %v4716_v18, %s6357_s8 }
 0x4e7   : > { %3869 = vset.pattern.permute.xlu1 %v6373_v32 }
 0x4e8   : > { %v4796_v16 = vpop.permute.xlu1 %2846 }
 0x4e9   : > { %2907 = vperm.xlu0 %3864, %v4508_v31   ;;  %6377 = vst [vmem:[#allocation36_spill] sm:$0xff] %v4796_v16 }
 0x4ec   : > { %v4802_v24 = vpop.permute.xlu1 %1849 }
 0x4ed   : > { %3866 = vset.pattern.permute.xlu0 %v6375_v37  ;;  %6379 = vst [vmem:[#allocation38_spill] sm:$0xff] %v4802_v24  ;;  %v4805_v37 = vpop.permute.xlu0 %2049 }
 0x4ee   : > { %1911 = vperm.xlu0 %3866, %v4490_v49   ;;  %6380 = vst [vmem:[#allocation39_spill] sm:$0xff] %v4805_v37 }
 0x4f0   : > { %v4808_v33 = vpop.permute.xlu1 %2853 }
 0x4f1   : > { %6381 = vst [vmem:[#allocation40_spill] sm:$0xff] %v4808_v33  ;;  %v4813_v16 = vpop.permute.xlu0 %2299 }
 0x4f2   : > { %2915 = vperm.xlu0 %3866, %v4508_v31   ;;  %v3641_v31 = vld [vmem:[%s6175_s18 + $0x28] sm:$0x3f]  ;;  %6382 = vst [vmem:[#allocation41_spill] sm:$0xff] %v4813_v16 }
 0x4f4   : > { %v4815_v60 = vpop.permute.xlu1 %2859 }
 0x4f5   : > { %6383 = vst [vmem:[#allocation42_spill] sm:$0xff] %v4815_v60  ;;  %v3605_v60 = vld [vmem:[%s6393_s7 + $0x8] sm:$0x3] }
 0x4f6   : > { %3001 = vperm.xlu0 %3866, %v4607_v39  }
 0x4f8   : > { %v4819_v24 = vpop.permute.xlu1 %1863 }
 0x4f9   : > { %6385 = vst [vmem:[#allocation44_spill] sm:$0xff] %v4819_v24 }
 0x4fa   : > { %3868 = vset.pattern.permute.xlu0 %v6373_v32  ;;  %v4817_v32 = vpop.permute.xlu0 %2547 }
 0x4fb   : > { %1842 = vperm.xlu0 %3868, %v4490_v49   ;;  %6384 = vst [vmem:[#allocation43_spill] sm:$0xff] %v4817_v32 }
 0x4fc   : > { %v4823_v37 = vpop.permute.xlu1 %2867 }
 0x4fd   : > { %6387 = vst [vmem:[#allocation46_spill] sm:$0xff] %v4823_v37  ;;  %v1599_v37 = vrot.slane %v3605_v60, %v4106_v15 }
 0x4fe   : > { %v4821_v49 = vpop.permute.xlu0 %1887 }
 0x4ff   : > { %2932 = vperm.xlu0 %3868, %v4607_v39   ;;  %6386 = vst [vmem:[#allocation45_spill] sm:$0xff] %v4821_v49  ;;  %v1595_v49 = vrot.slane %v3605_v60, %v4104_v14  ;;  %v4863_v60 = vld [vmem:[%s6393_s7 + $0x2] sm:$0x3] }
 0x500   : > { %v4827_v33 = vpop.permute.xlu1 %2945 }
 0x501   : > { %6389 = vst [vmem:[#allocation48_spill] sm:$0xff] %v4827_v33  ;;  %v4847_v33 = vmul.f32 %v1595_v49, %v4710_v21 }
 0x502   : > { %v4825_v39 = vpop.permute.xlu0 %2891 }
 0x503   : > { %2939 = vperm.xlu0 %3868, %v3641_v31   ;;  %6388 = vst [vmem:[#allocation47_spill] sm:$0xff] %v4825_v39  ;;  %6397 = vst [vmem:[#allocation55_spill] sm:$0xff] %v4847_v33  ;;  %v4885_v49 = vmul.f32 %v4638_v62, %v4847_v33  ;;  %v4905_v16 = vmul.f32 %v4670_v26, %v4847_v33 }
 0x504   : > { %v4831_v58 = vpop.permute.xlu1 %2953 }
 0x505   : > { %6391 = vst [vmem:[#allocation50_spill] sm:$0xff] %v4831_v58  ;;  %v1512_v58 = vld [vmem:[%s6393_s7] sm:$0x3]  ;;  %6404 = vst [vmem:[#allocation61_spill] sm:$0xff] %v4885_v49 }
 0x506   : > { %v4829_v6 = vpop.permute.xlu0 %2057  ;;  %v1517_v21 = vrot.slane %v1512_v58, %v4104_v14  ;;  %6409 = vst [vmem:[#allocation66_spill] sm:$0xff] %v4905_v16 }
 0x507   : > { %6390 = vst [vmem:[#allocation49_spill] sm:$0xff] %v4829_v6  ;;  %v4873_v6 = vmul.f32 %v1880_v29, %v4847_v33 }
 0x508   : > { %v4838_v32 = vpop.permute.xlu1 %2961 }
 0x509   : > { %6394 = vst [vmem:[#allocation52_spill] sm:$0xff] %v4838_v32  ;;  %v4858_v32 = vmul.f32 %v1599_v37, %v4716_v18  ;;  %6402 = vst [vmem:[#allocation59_spill] sm:$0xff] %v4873_v6  ;;  %v1521_v18 = vrot.slane %v1512_v58, %v4106_v15  ;;  %v4893_v58 = vmul.f32 %v4642_v22, %v4847_v33  ;;  %v4914_v6 = vld [vmem:[%s6393_s7 + $0x4] sm:$0x3] }
 0x50a   : > { %v4833_v31 = vpop.permute.xlu0 %2307  ;;  %v4897_v37 = vmul.f32 %v4646_v59, %v4847_v33 }
 0x50b   : > { %6392 = vst [vmem:[#allocation51_spill] sm:$0xff] %v4833_v31  ;;  %v4855_v31 = vld [vmem:[%s6398_s2 + $0x8] sm:$0x3]  ;;  %6400 = vst [vmem:[#allocation57_spill] sm:$0xff] %v4858_v32  ;;  %v4927_v16 = vmul.f32 %v4638_v62, %v4858_v32  ;;  %v4948_v62 = vmul.f32 %v4646_v59, %v4858_v32  ;;  %v4969_v59 = vld [vmem:[%s6393_s7 + $0xc] sm:$0x3] }
 0x50c   : > { %v4844_v39 = vpop.permute.xlu1 %2969  ;;  %6399 = vst [vmem:[#allocation56_spill] sm:$0xff] %v4855_v31  ;;  %6406 = vst [vmem:[#allocation63_spill] sm:$0xff] %v4893_v58  ;;  %v4909_v31 = vmul.f32 %v4674_v23, %v4847_v33  ;;  %v4935_v58 = vmul.f32 %v4642_v22, %v4858_v32 }
 0x50d   : > { %6396 = vst [vmem:[#allocation54_spill] sm:$0xff] %v4844_v39  ;;  %6407 = vst [vmem:[#allocation64_spill] sm:$0xff] %v4897_v37  ;;  %v4919_v37 = vld [vmem:[%s6393_s7 + $0x6] sm:$0x3] }
 0x50e   : > { %v4842_v24 = vpop.permute.xlu0 %2555  ;;  %6410 = vst [vmem:[#allocation67_spill] sm:$0xff] %v4909_v31  ;;  %6412 = vst [vmem:[#allocation69_spill] sm:$0xff] %v4927_v16  ;;  %v4931_v31 = vmul.f32 %v4774_v27, %v4858_v32 }
 0x50f   : > { %6395 = vst [vmem:[#allocation53_spill] sm:$0xff] %v4842_v24  ;;  %v4889_v24 = vmul.f32 %v4774_v27, %v4847_v33  ;;  %6414 = vst [vmem:[#allocation71_spill] sm:$0xff] %v4935_v58  ;;  %v4952_v27 = vmul.f32 %v4784_v17, %v4858_v32 }
 0x510   : > { %6413 = vst [vmem:[#allocation70_spill] sm:$0xff] %v4931_v31  ;;  %6415 = vst [vmem:[#allocation72_spill] sm:$0xff] %v4948_v62 }
 0x511   : > { %6405 = vst [vmem:[#allocation62_spill] sm:$0xff] %v4889_v24  ;;  %6416 = vst [vmem:[#allocation73_spill] sm:$0xff] %v4952_v27 }
 0x512   : > { %6421 = vst [vmem:[#allocation78_spill] sm:$0xff] %v4969_v59 }
 0x52e   : > { %v4865_v39 = vpop.permute.xlu0 %1667  ;;  %v1507_v55 = vpop.permute.xlu1 %1506 }
 0x52f   : > { %6401 = vst [vmem:[#allocation58_spill] sm:$0xff] %v4865_v39  ;;  %v4881_v39 = vmul.f32 %v1880_v29, %v4858_v32  ;;  %v4901_v29 = vmul.f32 %v4784_v17, %v4847_v33 }
 0x531   : > { %6403 = vst [vmem:[#allocation60_spill] sm:$0xff] %v4881_v39  ;;  %6408 = vst [vmem:[#allocation65_spill] sm:$0xff] %v4901_v29  ;;  %v4923_v29 = vmul.f32 %v4790_v35, %v4847_v33  ;;  %v4944_v33 = vld [vmem:[%s6393_s7 + $0xa] sm:$0x3] }
 0x532   : > { %v1509_v39 = vpop.permute.xlu0 %1508 }
 0x533   : > { %6411 = vst [vmem:[#allocation68_spill] sm:$0xff] %v4923_v29  ;;  %v1510_v24 = vsel %vm802_vm4, %v1507_v55, %v1509_v39  ;;  %v1511_v49 = vsel %vm802_vm4, %v1509_v39, %v1507_v55  ;;  %v4960_v55 = vmul.f32 %v4670_v26, %v4858_v32  ;;  %v4964_v39 = vmul.f32 %v4674_v23, %v4858_v32  ;;  %v4984_v23 = vld [vmem:[%s6393_s7 + $0xe] sm:$0x3] }
 0x534   : > { %v4954_v22 = vmul.f32 %v1517_v21, %v1511_v49  ;;  %v4956_v29 = vmul.f32 %v1521_v18, %v1510_v24  ;;  %v4979_v26 = vmul.f32 %v4790_v35, %v4858_v32  ;;  %v1527_v49 = vpop.permute.xlu1 %1526  ;;  %v4997_v32 = vld [vmem:[%s6398_s2] sm:$0x3]  ;;  %v5010_v35 = vld [vmem:[%s6393_s7 + $0x10] sm:$0x3] }
 0x535   : > { %6419 = vst [vmem:[#allocation76_spill] sm:$0xff] %v4960_v55  ;;  %6420 = vst [vmem:[#allocation77_spill] sm:$0xff] %v4964_v39 }
 0x536   : > { %6417 = vst [vmem:[#allocation74_spill] sm:$0xff] %v4954_v22  ;;  %6418 = vst [vmem:[#allocation75_spill] sm:$0xff] %v4956_v29  ;;  %v1927_v18 = vmul.f32 %v4541_v56, %v4954_v22  ;;  %v1928_v17 = vmul.f32 %v4541_v56, %v4956_v29  ;;  %v1529_v24 = vpop.permute.xlu0 %1528  ;;  %v2008_v39 = vmul.f32 %v4640_v63, %v4956_v29 }
 0x537   : > { %6422 = vst [vmem:[#allocation79_spill] sm:$0xff] %v4979_v26  ;;  %6423 = vst [vmem:[#allocation80_spill] sm:$0xff] %v4997_v32  ;;  %v2007_v26 = vmul.f32 %v4640_v63, %v4954_v22  ;;  %v2091_v55 = vmul.f32 %v4550_v9, %v4954_v22  ;;  %v2092_v62 = vmul.f32 %v4550_v9, %v4956_v29 }
 0x538   : > { %6424 = vst [vmem:[#allocation81_spill] sm:$0xff] %v5010_v35  ;;  %v2173_v21 = vmul.f32 %v4644_v25, %v4954_v22  ;;  %v2174_v27 = vmul.f32 %v4644_v25, %v4956_v29  ;;  %v1934_v9 = vadd.f32 %v4554_v34, %v1927_v18  ;;  %v1935_v16 = vadd.f32 %v4554_v34, %v1928_v17  ;;  %v1548_v56 = vpop.permute.xlu1 %1547 }
 0x539   : > { %v2014_v45 = vadd.f32 %v4562_v57, %v2007_v26  ;;  %v2015_v25 = vadd.f32 %v4562_v57, %v2008_v39  ;;  %v2257_v58 = vmul.f32 %v4578_v0, %v4954_v22  ;;  %v2258_v31 = vmul.f32 %v4578_v0, %v4956_v29 }
 0x53a   : > { %v1550_v63 = vpop.permute.xlu0 %1549  ;;  %v2098_v18 = vadd.f32 %v4648_v50, %v2091_v55  ;;  %v2099_v34 = vadd.f32 %v4648_v50, %v2092_v62  ;;  %v2339_v17 = vmul.f32 %v4583_v4, %v4954_v22  ;;  %v2340_v59 = vmul.f32 %v4583_v4, %v4956_v29 }
 0x53b   : > { %v2180_v26 = vadd.f32 %v4575_v19, %v2173_v21  ;;  %v2181_v57 = vadd.f32 %v4575_v19, %v2174_v27  ;;  %v2423_v39 = vmul.f32 %v4652_v44, %v4954_v22  ;;  %v2424_v0 = vmul.f32 %v4652_v44, %v4956_v29 }
 0x53c   : > { %v2505_v50 = vmul.f32 %v4591_v8, %v4954_v22  ;;  %v2506_v62 = vmul.f32 %v4591_v8, %v4956_v29  ;;  %v1530_v4 = vsel %vm823_vm1, %v1527_v49, %v1529_v24  ;;  %v1531_v55 = vsel %vm823_vm1, %v1529_v24, %v1527_v49 }
 0x53d   : > { %v2264_v19 = vadd.f32 %v4656_v5, %v2257_v58  ;;  %v2265_v27 = vadd.f32 %v4656_v5, %v2258_v31  ;;  %v6425_v21 = vrot.slane %v4863_v60, %v4104_v14  ;;  %v6427_v32 = vrot.slane %v4863_v60, %v4106_v15 }
 0x53e   : > { %v2346_v8 = vadd.f32 %v4615_v41, %v2339_v17  ;;  %v2347_v29 = vadd.f32 %v4615_v41, %v2340_v59  ;;  %v1551_v24 = vsel %vm845_vm2, %v1548_v56, %v1550_v63  ;;  %v1552_v5 = vsel %vm845_vm2, %v1550_v63, %v1548_v56  ;;  %v1571_v31 = vpop.permute.xlu0 %1570  ;;  %v1569_v63 = vpop.permute.xlu1 %1568 }
 0x53f   : > { %v5065_v44 = vmul.f32 %v6425_v21, %v1531_v55  ;;  %v5070_v22 = vmul.f32 %v6427_v32, %v1530_v4  ;;  %v2430_v41 = vadd.f32 %v4619_v42, %v2423_v39  ;;  %v2431_v59 = vadd.f32 %v4619_v42, %v2424_v0 }
 0x540   : > { %v2512_v17 = vadd.f32 %v4660_v7, %v2505_v50  ;;  %v2513_v56 = vadd.f32 %v4660_v7, %v2506_v62  ;;  %v6428_v4 = vrot.slane %v4914_v6, %v4104_v14  ;;  %v1573_v42 = vsel %vm867_vm0, %v1571_v31, %v1569_v63 }
 0x541   : > { %6426 = vst [vmem:[#allocation82_spill] sm:$0xff] %v5065_v44  ;;  %v1940_v58 = vmul.f32 %v4698_v2, %v5065_v44  ;;  %v1941_v49 = vmul.f32 %v4698_v2, %v5070_v22  ;;  %v2020_v32 = vmul.f32 %v4566_v38, %v5065_v44  ;;  %v2021_v60 = vmul.f32 %v4566_v38, %v5070_v22 }
 0x542   : > { %v5093_v55 = vmul.f32 %v6428_v4, %v1552_v5  ;;  %v6429_v2 = vrot.slane %v4914_v6, %v4106_v15  ;;  %v1572_v38 = vsel %vm867_vm0, %v1569_v63, %v1571_v31  ;;  %v2104_v7 = vmul.f32 %v4571_v61, %v5065_v44 }
 0x543   : > { %v2105_v39 = vmul.f32 %v4571_v61, %v5070_v22  ;;  %v2186_v0 = vmul.f32 %v4702_v3, %v5065_v44  ;;  %v2187_v6 = vmul.f32 %v4702_v3, %v5070_v22  ;;  %v1942_v50 = vadd.f32 %v1940_v58, %v1934_v9 }
 0x544   : > { %v5098_v21 = vmul.f32 %v6429_v2, %v1551_v24  ;;  %v1943_v62 = vadd.f32 %v1941_v49, %v1935_v16  ;;  %v2022_v24 = vadd.f32 %v2020_v32, %v2014_v45  ;;  %v2023_v5 = vadd.f32 %v2021_v60, %v2015_v25 }
 0x545   : > { %v2270_v4 = vmul.f32 %v4610_v40, %v5065_v44  ;;  %v2271_v31 = vmul.f32 %v4610_v40, %v5070_v22  ;;  %v2352_v63 = vmul.f32 %v4706_v30, %v5065_v44  ;;  %v2353_v61 = vmul.f32 %v4706_v30, %v5070_v22 }
 0x546   : > { %v2436_v2 = vmul.f32 %v4623_v12, %v5065_v44  ;;  %v2437_v3 = vmul.f32 %v4623_v12, %v5070_v22  ;;  %v2518_v45 = vmul.f32 %v4626_v43, %v5065_v44  ;;  %v2519_v16 = vmul.f32 %v4626_v43, %v5070_v22 }
 0x547   : > { %v2106_v9 = vadd.f32 %v2104_v7, %v2098_v18  ;;  %v2107_v40 = vadd.f32 %v2105_v39, %v2099_v34  ;;  %v2188_v25 = vadd.f32 %v2186_v0, %v2180_v26  ;;  %v2189_v58 = vadd.f32 %v2187_v6, %v2181_v57  ;;  %v1607_v7 = vpop.permute.xlu0 %1606 }
 0x548   : > { %v1948_v49 = vmul.f32 %v4593_v53, %v5093_v55  ;;  %v1949_v30 = vmul.f32 %v4593_v53, %v5098_v21  ;;  %v2028_v32 = vmul.f32 %v4664_v11, %v5093_v55  ;;  %v2029_v12 = vmul.f32 %v4664_v11, %v5098_v21 }
 0x549   : > { %v2272_v60 = vadd.f32 %v2270_v4, %v2264_v19  ;;  %v2273_v35 = vadd.f32 %v2271_v31, %v2265_v27  ;;  %v2354_v44 = vadd.f32 %v2352_v63, %v2346_v8  ;;  %v2355_v43 = vadd.f32 %v2353_v61, %v2347_v29 }
 0x54a   : > { %v2438_v18 = vadd.f32 %v2436_v2, %v2430_v41  ;;  %v2439_v34 = vadd.f32 %v2437_v3, %v2431_v59  ;;  %v2520_v26 = vadd.f32 %v2518_v45, %v2512_v17  ;;  %v2521_v57 = vadd.f32 %v2519_v16, %v2513_v56  ;;  %v1605_v41 = vpop.permute.xlu1 %1604 }
 0x54b   : > { %v2112_v39 = vmul.f32 %v4597_v1, %v5093_v55  ;;  %v2113_v53 = vmul.f32 %v4597_v1, %v5098_v21  ;;  %v2194_v0 = vmul.f32 %v4602_v54, %v5093_v55  ;;  %v2195_v11 = vmul.f32 %v4602_v54, %v5098_v21  ;;  %v1628_v2 = vpop.permute.xlu0 %1627 }
 0x54c   : > { %v1950_v19 = vadd.f32 %v1948_v49, %v1942_v50  ;;  %v1951_v27 = vadd.f32 %v1949_v30, %v1943_v62  ;;  %v2030_v29 = vadd.f32 %v2028_v32, %v2022_v24  ;;  %v2031_v8 = vadd.f32 %v2029_v12, %v2023_v5 }
 0x54d   : > { %v2278_v59 = vmul.f32 %v4668_v20, %v5093_v55  ;;  %v2279_v17 = vmul.f32 %v4668_v20, %v5098_v21  ;;  %v2360_v1 = vmul.f32 %v4634_v48, %v5093_v55  ;;  %v2361_v56 = vmul.f32 %v4634_v48, %v5098_v21 }
 0x54e   : > { %v2444_v54 = vmul.f32 %v4636_v51, %v5093_v55  ;;  %v2445_v6 = vmul.f32 %v4636_v51, %v5098_v21  ;;  %v2526_v50 = vmul.f32 %v4672_v28, %v5093_v55  ;;  %v2527_v62 = vmul.f32 %v4672_v28, %v5098_v21  ;;  %v1626_v49 = vpop.permute.xlu1 %1625 }
 0x54f   : > { %v2114_v24 = vadd.f32 %v2112_v39, %v2106_v9  ;;  %v2115_v20 = vadd.f32 %v2113_v53, %v2107_v40  ;;  %v2196_v5 = vadd.f32 %v2194_v0, %v2188_v25  ;;  %v2197_v4 = vadd.f32 %v2195_v11, %v2189_v58  ;;  %v5216_v0 = vpop.permute.xlu0 %1648 }
 0x550   : > { %v6430_v31 = vrot.slane %v4919_v37, %v4104_v14  ;;  %v6431_v63 = vrot.slane %v4919_v37, %v4106_v15  ;;  %v1608_v51 = vsel %vm903_vm3, %v1605_v41, %v1607_v7  ;;  %v1609_v28 = vsel %vm903_vm3, %v1607_v7, %v1605_v41  ;;  %v6437_v41 = vld [vmem:[#allocation27_spill] sm:$0xff] }
 0x551   : > { %v2280_v3 = vadd.f32 %v2278_v59, %v2272_v60  ;;  %v2281_v45 = vadd.f32 %v2279_v17, %v2273_v35  ;;  %v2362_v16 = vadd.f32 %v2360_v1, %v2354_v44  ;;  %v2363_v9 = vadd.f32 %v2361_v56, %v2355_v43 }
 0x552   : > { %v5163_v48 = vmul.f32 %v6430_v31, %v1573_v42  ;;  %v5168_v61 = vmul.f32 %v6431_v63, %v1572_v38  ;;  %v2446_v40 = vadd.f32 %v2444_v54, %v2438_v18  ;;  %v2447_v25 = vadd.f32 %v2445_v6, %v2439_v34 }
 0x553   : > { %v2528_v42 = vadd.f32 %v2526_v50, %v2520_v26  ;;  %v2529_v58 = vadd.f32 %v2527_v62, %v2521_v57  ;;  %v6432_v37 = vrot.slane %v4944_v33, %v4104_v14  ;;  %v6433_v30 = vrot.slane %v4944_v33, %v4106_v15 }
 0x554   : > { %v5186_v35 = vsel %vm925_vm9, %v1626_v49, %v1628_v2  ;;  %v5190_v44 = vsel %vm925_vm9, %v1628_v2, %v1626_v49  ;;  %v1956_v12 = vmul.f32 %v4628_v13, %v5163_v48  ;;  %v1957_v60 = vmul.f32 %v4628_v13, %v5168_v61  ;;  %v5226_v49 = vpop.permute.xlu1 %1646 }
 0x555   : > { %v5177_v38 = vmul.f32 %v6432_v37, %v1608_v51  ;;  %v5182_v32 = vmul.f32 %v6433_v30, %v1609_v28  ;;  %v2036_v43 = vmul.f32 %v4726_v52, %v5163_v48  ;;  %v2037_v33 = vmul.f32 %v4726_v52, %v5168_v61  ;;  %v6435_v52 = vld [vmem:[#allocation4_spill] sm:$0xff] }
 0x556   : > { %v2120_v18 = vmul.f32 %v4630_v46, %v5163_v48  ;;  %v2121_v34 = vmul.f32 %v4630_v46, %v5168_v61  ;;  %v2202_v26 = vmul.f32 %v4632_v47, %v5163_v48  ;;  %v2203_v57 = vmul.f32 %v4632_v47, %v5168_v61  ;;  %v6436_v46 = vld [vmem:[#allocation5_spill] sm:$0xff] }
 0x557   : > { %6434 = vst [vmem:[#allocation83_spill] sm:$0xff] %v5182_v32  ;;  %v2286_v13 = vmul.f32 %v4738_v36, %v5163_v48  ;;  %v2287_v7 = vmul.f32 %v4738_v36, %v5168_v61  ;;  %v2368_v39 = vmul.f32 %v6435_v52, %v5163_v48  ;;  %v2369_v53 = vmul.f32 %v6435_v52, %v5168_v61 }
 0x558   : > { %v2452_v11 = vmul.f32 %v6436_v46, %v5163_v48  ;;  %v2453_v47 = vmul.f32 %v6436_v46, %v5168_v61  ;;  %v2534_v59 = vmul.f32 %v6437_v41, %v5163_v48  ;;  %v2535_v36 = vmul.f32 %v6437_v41, %v5168_v61 }
 0x559   : > { %v1958_v17 = vadd.f32 %v1956_v12, %v1950_v19  ;;  %v1959_v1 = vadd.f32 %v1957_v60, %v1951_v27  ;;  %v2038_v56 = vadd.f32 %v2036_v43, %v2030_v29  ;;  %v2039_v54 = vadd.f32 %v2037_v33, %v2031_v8  ;;  %v6438_v19 = vld [vmem:[#allocation61_spill] sm:$0xff]  ;;  %v6446_v60 = vld [vmem:[#allocation39_spill] sm:$0xff] }
 0x55a   : > { %v2122_v6 = vadd.f32 %v2120_v18, %v2114_v24  ;;  %v2123_v50 = vadd.f32 %v2121_v34, %v2115_v20  ;;  %v2204_v62 = vadd.f32 %v2202_v26, %v2196_v5  ;;  %v2288_v31 = vadd.f32 %v2286_v13, %v2280_v3  ;;  %v6439_v29 = vld [vmem:[#allocation69_spill] sm:$0xff]  ;;  %v6440_v24 = vld [vmem:[#allocation6_spill] sm:$0xff]  ;;  %v6447_v18 = vld [vmem:[#allocation7_spill] sm:$0xff]  ;;  %v5247_v26 = vpop.permute.xlu1 %2977 }
 0x55b   : > { %v2205_v63 = vadd.f32 %v2203_v57, %v2197_v4  ;;  %v2289_v51 = vadd.f32 %v2287_v7, %v2281_v45  ;;  %v2370_v28 = vadd.f32 %v2368_v39, %v2362_v16  ;;  %v2371_v2 = vadd.f32 %v2369_v53, %v2363_v9  ;;  %v5228_v37 = vpop.permute.xlu0 %1895  ;;  %v6441_v4 = vld [vmem:[#allocation62_spill] sm:$0xff]  ;;  %v6442_v45 = vld [vmem:[#allocation63_spill] sm:$0xff]  ;;  %v6443_v9 = vld [vmem:[#allocation64_spill] sm:$0xff]  ;;  %6448 = vst [vmem:[#allocation4_spill] sm:$0xff] %v5247_v26 }
 0x55c   : > { %v2454_v30 = vadd.f32 %v2452_v11, %v2446_v40  ;;  %v2455_v52 = vadd.f32 %v2453_v47, %v2447_v25  ;;  %v2536_v46 = vadd.f32 %v2534_v59, %v2528_v42  ;;  %v2537_v41 = vadd.f32 %v2535_v36, %v2529_v58  ;;  %v6444_v40 = vld [vmem:[#allocation65_spill] sm:$0xff]  ;;  %v6445_v42 = vld [vmem:[#allocation70_spill] sm:$0xff]  ;;  %v6451_v39 = vld [vmem:[#allocation67_spill] sm:$0xff] }
 0x55d   : > { %v1966_v27 = vadd.f32 %v6438_v19, %v1958_v17  ;;  %v1967_v8 = vadd.f32 %v6439_v29, %v1959_v1  ;;  %v1972_v20 = vmul.f32 %v6440_v24, %v5177_v38  ;;  %v1973_v5 = vmul.f32 %v6440_v24, %v5182_v32  ;;  %v6450_v13 = vld [vmem:[#allocation66_spill] sm:$0xff]  ;;  %v6452_v11 = vld [vmem:[#allocation71_spill] sm:$0xff]  ;;  %v6453_v36 = vld [vmem:[#allocation68_spill] sm:$0xff] }
 0x55e   : > { %v2046_v3 = vadd.f32 %v6441_v4, %v2038_v56  ;;  %v2130_v16 = vadd.f32 %v6442_v45, %v2122_v6  ;;  %v2212_v12 = vadd.f32 %v6443_v9, %v2204_v62  ;;  %v2296_v25 = vadd.f32 %v6444_v40, %v2288_v31  ;;  %v6455_v62 = vld [vmem:[#allocation72_spill] sm:$0xff]  ;;  %v6505_v26 = vld [vmem:[#allocation25_spill] sm:$0xff] }
 0x55f   : > { %v2047_v58 = vadd.f32 %v6445_v42, %v2039_v54  ;;  %v2052_v43 = vmul.f32 %v6446_v60, %v5177_v38  ;;  %v2053_v33 = vmul.f32 %v6446_v60, %v5182_v32  ;;  %v2136_v34 = vmul.f32 %v6447_v18, %v5177_v38  ;;  %v5249_v57 = vpop.permute.xlu0 %2899  ;;  %v6454_v54 = vld [vmem:[#allocation73_spill] sm:$0xff]  ;;  %v6456_v19 = vld [vmem:[#allocation8_spill] sm:$0xff] }
 0x560   : > { %6449 = vst [vmem:[#allocation5_spill] sm:$0xff] %v5249_v57  ;;  %v2378_v7 = vadd.f32 %v6450_v13, %v2370_v28  ;;  %v2462_v53 = vadd.f32 %v6451_v39, %v2454_v30  ;;  %v2131_v47 = vadd.f32 %v6452_v11, %v2123_v50  ;;  %v2137_v59 = vmul.f32 %v6447_v18, %v5182_v32  ;;  %v6457_v30 = vld [vmem:[#allocation41_spill] sm:$0xff]  ;;  %v6463_v18 = vld [vmem:[#allocation78_spill] sm:$0xff] }
 0x561   : > { %v2544_v17 = vadd.f32 %v6453_v36, %v2536_v46  ;;  %v1974_v1 = vadd.f32 %v1972_v20, %v1966_v27  ;;  %v1975_v56 = vadd.f32 %v1973_v5, %v1967_v8  ;;  %v2297_v6 = vadd.f32 %v6454_v54, %v2289_v51  ;;  %v6458_v51 = vld [vmem:[#allocation76_spill] sm:$0xff]  ;;  %v6460_v42 = vld [vmem:[#allocation77_spill] sm:$0xff]  ;;  %v6469_v36 = vld [vmem:[#allocation43_spill] sm:$0xff] }
 0x562   : > { %v2213_v31 = vadd.f32 %v6455_v62, %v2205_v63  ;;  %v2218_v29 = vmul.f32 %v6456_v19, %v5177_v38  ;;  %v2219_v28 = vmul.f32 %v6456_v19, %v5182_v32  ;;  %v2303_v50 = vmul.f32 %v6457_v30, %v5182_v32  ;;  %v6459_v63 = vld [vmem:[#allocation15_spill] sm:$0xff] }
 0x563   : > { %v2054_v24 = vadd.f32 %v2052_v43, %v2046_v3  ;;  %v2055_v4 = vadd.f32 %v2053_v33, %v2047_v58  ;;  %v2138_v45 = vadd.f32 %v2136_v34, %v2130_v16  ;;  %v2302_v46 = vmul.f32 %v6457_v30, %v5177_v38  ;;  %v6461_v3 = vld [vmem:[#allocation17_spill] sm:$0xff]  ;;  %v5279_v43 = vpop.permute.xlu1 %2985  ;;  %v6472_v30 = vld [vmem:[#allocation12_spill] sm:$0xff] }
 0x564   : > { %v2139_v27 = vadd.f32 %v2137_v59, %v2131_v47  ;;  %v2305_v8 = vadd.f32 %v2303_v50, %v2297_v6  ;;  %v2379_v20 = vadd.f32 %v6458_v51, %v2371_v2  ;;  %v2384_v5 = vmul.f32 %v6459_v63, %v5177_v38  ;;  %v5270_v9 = vpop.permute.xlu0 %1903  ;;  %6462 = vst [vmem:[#allocation27_spill] sm:$0xff] %v5279_v43  ;;  %v6468_v47 = vld [vmem:[#allocation79_spill] sm:$0xff]  ;;  %v6470_v6 = vld [vmem:[#allocation10_spill] sm:$0xff] }
 0x565   : > { %v2385_v40 = vmul.f32 %v6459_v63, %v5182_v32  ;;  %v2463_v60 = vadd.f32 %v6460_v42, %v2455_v52  ;;  %v2468_v16 = vmul.f32 %v6461_v3, %v5177_v38  ;;  %v2469_v58 = vmul.f32 %v6461_v3, %v5182_v32  ;;  %v6473_v51 = vld [vmem:[#allocation14_spill] sm:$0xff] }
 0x566   : > { %v2220_v33 = vadd.f32 %v2218_v29, %v2212_v12  ;;  %v2221_v2 = vadd.f32 %v2219_v28, %v2213_v31  ;;  %v6464_v34 = vrot.slane %v6463_v18, %v4104_v14  ;;  %v6466_v52 = vrot.slane %v6463_v18, %v4106_v15  ;;  %v6471_v31 = vld [vmem:[#allocation49_spill] sm:$0xff] }
 0x567   : > { %v2304_v11 = vadd.f32 %v2302_v46, %v2296_v25  ;;  %v2545_v59 = vadd.f32 %v6468_v47, %v2537_v41  ;;  %v2550_v54 = vmul.f32 %v6469_v36, %v5177_v38  ;;  %v2551_v12 = vmul.f32 %v6469_v36, %v5182_v32  ;;  %v6477_v47 = vld [vmem:[#allocation22_spill] sm:$0xff] }
 0x568   : > { %v5285_v13 = vmul.f32 %v6464_v34, %v5186_v35  ;;  %v5291_v39 = vmul.f32 %v6466_v52, %v5190_v44  ;;  %v2386_v25 = vadd.f32 %v2384_v5, %v2378_v7  ;;  %v2387_v41 = vadd.f32 %v2385_v40, %v2379_v20  ;;  %v5314_v3 = vpop.permute.xlu0 %2907  ;;  %v5324_v20 = vpop.permute.xlu1 %2993 }
 0x569   : > { %v2470_v29 = vadd.f32 %v2468_v16, %v2462_v53  ;;  %v2471_v28 = vadd.f32 %v2469_v58, %v2463_v60  ;;  %6474 = vst [vmem:[#allocation6_spill] sm:$0xff] %v5314_v3  ;;  %v2552_v18 = vadd.f32 %v2550_v54, %v2544_v17  ;;  %v2553_v34 = vadd.f32 %v2551_v12, %v2545_v59  ;;  %v6476_v58 = vld [vmem:[#allocation51_spill] sm:$0xff] }
 0x56a   : > { %6465 = vst [vmem:[#allocation61_spill] sm:$0xff] %v5285_v13  ;;  %6467 = vst [vmem:[#allocation69_spill] sm:$0xff] %v5291_v39  ;;  %v1980_v62 = vmul.f32 %v6470_v6, %v5285_v13  ;;  %v1981_v35 = vmul.f32 %v6470_v6, %v5291_v39  ;;  %v2060_v19 = vmul.f32 %v6471_v31, %v5285_v13 }
 0x56b   : > { %v2061_v44 = vmul.f32 %v6471_v31, %v5291_v39  ;;  %v2144_v50 = vmul.f32 %v6472_v30, %v5285_v13  ;;  %v2145_v46 = vmul.f32 %v6472_v30, %v5291_v39  ;;  %v2226_v63 = vmul.f32 %v6473_v51, %v5285_v13  ;;  %6475 = vst [vmem:[#allocation62_spill] sm:$0xff] %v5324_v20 }
 0x56c   : > { %v2227_v42 = vmul.f32 %v6473_v51, %v5291_v39  ;;  %v1650_v7 = vsel %vm947_vm11, %v5226_v49, %v5216_v0  ;;  %v1651_v53 = vsel %vm947_vm11, %v5216_v0, %v5226_v49  ;;  %v1982_v5 = vadd.f32 %v1980_v62, %v1974_v1  ;;  %v6478_v1 = vld [vmem:[#allocation24_spill] sm:$0xff]  ;;  %v1670_v51 = vpop.permute.xlu1 %1669 }
 0x56d   : > { %v1983_v40 = vadd.f32 %v1981_v35, %v1975_v56  ;;  %v2062_v60 = vadd.f32 %v2060_v19, %v2054_v24  ;;  %v2063_v16 = vadd.f32 %v2061_v44, %v2055_v4  ;;  %v2310_v17 = vmul.f32 %v6476_v58, %v5285_v13  ;;  %v6479_v4 = vld [vmem:[#allocation53_spill] sm:$0xff]  ;;  %v5360_v19 = vpop.permute.xlu0 %1911 }
 0x56e   : > { %v2311_v52 = vmul.f32 %v6476_v58, %v5291_v39  ;;  %v2392_v59 = vmul.f32 %v6477_v47, %v5285_v13  ;;  %v2393_v36 = vmul.f32 %v6477_v47, %v5291_v39  ;;  %v2146_v54 = vadd.f32 %v2144_v50, %v2138_v45  ;;  %6486 = vst [vmem:[#allocation39_spill] sm:$0xff] %v5360_v19 }
 0x56f   : > { %v2147_v0 = vadd.f32 %v2145_v46, %v2139_v27  ;;  %v2228_v49 = vadd.f32 %v2226_v63, %v2220_v33  ;;  %v2229_v12 = vadd.f32 %v2227_v42, %v2221_v2  ;;  %v2476_v56 = vmul.f32 %v6478_v1, %v5285_v13  ;;  %v6487_v63 = vld [vmem:[#allocation19_spill] sm:$0xff] }
 0x570   : > { %v2477_v24 = vmul.f32 %v6478_v1, %v5291_v39  ;;  %v2558_v6 = vmul.f32 %v6479_v4, %v5285_v13  ;;  %v2559_v62 = vmul.f32 %v6479_v4, %v5291_v39  ;;  %v6480_v35 = vrot.slane %v4984_v23, %v4104_v14  ;;  %v6493_v1 = vld [vmem:[#allocation23_spill] sm:$0xff] }
 0x571   : > { %v6482_v45 = vrot.slane %v4984_v23, %v4106_v15  ;;  %v5354_v33 = vmul.f32 %v5228_v37, %v5285_v13  ;;  %v5358_v2 = vmul.f32 %v5228_v37, %v5291_v39  ;;  %v2312_v44 = vadd.f32 %v2310_v17, %v2304_v11 }
 0x572   : > { %v5345_v31 = vmul.f32 %v6480_v35, %v1650_v7  ;;  %v2313_v30 = vadd.f32 %v2311_v52, %v2305_v8  ;;  %v2394_v50 = vadd.f32 %v2392_v59, %v2386_v25  ;;  %v2395_v46 = vadd.f32 %v2393_v36, %v2387_v41  ;;  %v6488_v7 = vld [vmem:[#allocation9_spill] sm:$0xff]  ;;  %v6489_v25 = vld [vmem:[#allocation20_spill] sm:$0xff]  ;;  %v6490_v52 = vld [vmem:[#allocation58_spill] sm:$0xff] }
 0x573   : > { %v5350_v27 = vmul.f32 %v6482_v45, %v1651_v53  ;;  %6484 = vst [vmem:[#allocation65_spill] sm:$0xff] %v5354_v33  ;;  %6485 = vst [vmem:[#allocation70_spill] sm:$0xff] %v5358_v2  ;;  %v2478_v58 = vadd.f32 %v2476_v56, %v2470_v29  ;;  %v5370_v47 = vadd.f32 %v2477_v24, %v2471_v28  ;;  %v6491_v29 = vld [vmem:[#allocation21_spill] sm:$0xff]  ;;  %v5396_v45 = vpop.permute.xlu0 %2915 }
 0x574   : > { %6481 = vst [vmem:[#allocation63_spill] sm:$0xff] %v5345_v31  ;;  %v1988_v23 = vmul.f32 %v6487_v63, %v5345_v31  ;;  %v2068_v53 = vmul.f32 %v6488_v7, %v5345_v31  ;;  %v2560_v11 = vadd.f32 %v2558_v6, %v2552_v18  ;;  %v5372_v8 = vadd.f32 %v2559_v62, %v2553_v34  ;;  %v6492_v34 = vld [vmem:[#allocation82_spill] sm:$0xff] }
 0x575   : > { %6483 = vst [vmem:[#allocation64_spill] sm:$0xff] %v5350_v27  ;;  %v1989_v42 = vmul.f32 %v6487_v63, %v5350_v27  ;;  %v2069_v37 = vmul.f32 %v6488_v7, %v5350_v27  ;;  %v2152_v41 = vmul.f32 %v6489_v25, %v5345_v31  ;;  %v2153_v17 = vmul.f32 %v6489_v25, %v5350_v27  ;;  %v6496_v25 = vld [vmem:[#allocation30_spill] sm:$0xff] }
 0x576   : > { %v1671_v59 = vsel %vm969_vm13, %v6490_v52, %v1670_v51  ;;  %v1672_v36 = vsel %vm969_vm13, %v1670_v51, %v6490_v52  ;;  %v2234_v28 = vmul.f32 %v6491_v29, %v5345_v31  ;;  %v2235_v18 = vmul.f32 %v6491_v29, %v5350_v27  ;;  %6494 = vst [vmem:[#allocation7_spill] sm:$0xff] %v5396_v45  ;;  %v6495_v51 = vld [vmem:[#allocation11_spill] sm:$0xff]  ;;  %v6506_v45 = vld [vmem:[#allocation16_spill] sm:$0xff] }
 0x577   : > { %v5390_v56 = vmul.f32 %v6493_v1, %v6492_v34  ;;  %v5394_v24 = vmul.f32 %v6493_v1, %v5070_v22  ;;  %v1990_v4 = vadd.f32 %v1988_v23, %v1982_v5  ;;  %v1991_v6 = vadd.f32 %v1989_v42, %v1983_v40  ;;  %v6497_v5 = vld [vmem:[#allocation32_spill] sm:$0xff]  ;;  %v5436_v57 = vpop.permute.xlu0 %3001 }
 0x578   : > { %v2070_v62 = vadd.f32 %v2068_v53, %v2062_v60  ;;  %v2071_v35 = vadd.f32 %v2069_v37, %v2063_v16  ;;  %v2318_v63 = vmul.f32 %v6495_v51, %v5345_v31  ;;  %v2319_v7 = vmul.f32 %v6495_v51, %v5350_v27  ;;  %v6498_v60 = vld [vmem:[#allocation13_spill] sm:$0xff]  ;;  %6507 = vst [vmem:[#allocation68_spill] sm:$0xff] %v5436_v57 }
 0x579   : > { %v2400_v52 = vmul.f32 %v6496_v25, %v5345_v31  ;;  %v2401_v29 = vmul.f32 %v6496_v25, %v5350_v27  ;;  %v2154_v1 = vadd.f32 %v2152_v41, %v2146_v54  ;;  %v2155_v20 = vadd.f32 %v2153_v17, %v2147_v0  ;;  %v6501_v0 = vld [vmem:[#allocation81_spill] sm:$0xff] }
 0x57a   : > { %v2484_v40 = vmul.f32 %v6497_v5, %v5345_v31  ;;  %v2566_v16 = vmul.f32 %v6498_v60, %v5345_v31  ;;  %v2236_v23 = vadd.f32 %v2234_v28, %v2228_v49  ;;  %v2237_v42 = vadd.f32 %v2235_v18, %v2229_v12 }
 0x57b   : > { %v2485_v53 = vmul.f32 %v6497_v5, %v5350_v27  ;;  %v2567_v37 = vmul.f32 %v6498_v60, %v5350_v27  ;;  %v5416_v51 = vmul.f32 %v5270_v9, %v5345_v31  ;;  %v5420_v54 = vmul.f32 %v5270_v9, %v5350_v27  ;;  %v1843_v2 = vpop.permute.xlu0 %1842 }
 0x57c   : > { %v6502_v41 = vrot.slane %v6501_v0, %v4104_v14  ;;  %v6504_v49 = vrot.slane %v6501_v0, %v4106_v15  ;;  %v2320_v28 = vadd.f32 %v2318_v63, %v2312_v44  ;;  %v2321_v18 = vadd.f32 %v2319_v7, %v2313_v30  ;;  %v6508_v44 = vld [vmem:[#allocation26_spill] sm:$0xff]  ;;  %v6510_v63 = vld [vmem:[#allocation33_spill] sm:$0xff] }
 0x57d   : > { %6499 = vst [vmem:[#allocation66_spill] sm:$0xff] %v5416_v51  ;;  %6500 = vst [vmem:[#allocation67_spill] sm:$0xff] %v5420_v54  ;;  %v2402_v25 = vadd.f32 %v2400_v52, %v2394_v50  ;;  %v2403_v5 = vadd.f32 %v2401_v29, %v2395_v46  ;;  %v2486_v60 = vadd.f32 %v2484_v40, %v2478_v58  ;;  %v6509_v50 = vld [vmem:[#allocation28_spill] sm:$0xff]  ;;  %v6512_v40 = vld [vmem:[#allocation34_spill] sm:$0xff]  ;;  %vm3032_vm13 = vcmask 48128  }
 0x57e   : > { %v5425_v17 = vmul.f32 %v6502_v41, %v1671_v59  ;;  %v5430_v12 = vmul.f32 %v6504_v49, %v1672_v36  ;;  %v2568_v43 = vadd.f32 %v2566_v16, %v2560_v11  ;;  %v6513_v41 = vld [vmem:[#allocation35_spill] sm:$0xff]  ;;  %v2569_v32 = vadd.f32 %v2567_v37, %v5372_v8 }
 0x580   : > { %6503 = vst [vmem:[#allocation71_spill] sm:$0xff] %v5425_v17  ;;  %v1996_v9 = vmul.f32 %v6505_v26, %v5425_v17  ;;  %v2076_v3 = vmul.f32 %v6506_v45, %v5425_v17  ;;  %v1997_v59 = vmul.f32 %v6505_v26, %v5430_v12  ;;  %v2077_v36 = vmul.f32 %v6506_v45, %v5430_v12  ;;  %v6511_v45 = vld [vmem:[#allocation18_spill] sm:$0xff] }
 0x581   : > { %v2160_v30 = vmul.f32 %v6508_v44, %v5425_v17  ;;  %v2242_v46 = vmul.f32 %v6509_v50, %v5425_v17  ;;  %v2161_v58 = vmul.f32 %v6508_v44, %v5430_v12  ;;  %v2243_v11 = vmul.f32 %v6509_v50, %v5430_v12 }
 0x582   : > { %v2326_v7 = vmul.f32 %v6510_v63, %v5425_v17  ;;  %v2327_v26 = vmul.f32 %v6510_v63, %v5430_v12  ;;  %v2408_v52 = vmul.f32 %v6511_v45, %v5425_v17  ;;  %v2409_v29 = vmul.f32 %v6511_v45, %v5430_v12 }
 0x583   : > { %v2492_v16 = vmul.f32 %v6512_v40, %v5425_v17  ;;  %v2493_v0 = vmul.f32 %v6512_v40, %v5430_v12  ;;  %v2574_v49 = vmul.f32 %v6513_v41, %v5425_v17  ;;  %v2575_v44 = vmul.f32 %v6513_v41, %v5430_v12 }
 0x584   : > { %v1998_v50 = vadd.f32 %v1996_v9, %v1990_v4  ;;  %v2078_v63 = vadd.f32 %v2076_v3, %v2070_v62  ;;  %v2162_v57 = vadd.f32 %v2160_v30, %v2154_v1  ;;  %v2244_v10 = vadd.f32 %v2242_v46, %v2236_v23  ;;  %v6515_v1 = vld [vmem:[#allocation75_spill] sm:$0xff] }
 0x585   : > { %v1999_v27 = vadd.f32 %v1997_v59, %v1991_v6  ;;  %v2079_v31 = vadd.f32 %v2077_v36, %v2071_v35  ;;  %v2163_v45 = vadd.f32 %v2161_v58, %v2155_v20  ;;  %v2245_v39 = vadd.f32 %v2243_v11, %v2237_v42  ;;  %v6514_v6 = vld [vmem:[#allocation74_spill] sm:$0xff] }
 0x586   : > { %v2080_v54 = vmul.f32 %v2078_v63, %v1998_v50  ;;  %v2328_v51 = vadd.f32 %v2326_v7, %v2320_v28  ;;  %v2246_v13 = vmul.f32 %v2244_v10, %v2162_v57  ;;  %v2410_v40 = vadd.f32 %v2408_v52, %v2402_v25  ;;  %v3610_v10 = vld [vmem:[%s6398_s2 + $0x2] sm:$0x3]  ;;  %v3614_v25 = vld [vmem:[%s6398_s2 + $0xa] sm:$0x3] }
 0x587   : > { %v2081_v19 = vmul.f32 %v2079_v31, %v1999_v27  ;;  %v2494_v33 = vadd.f32 %v2492_v16, %v2486_v60  ;;  %v2487_v17 = vadd.f32 %v2485_v53, %v5370_v47  ;;  %v2247_v41 = vmul.f32 %v2245_v39, %v2163_v45  ;;  %v6518_v53 = vld [vmem:[#allocation80_spill] sm:$0xff]  ;;  %v6519_v60 = vld [vmem:[#allocation29_spill] sm:$0xff] }
 0x588   : > { %v2576_v4 = vadd.f32 %v2574_v49, %v2568_v43  ;;  %v5468_v3 = vadd.f32 %v2246_v13, %v2080_v54  ;;  %v2412_v62 = vmul.f32 %v2410_v40, %v2328_v51  ;;  %v1845_v35 = vmul.f32 %v1843_v2, %v6514_v6  ;;  %v6516_v43 = vld [vmem:[#allocation38_spill] sm:$0xff]  ;;  %v3615_v40 = vld [vmem:[%s6398_s2 + $0xc] sm:$0x3] }
 0x589   : > { %v1846_v20 = vmul.f32 %v1843_v2, %v6515_v1  ;;  %v5475_v57 = vadd.f32 %v2247_v41, %v2081_v19  ;;  %v2329_v27 = vadd.f32 %v2327_v26, %v2321_v18  ;;  %v2411_v47 = vadd.f32 %v2409_v29, %v2403_v5  ;;  %v3611_v2 = vld [vmem:[%s6398_s2 + $0x4] sm:$0x3]  ;;  %v3612_v18 = vld [vmem:[%s6398_s2 + $0x6] sm:$0x3]  ;;  %v6521_v41 = vld [vmem:[#allocation45_spill] sm:$0xff] }
 0x58a   : > { %v2578_v31 = vmul.f32 %v2576_v4, %v2494_v33  ;;  %2584 = vrot.lane.b32.xlu1 %v5468_v3, %s3898_s6  ;;  %v1852_v13 = vadd.f32 %v6516_v43, %v1845_v35  ;;  %v2495_v8 = vadd.f32 %v2493_v0, %v2487_v17  ;;  %v2577_v23 = vadd.f32 %v2575_v44, %v2569_v32  ;;  %v6517_v33 = vld [vmem:[#allocation44_spill] sm:$0xff]  ;;  %v6523_v35 = vld [vmem:[#allocation59_spill] sm:$0xff] }
 0x58b   : > { %v1853_v39 = vadd.f32 %v6516_v43, %v1846_v20  ;;  %2586 = vrot.lane.b32.xlu0 %v5475_v57, %s3898_s6  ;;  %v1866_v19 = vmul.f32 %v6517_v33, %v5093_v55  ;;  %v2413_v42 = vmul.f32 %v2411_v47, %v2329_v27  ;;  %v1697_v37 = vrot.slane %v6518_v53, %v4106_v15  ;;  %v3616_v27 = vld [vmem:[%s6398_s2 + $0xe] sm:$0x3] }
 0x58c   : > { %v1708_v51 = vrot.slane %v3610_v10, %v4104_v14  ;;  %v1867_v54 = vmul.f32 %v6517_v33, %v5098_v21  ;;  %v1860_v32 = vadd.f32 %v5390_v56, %v1852_v13  ;;  %v2579_v28 = vmul.f32 %v2577_v23, %v2495_v8  ;;  %v6526_v33 = vld [vmem:[#allocation56_spill] sm:$0xff] }
 0x58d   : > { %v1861_v17 = vadd.f32 %v5394_v24, %v1853_v39  ;;  %v5501_v5 = vadd.f32 %v2578_v31, %v2412_v62  ;;  %v1874_v9 = vmul.f32 %v6519_v60, %v5163_v48  ;;  %v1712_v59 = vrot.slane %v3610_v10, %v4106_v15  ;;  %v6522_v62 = vld [vmem:[#allocation83_spill] sm:$0xff] }
 0x58e   : > { %v1725_v56 = vrot.slane %v3611_v2, %v4104_v14  ;;  %2605 = vrot.lane.b32.xlu1 %v5468_v3, %s3899_s30  ;;  %v1875_v24 = vmul.f32 %v6519_v60, %v5168_v61  ;;  %v1868_v36 = vadd.f32 %v1866_v19, %v1860_v32  ;;  %v5511_v46 = vadd.f32 %v2579_v28, %v2413_v42  ;;  %v6531_v60 = vld [vmem:[#allocation71_spill] sm:$0xff] }
 0x58f   : > { %v1869_v30 = vadd.f32 %v1867_v54, %v1861_v17  ;;  %2774 = vrot.lane.b32.xlu0 %v5501_v5, %s3898_s6  ;;  %v1729_v58 = vrot.slane %v3611_v2, %v4106_v15  ;;  %v1742_v11 = vrot.slane %v3612_v18, %v4104_v14  ;;  %v1746_v7 = vrot.slane %v3612_v18, %v4106_v15  ;;  %v6525_v2 = vld [vmem:[#allocation55_spill] sm:$0xff]  ;;  %v6530_v18 = vld [vmem:[#allocation65_spill] sm:$0xff] }
 0x590   : > { %v1776_v26 = vrot.slane %v3614_v25, %v4104_v14  ;;  %v1876_v52 = vadd.f32 %v1874_v9, %v1868_v36  ;;  %v6520_v16 = vrot.slane %v6518_v53, %v4104_v14  ;;  %v1780_v49 = vrot.slane %v3614_v25, %v4106_v15  ;;  %v6532_v9 = vld [vmem:[#allocation39_spill] sm:$0xff] }
 0x591   : > { %v1877_v29 = vadd.f32 %v1875_v24, %v1869_v30  ;;  %v1701_v44 = vadd.f32 %v1697_v37, %v6515_v1  ;;  %v1715_v50 = vadd.f32 %v1708_v51, %v6492_v34  ;;  %v1716_v63 = vadd.f32 %v1712_v59, %v5070_v22  ;;  %v6524_v34 = vld [vmem:[#allocation60_spill] sm:$0xff]  ;;  %v6528_v37 = vld [vmem:[#allocation57_spill] sm:$0xff]  ;;  %v6534_v30 = vld [vmem:[#allocation70_spill] sm:$0xff] }
 0x592   : > { %v1700_v0 = vadd.f32 %v6520_v16, %v6514_v6  ;;  %v1732_v45 = vadd.f32 %v1725_v56, %v5093_v55  ;;  %2607 = vrot.lane.b32.xlu1 %v5475_v57, %s3899_s30  ;;  %v1890_v4 = vmul.f32 %v6521_v41, %v5177_v38  ;;  %v1891_v6 = vmul.f32 %v6521_v41, %v6522_v62  ;;  %v6533_v24 = vld [vmem:[#allocation61_spill] sm:$0xff] }
 0x593   : > { %v1884_v1 = vadd.f32 %v6523_v35, %v1876_v52  ;;  %v1885_v20 = vadd.f32 %v6524_v34, %v1877_v29  ;;  %2782 = vrot.lane.b32.xlu0 %v5501_v5, %s3899_s30  ;;  %v1718_v55 = vmax.f32 %v1701_v44, %v1716_v63  ;;  %v1733_v10 = vadd.f32 %v1729_v58, %v5098_v21  ;;  %v6535_v52 = vld [vmem:[#allocation66_spill] sm:$0xff]  ;;  %v6537_v44 = vld [vmem:[#allocation67_spill] sm:$0xff] }
 0x594   : > { %v1717_v22 = vmax.f32 %v1700_v0, %v1715_v50  ;;  %v1749_v31 = vadd.f32 %v1742_v11, %v5163_v48  ;;  %v1750_v13 = vadd.f32 %v1746_v7, %v5168_v61  ;;  %v1793_v39 = vrot.slane %v3615_v40, %v4104_v14  ;;  %v3617_v61 = vld [vmem:[%s6398_s2 + $0x10] sm:$0x3] }
 0x595   : > { %v1892_v47 = vadd.f32 %v1890_v4, %v1884_v1  ;;  %v1893_v43 = vadd.f32 %v1891_v6, %v1885_v20  ;;  %v1735_v23 = vmax.f32 %v1718_v55, %v1733_v10  ;;  %v6527_v19 = vrot.slane %v6526_v33, %v4104_v14  ;;  %v6539_v4 = vld [vmem:[#allocation64_spill] sm:$0xff] }
 0x596   : > { %v1734_v8 = vmax.f32 %v1717_v22, %v1732_v45  ;;  %2776 = vrot.lane.b32.xlu1 %v5511_v46, %s3898_s6  ;;  %v1797_v21 = vrot.slane %v3615_v40, %v4106_v15  ;;  %v1810_v48 = vrot.slane %v3616_v27, %v4104_v14  ;;  %v1814_v53 = vrot.slane %v3616_v27, %v4106_v15  ;;  %v6538_v45 = vld [vmem:[#allocation63_spill] sm:$0xff] }
 0x597   : > { %v1766_v42 = vadd.f32 %v6527_v19, %v6525_v2  ;;  %v6529_v51 = vrot.slane %v6526_v33, %v4106_v15  ;;  %2790 = vrot.lane.b32.xlu0 %v5501_v5, %s3900_s9  ;;  %v1752_v17 = vmax.f32 %v1735_v23, %v1750_v13  ;;  %v1783_v28 = vadd.f32 %v1776_v26, %v5177_v38  ;;  %v6536_v26 = vld [vmem:[#allocation69_spill] sm:$0xff]  ;;  %v3012_v13 = vld [vmem:[%s6176_s19] sm:$0x3f]  ;;  %v5648_v23 = vpop.permute.xlu0 %2932 }
 0x598   : > { %v1751_v32 = vmax.f32 %v1734_v8, %v1749_v31  ;;  %v1900_v25 = vadd.f32 %v6530_v18, %v1892_v47  ;;  %v1914_v59 = vmul.f32 %v6532_v9, %v6531_v60  ;;  %v1784_v56 = vadd.f32 %v1780_v49, %v6522_v62  ;;  %v3646_v8 = vld [vmem:[%s6178_s21 + $0x8] sm:$0xff]  ;;  %v6541_v19 = vld [vmem:[#allocation3_spill] sm:$0xff] }
 0x599   : > { %v1767_v54 = vadd.f32 %v6529_v51, %v6528_v37  ;;  %v1800_v36 = vadd.f32 %v1793_v39, %v6533_v24  ;;  %v1901_v58 = vadd.f32 %v6534_v30, %v1893_v43  ;;  %v1827_v7 = vrot.slane %v3617_v61, %v4104_v14  ;;  %v3113_v39 = vld [vmem:[%s6178_s21] sm:$0xff] }
 0x59a   : > { %v1768_v11 = vmax.f32 %v1751_v32, %v1766_v42  ;;  %v1908_v29 = vadd.f32 %v6535_v52, %v1900_v25  ;;  %v1915_v38 = vmul.f32 %v6532_v9, %v5430_v12  ;;  %2627 = vrot.lane.b32.xlu1 %v5468_v3, %s3900_s9  ;;  %v1801_v0 = vadd.f32 %v1797_v21, %v6536_v26  ;;  %v6542_v25 = vld [vmem:[#allocation36_spill] sm:$0xff]  ;;  %v6544_v52 = vld [vmem:[#allocation42_spill] sm:$0xff] }
 0x59b   : > { %v1769_v16 = vmax.f32 %v1752_v17, %v1767_v54  ;;  %v1831_v49 = vrot.slane %v3617_v61, %v4106_v15  ;;  %v1909_v50 = vadd.f32 %v6537_v44, %v1901_v58  ;;  %2808 = vrot.lane.b32.xlu0 %v5501_v5, %s6310_s29  ;;  %v1817_v40 = vadd.f32 %v1810_v48, %v6538_v45  ;;  %v5650_v2 = vpop.permute.xlu0 %2939  ;;  %v6543_v58 = vld [vmem:[#allocation40_spill] sm:$0xff] }
 0x59c   : > { %v1785_v63 = vmax.f32 %v1768_v11, %v1783_v28  ;;  %v1916_v41 = vadd.f32 %v1914_v59, %v1908_v29  ;;  %v1818_v62 = vadd.f32 %v1814_v53, %v6539_v4  ;;  %v1834_v34 = vadd.f32 %v1827_v7, %v6531_v60 }
 0x59d   : > { %v1786_v6 = vmax.f32 %v1769_v16, %v1784_v56  ;;  %v1917_v35 = vadd.f32 %v1915_v38, %v1909_v50  ;;  %v1835_v20 = vadd.f32 %v1831_v49, %v5430_v12  ;;  %v3642_v12 = vld [vmem:[%s6176_s19 + $0x8] sm:$0x3f]  ;;  %vm2588_vm0 = vcmp.lt.s32.totalorder %v6541_v19, 34 }
 0x59e   : > { %v1802_v1 = vmax.f32 %v1785_v63, %v1800_v36  ;;  %2629 = vrot.lane.b32.xlu1 %v5475_v57, %s3900_s9  ;;  %vm2609_vm1 = vcmp.lt.s32.totalorder %v6541_v19, 32  ;;  %vm2631_vm2 = vcmp.lt.s32.totalorder %v6541_v19, 30  ;;  %vm2653_vm3 = vcmp.lt.s32.totalorder %v6541_v19, 2 }
 0x59f   : > { %v1803_v22 = vmax.f32 %v1786_v6, %v1801_v0  ;;  %2730 = vrot.lane.b32.xlu0 %v5468_v3, %s6308_s4  ;;  %vm2690_vm4 = vcmp.lt.s32.totalorder %v6541_v19, 126  ;;  %vm2712_vm6 = vcmp.lt.s32.totalorder %v6541_v19, 98  ;;  %vm2734_vm9 = vcmp.lt.s32.totalorder %v6541_v19, 96 }
 0x5a0   : > { %v1819_v55 = vmax.f32 %v1802_v1, %v1817_v40  ;;  %vm2756_vm11 = vcmp.lt.s32.totalorder %v6541_v19, 94 }
 0x5a1   : > { %v1820_v10 = vmax.f32 %v1803_v22, %v1818_v62 }
 0x5a2   : > { %v1836_v31 = vmax.f32 %v1819_v55, %v1834_v34  ;;  %2784 = vrot.lane.b32.xlu1 %v5511_v46, %s3899_s30 }
 0x5a3   : > { %v1837_v27 = vmax.f32 %v1820_v10, %v1835_v20  ;;  %2816 = vrot.lane.b32.xlu0 %v5501_v5, %s6304_s10 }
 0x5a4   : > { %v5596_v47 = vmul.f32 %v1916_v41, %v1836_v31 }
 0x5a5   : > { %v5598_v43 = vmul.f32 %v1917_v35, %v1837_v27 }
 0x5a6   : > { %2649 = vrot.lane.b32.xlu1 %v5468_v3, %s3904_s28 }
 0x5a7   : > { %2754 = vrot.lane.b32.xlu0 %v5475_v57, %s6306_s5 }
 0x5aa   : > { %2651 = vrot.lane.b32.xlu1 %v5475_v57, %s3904_s28 }
 0x5ab   : > { %2826 = vrot.lane.b32.xlu0 %v5511_v46, %s6308_s4 }
 0x5ae   : > { %2792 = vrot.lane.b32.xlu1 %v5511_v46, %s3900_s9 }
 0x5af   : > { %2834 = vrot.lane.b32.xlu0 %v5511_v46, %s6306_s5 }
 0x5b2   : > { %2798 = vrot.lane.b32.xlu1 %v5501_v5, %s3904_s28 }
 0x5b3   : > { %3024 = vperm.xlu0 %3868, %v3642_v12  }
 0x5b6   : > { %2800 = vrot.lane.b32.xlu1 %v5511_v46, %s3904_s28 }
 0x5ba   : > { %2686 = vrot.lane.b32.xlu1 %v5468_v3, %s6310_s29 }
 0x5be   : > { %2688 = vrot.lane.b32.xlu1 %v5475_v57, %s6310_s29 }
 0x5c2   : > { %2708 = vrot.lane.b32.xlu1 %v5468_v3, %s6304_s10 }
 0x5c6   : > { %2710 = vrot.lane.b32.xlu1 %v5475_v57, %s6304_s10 }
 0x5ca   : > { %2810 = vrot.lane.b32.xlu1 %v5511_v46, %s6310_s29  ;;  %s6540_s29 = sld [smem:[#allocation88_spill]] }
 0x5ce   : > { %2732 = vrot.lane.b32.xlu1 %v5475_v57, %s6308_s4 }
 0x5d0   : > { %v2591_v33 = vld [vmem:[%s6540_s29] sm:$0x3]  ;;  %v3630_v51 = vld [vmem:[%s6540_s29 + $0x2] sm:$0x3]  ;;  %v3633_v35 = vld [vmem:[%s6540_s29 + $0x8] sm:$0x3] }
 0x5d1   : > { %v5657_v21 = vrot.slane %v2591_v33, %v4104_v14  ;;  %v5660_v48 = vrot.slane %v2591_v33, %v4106_v15  ;;  %v5673_v28 = vrot.slane %v3630_v51, %v4104_v14  ;;  %v5676_v18 = vrot.slane %v3630_v51, %v4106_v15  ;;  %v3631_v1 = vld [vmem:[%s6540_s29 + $0x4] sm:$0x3]  ;;  %v3632_v20 = vld [vmem:[%s6540_s29 + $0x6] sm:$0x3] }
 0x5d2   : > { %2818 = vrot.lane.b32.xlu1 %v5511_v46, %s6304_s10  ;;  %v5711_v55 = vrot.slane %v3633_v35, %v4104_v14  ;;  %v5714_v10 = vrot.slane %v3631_v1, %v4104_v14  ;;  %v5720_v27 = vrot.slane %v3632_v20, %v4104_v14  ;;  %v5723_v12 = vrot.slane %v3633_v35, %v4106_v15 }
 0x5d3   : > { %v5730_v33 = vrot.slane %v3631_v1, %v4106_v15 }
 0x5d6   : > { %2752 = vrot.lane.b32.xlu1 %v5468_v3, %s6306_s5 }
 0x5da   : > { %2824 = vrot.lane.b32.xlu1 %v5501_v5, %s6308_s4  ;;  %s6561_s4 = smov 126  }
 0x5de   : > { %2832 = vrot.lane.b32.xlu1 %v5501_v5, %s6306_s5  ;;  %s3656_s5 = sshll.u32 %s6569_s3, 4 }
 0x5e2   : > { %3015 = vperm.xlu1 %3869, %v3012_v13  }
 0x5e6   : > { %3116 = vperm.xlu1 %3869, %v3113_v39   ;;  %v2684_v39 = vmul.f32 %v5711_v55, %v5468_v3 }
 0x5ea   : > { %3125 = vperm.xlu1 %3869, %v3646_v8  }
 0x5fc   : > { %v2585_v42 = vpop.permute.xlu1 %2584 }
 0x5fd   : > { %v2587_v53 = vpop.permute.xlu0 %2586 }
 0x5fe   : > { %v2589_v61 = vsel %vm2588_vm0, %v2585_v42, %v2587_v53  ;;  %v2590_v37 = vsel %vm2588_vm0, %v2587_v53, %v2585_v42 }
 0x5ff   : > { %v2603_v54 = vmul.f32 %v5657_v21, %v2590_v37  ;;  %v2604_v32 = vmul.f32 %v5660_v48, %v2589_v61 }
 0x600   : > { %v2606_v17 = vpop.permute.xlu1 %2605 }
 0x601   : > { %v2849_v60 = vmul.f32 %v6542_v25, %v2603_v54  ;;  %v2850_v9 = vmul.f32 %v6542_v25, %v2604_v32  ;;  %v2775_v40 = vpop.permute.xlu0 %2774  ;;  %v5742_v54 = vrot.slane %v3632_v20, %v4106_v15  ;;  %v2685_v25 = vmul.f32 %v5723_v12, %v5475_v57 }
 0x603   : > { %v2856_v11 = vadd.f32 %v6543_v58, %v2849_v60  ;;  %v2857_v7 = vadd.f32 %v6543_v58, %v2850_v9  ;;  %v6545_v9 = vld [vmem:[#allocation37_spill] sm:$0xff] }
 0x604   : > { %v2608_v59 = vpop.permute.xlu1 %2607 }
 0x605   : > { %v2610_v56 = vsel %vm2609_vm1, %v2606_v17, %v2608_v59  ;;  %v2611_v24 = vsel %vm2609_vm1, %v2608_v59, %v2606_v17  ;;  %v2783_v62 = vpop.permute.xlu0 %2782  ;;  %v3634_v17 = vld [vmem:[%s6540_s29 + $0xa] sm:$0x3]  ;;  %v2886_v59 = vmul.f32 %v6545_v9, %v2684_v39 }
 0x606   : > { %v2625_v36 = vmul.f32 %v5673_v28, %v2611_v24  ;;  %v2626_v30 = vmul.f32 %v5676_v18, %v2610_v56  ;;  %v5779_v35 = vrot.slane %v3634_v17, %v4106_v15 }
 0x608   : > { %v2862_v29 = vmul.f32 %v6544_v52, %v2625_v36  ;;  %v2863_v16 = vmul.f32 %v6544_v52, %v2626_v30  ;;  %v2777_v38 = vpop.permute.xlu1 %2776  ;;  %v6546_v30 = vld [vmem:[#allocation46_spill] sm:$0xff] }
 0x609   : > { %v2791_v34 = vpop.permute.xlu0 %2790  ;;  %v2779_v53 = vsel %vm2588_vm0, %v2777_v38, %v2775_v40  ;;  %v2778_v51 = vsel %vm2588_vm0, %v2775_v40, %v2777_v38 }
 0x60a   : > { %v2864_v26 = vadd.f32 %v2862_v29, %v2856_v11  ;;  %v5690_v0 = vadd.f32 %v2863_v16, %v2857_v7  ;;  %v2780_v24 = vmul.f32 %v2779_v53, %v5657_v21  ;;  %v3635_v11 = vld [vmem:[%s6540_s29 + $0xc] sm:$0x3]  ;;  %v5762_v7 = vmul.f32 %v5711_v55, %v5501_v5 }
 0x60b   : > { %v2781_v52 = vmul.f32 %v2778_v51, %v5660_v48  ;;  %v5766_v29 = vrot.slane %v3634_v17, %v4104_v14  ;;  %v5771_v16 = vmul.f32 %v5723_v12, %v5511_v46  ;;  %v5782_v1 = vrot.slane %v3635_v11, %v4104_v14 }
 0x60c   : > { %v2628_v49 = vpop.permute.xlu1 %2627  ;;  %v5785_v20 = vrot.slane %v3635_v11, %v4106_v15 }
 0x60d   : > { %v5735_v61 = vpop.permute.xlu0 %2808  ;;  %v2936_v51 = vmul.f32 %v5648_v23, %v2781_v52 }
 0x610   : > { %v2630_v44 = vpop.permute.xlu1 %2629 }
 0x611   : > { %v2633_v31 = vsel %vm2631_vm2, %v2630_v44, %v2628_v49  ;;  %v2632_v37 = vsel %vm2631_vm2, %v2628_v49, %v2630_v44  ;;  %v6547_v49 = vld [vmem:[#allocation31_spill] sm:$0xff]  ;;  %v2731_v40 = vpop.permute.xlu0 %2730 }
 0x612   : > { %v2647_v42 = vmul.f32 %v5714_v10, %v2633_v31  ;;  %v2648_v36 = vmul.f32 %v5730_v33, %v2632_v37  ;;  %v3636_v37 = vld [vmem:[%s6540_s29 + $0xe] sm:$0x3] }
 0x614   : > { %v5692_v50 = vpop.permute.xlu1 %2784  ;;  %v2870_v58 = vmul.f32 %v6546_v30, %v2647_v42  ;;  %v2871_v39 = vmul.f32 %v6546_v30, %v2648_v36 }
 0x615   : > { %v2787_v17 = vsel %vm2609_vm1, %v5692_v50, %v2783_v62 }
 0x616   : > { %v2872_v42 = vadd.f32 %v2870_v58, %v2864_v26  ;;  %v2873_v58 = vadd.f32 %v2871_v39, %v5690_v0  ;;  %v2788_v11 = vmul.f32 %v2787_v17, %v5673_v28  ;;  %v2943_v0 = vadd.f32 %v5650_v2, %v2936_v51 }
 0x618   : > { %v2650_v63 = vpop.permute.xlu1 %2649 }
 0x61c   : > { %v2652_v45 = vpop.permute.xlu1 %2651 }
 0x61d   : > { %v2655_v13 = vsel %vm2653_vm3, %v2652_v45, %v2650_v63  ;;  %v2654_v60 = vsel %vm2653_vm3, %v2650_v63, %v2652_v45  ;;  %v2887_v45 = vmul.f32 %v6545_v9, %v2685_v25 }
 0x61e   : > { %v2669_v32 = vmul.f32 %v5720_v27, %v2655_v13  ;;  %v2670_v38 = vmul.f32 %v5742_v54, %v2654_v60  ;;  %v2935_v13 = vmul.f32 %v5648_v23, %v2780_v24 }
 0x620   : > { %v5694_v41 = vpop.permute.xlu1 %2792  ;;  %v2878_v44 = vmul.f32 %v6547_v49, %v2669_v32  ;;  %v2786_v32 = vsel %vm2609_vm1, %v2783_v62, %v5692_v50  ;;  %v2879_v26 = vmul.f32 %v6547_v49, %v2670_v38  ;;  %v5814_v50 = vrot.slane %v3636_v37, %v4104_v14  ;;  %v6548_v49 = vld [vmem:[#allocation47_spill] sm:$0xff] }
 0x621   : > { %v2795_v9 = vsel %vm2631_vm2, %v5694_v41, %v2791_v34  ;;  %v2794_v24 = vsel %vm2631_vm2, %v2791_v34, %v5694_v41  ;;  %v5817_v62 = vrot.slane %v3636_v37, %v4106_v15  ;;  %v2789_v52 = vmul.f32 %v2786_v32, %v5676_v18  ;;  %v2817_v34 = vpop.permute.xlu0 %2816 }
 0x622   : > { %v2880_v60 = vadd.f32 %v2878_v44, %v2872_v42  ;;  %v2942_v41 = vadd.f32 %v5650_v2, %v2935_v13  ;;  %v2797_v39 = vmul.f32 %v2794_v24, %v5730_v33  ;;  %v6550_v2 = vld [vmem:[#allocation48_spill] sm:$0xff] }
 0x623   : > { %v2948_v51 = vmul.f32 %v6550_v2, %v2788_v11  ;;  %v2949_v17 = vmul.f32 %v6550_v2, %v2789_v52 }
 0x624   : > { %v5696_v4 = vpop.permute.xlu1 %2798  ;;  %v2888_v42 = vadd.f32 %v2886_v59, %v2880_v60 }
 0x628   : > { %v5698_v6 = vpop.permute.xlu1 %2800 }
 0x62c   : > { %v2687_v22 = vpop.permute.xlu1 %2686 }
 0x630   : > { %v2689_v8 = vpop.permute.xlu1 %2688 }
 0x631   : > { %v2691_v63 = vsel %vm2690_vm4, %v2687_v22, %v2689_v8  ;;  %v2692_v23 = vsel %vm2690_vm4, %v2689_v8, %v2687_v22  ;;  %v2796_v8 = vmul.f32 %v2795_v9, %v5714_v10 }
 0x632   : > { %v2706_v25 = vmul.f32 %v5766_v29, %v2691_v63  ;;  %v2707_v38 = vmul.f32 %v5779_v35, %v2692_v23  ;;  %v2881_v63 = vadd.f32 %v2879_v26, %v2873_v58  ;;  %v6551_v26 = vld [vmem:[#allocation50_spill] sm:$0xff]  ;;  %v3637_v23 = vld [vmem:[%s6540_s29 + $0x10] sm:$0x3] }
 0x633   : > { %v2956_v60 = vmul.f32 %v6551_v26, %v2796_v8  ;;  %v2957_v24 = vmul.f32 %v6551_v26, %v2797_v39 }
 0x634   : > { %v2709_v56 = vpop.permute.xlu1 %2708  ;;  %v2894_v44 = vmul.f32 %v6548_v49, %v2706_v25  ;;  %v2895_v9 = vmul.f32 %v6548_v49, %v2707_v38  ;;  %v2889_v52 = vadd.f32 %v2887_v45, %v2881_v63  ;;  %v6552_v38 = vld [vmem:[#allocation6_spill] sm:$0xff] }
 0x636   : > { %v2897_v45 = vadd.f32 %v2895_v9, %v2889_v52  ;;  %v6554_v9 = vld [vmem:[#allocation54_spill] sm:$0xff] }
 0x638   : > { %v2711_v31 = vpop.permute.xlu1 %2710 }
 0x639   : > { %v2713_v53 = vsel %vm2712_vm6, %v2709_v56, %v2711_v31  ;;  %v2714_v22 = vsel %vm2712_vm6, %v2711_v31, %v2709_v56  ;;  %v2802_v56 = vsel %vm2653_vm3, %v5696_v4, %v5698_v6  ;;  %v2803_v31 = vsel %vm2653_vm3, %v5698_v6, %v5696_v4 }
 0x63a   : > { %v2728_v36 = vmul.f32 %v5782_v1, %v2713_v53  ;;  %v2729_v13 = vmul.f32 %v5785_v20, %v2714_v22  ;;  %v6549_v53 = vld [vmem:[#allocation5_spill] sm:$0xff]  ;;  %v2896_v4 = vadd.f32 %v2894_v44, %v2888_v42  ;;  %v2805_v58 = vmul.f32 %v2802_v56, %v5742_v54 }
 0x63b   : > { %v2950_v42 = vadd.f32 %v2948_v51, %v2942_v41  ;;  %v5866_v56 = vrot.slane %v3637_v23, %v4104_v14 }
 0x63c   : > { %v2811_v30 = vpop.permute.xlu1 %2810  ;;  %v2902_v37 = vmul.f32 %v6549_v53, %v2728_v36  ;;  %v2804_v36 = vmul.f32 %v2803_v31, %v5720_v27  ;;  %v2903_v22 = vmul.f32 %v6549_v53, %v2729_v13  ;;  %v2951_v31 = vadd.f32 %v2949_v17, %v2943_v0 }
 0x63d   : > { %v2813_v39 = vsel %vm2690_vm4, %v2811_v30, %v5735_v61  ;;  %v5869_v13 = vrot.slane %v3637_v23, %v4106_v15  ;;  %v2958_v53 = vadd.f32 %v2956_v60, %v2950_v42 }
 0x63e   : > { %v2904_v8 = vadd.f32 %v2902_v37, %v2896_v4  ;;  %v6553_v37 = vld [vmem:[#allocation52_spill] sm:$0xff]  ;;  %v2815_v14 = vmul.f32 %v2813_v39, %v5779_v35  ;;  %v2972_v4 = vmul.f32 %v6554_v9, %v5762_v7 }
 0x63f   : > { %v2964_v41 = vmul.f32 %v6553_v37, %v2804_v36  ;;  %v2965_v2 = vmul.f32 %v6553_v37, %v2805_v58  ;;  %v2973_v58 = vmul.f32 %v6554_v9, %v5771_v16  ;;  %v6556_v7 = vld [vmem:[#allocation4_spill] sm:$0xff] }
 0x640   : > { %v2733_v32 = vpop.permute.xlu1 %2732 }
 0x641   : > { %v2735_v59 = vsel %vm2734_vm9, %v2731_v40, %v2733_v32  ;;  %v2736_v25 = vsel %vm2734_vm9, %v2733_v32, %v2731_v40  ;;  %v2755_v40 = vpop.permute.xlu0 %2754  ;;  %v2812_v32 = vsel %vm2690_vm4, %v5735_v61, %v2811_v30 }
 0x642   : > { %v2750_v6 = vmul.f32 %v5814_v50, %v2735_v59  ;;  %v2751_v11 = vmul.f32 %v5817_v62, %v2736_v25  ;;  %v2959_v59 = vadd.f32 %v2957_v24, %v2951_v31  ;;  %v2905_v25 = vadd.f32 %v2903_v22, %v2897_v45  ;;  %v6555_v22 = vld [vmem:[#allocation7_spill] sm:$0xff] }
 0x643   : > { %v2814_v61 = vmul.f32 %v2812_v32, %v5766_v29  ;;  %v2966_v24 = vadd.f32 %v2964_v41, %v2958_v53 }
 0x644   : > { %v2910_v49 = vmul.f32 %v6552_v38, %v2750_v6  ;;  %v2819_v44 = vpop.permute.xlu1 %2818  ;;  %v2911_v51 = vmul.f32 %v6552_v38, %v2751_v11  ;;  %v2967_v36 = vadd.f32 %v2965_v2, %v2959_v59  ;;  %v6557_v2 = vld [vmem:[#allocation27_spill] sm:$0xff] }
 0x645   : > { %v2820_v0 = vsel %vm2712_vm6, %v2817_v34, %v2819_v44  ;;  %v2821_v15 = vsel %vm2712_vm6, %v2819_v44, %v2817_v34  ;;  %v2827_v60 = vpop.permute.xlu0 %2826  ;;  %v2981_v44 = vmul.f32 %v6556_v7, %v2815_v14  ;;  %v2974_v53 = vadd.f32 %v2972_v4, %v2966_v24  ;;  %v6559_v24 = vld [vmem:[#allocation68_spill] sm:$0xff] }
 0x646   : > { %v2912_v63 = vadd.f32 %v2910_v49, %v2904_v8  ;;  %v2913_v34 = vadd.f32 %v2911_v51, %v2905_v25  ;;  %v2822_v11 = vmul.f32 %v2820_v0, %v5782_v1  ;;  %v2823_v52 = vmul.f32 %v2821_v15, %v5785_v20 }
 0x647   : > { %v2980_v49 = vmul.f32 %v6556_v7, %v2814_v61  ;;  %v2975_v37 = vadd.f32 %v2973_v58, %v2967_v36 }
 0x648   : > { %v2753_v30 = vpop.permute.xlu1 %2752  ;;  %v2988_v51 = vmul.f32 %v6557_v2, %v2822_v11  ;;  %v2989_v59 = vmul.f32 %v6557_v2, %v2823_v52 }
 0x649   : > { %v2757_v17 = vsel %vm2756_vm11, %v2753_v30, %v2755_v40  ;;  %v2758_v26 = vsel %vm2756_vm11, %v2755_v40, %v2753_v30  ;;  %v2835_v41 = vpop.permute.xlu0 %2834  ;;  %v2982_v30 = vadd.f32 %v2980_v49, %v2974_v53  ;;  %v2983_v0 = vadd.f32 %v2981_v44, %v2975_v37 }
 0x64a   : > { %v2772_v6 = vmul.f32 %v5866_v56, %v2757_v17  ;;  %v2773_v23 = vmul.f32 %v5869_v13, %v2758_v26  ;;  %v6558_v17 = vld [vmem:[#allocation62_spill] sm:$0xff] }
 0x64c   : > { %v2918_v40 = vmul.f32 %v6555_v22, %v2772_v6  ;;  %v2919_v8 = vmul.f32 %v6555_v22, %v2773_v23  ;;  %v2825_v38 = vpop.permute.xlu1 %2824  ;;  %v2990_v6 = vadd.f32 %v2988_v51, %v2982_v30  ;;  %v2991_v23 = vadd.f32 %v2989_v59, %v2983_v0  ;;  %v3648_v30 = vld [vmem:[%s6180_s23 + $0x10] sm:$0xff]  ;;  %v3282_v0 = vld [vmem:[%s6180_s23 + $0x8] sm:$0x3] }
 0x64d   : > { %v2828_v42 = vsel %vm2734_vm9, %v2825_v38, %v2827_v60  ;;  %v2829_v16 = vsel %vm2734_vm9, %v2827_v60, %v2825_v38  ;;  %v3025_v44 = vpop.permute.xlu0 %3024 }
 0x64e   : > { %v2920_v32 = vadd.f32 %v2918_v40, %v2912_v63  ;;  %v2921_v39 = vadd.f32 %v2919_v8, %v2913_v34  ;;  %v2830_v31 = vmul.f32 %v2828_v42, %v5814_v50  ;;  %v2831_v45 = vmul.f32 %v2829_v16, %v5817_v62 }
 0x650   : > { %v2833_v25 = vpop.permute.xlu1 %2832  ;;  %v2922_v61 = vmul.f32 %v2920_v32, %v5468_v3  ;;  %v2923_v14 = vmul.f32 %v2921_v39, %v5475_v57  ;;  %v2996_v26 = vmul.f32 %v6558_v17, %v2830_v31  ;;  %v2997_v60 = vmul.f32 %v6558_v17, %v2831_v45 }
 0x651   : > { %v2836_v63 = vsel %vm2756_vm11, %v2833_v25, %v2835_v41  ;;  %v2837_v15 = vsel %vm2756_vm11, %v2835_v41, %v2833_v25 }
 0x652   : > { %v2838_v9 = vmul.f32 %v2836_v63, %v5866_v56  ;;  %v2839_v4 = vmul.f32 %v2837_v15, %v5869_v13  ;;  %v2924_v3 = vadd.f32 %v2922_v61, %v5596_v47  ;;  %v2925_v57 = vadd.f32 %v2923_v14, %v5598_v43  ;;  %v3281_v14 = vld [vmem:[%s6180_s23] sm:$0xff]  ;;  %v3649_v63 = vld [vmem:[%s6180_s23 + $0x18] sm:$0x3] }
 0x653   : > { %v2998_v34 = vadd.f32 %v2996_v26, %v2990_v6  ;;  %v2999_v11 = vadd.f32 %v2997_v60, %v2991_v23 }
 0x654   : > { %v3004_v36 = vmul.f32 %v6559_v24, %v2838_v9  ;;  %v3005_v58 = vmul.f32 %v6559_v24, %v2839_v4 }
 0x656   : > { %v3006_v52 = vadd.f32 %v3004_v36, %v2998_v34  ;;  %v3007_v22 = vadd.f32 %v3005_v58, %v2999_v11 }
 0x658   : > { %v3008_v40 = vmul.f32 %v3006_v52, %v5501_v5  ;;  %v3009_v8 = vmul.f32 %v3007_v22, %v5511_v46  ;;  %v3031_v5 = vld [vmem:[%s6177_s20] sm:$0xff]  ;;  %v6560_v46 = vmov 0.0  }
 0x65a   : > { %v5920_v38 = vadd.f32 %v3008_v40, %v2924_v3  ;;  %v5922_v7 = vadd.f32 %v3009_v8, %v2925_v57 }
 0x661   : > { %v3016_v47 = vpop.permute.xlu1 %3015 }
 0x662   : > { %v3018_v43 = vmul.f32 %v3016_v47, %v5920_v38  ;;  %v3019_v49 = vmul.f32 %v3016_v47, %v5922_v7 }
 0x664   : > { %v3027_v42 = vadd.f32 %v3025_v44, %v3018_v43  ;;  %v3028_v16 = vadd.f32 %v3025_v44, %v3019_v49 }
 0x665   : > { %v3117_v31 = vpop.permute.xlu1 %3116 }
 0x666   : > { %v3029_v32 = vmax.f32 %v3027_v42, 0.0  ;;  %v3030_v39 = vmax.f32 %v3028_v16, 0.0 }
 0x668   : > { %3643 = vmatprep.subr.msk.mxu0 %vm1029_vm10, %v3030_v39 }
 0x669   : > { %3644 = vmatpush1.msk.msra.mxu0 %vm1029_vm10, %v3029_v32  ;;  %v3126_v41 = vpop.permute.xlu1 %3125 }
 0x66a   : > { %3645 = vmatmul.mubr.msk.f32.vlgmr.msra.gmra.mrb[6].mxu0 %vm3032_vm13, %v3031_v5 }
 0x66b   : > { %3266 = vmatprep.mubr.f32.mxu0 %v6560_v46 }
 0x73d   : > { %v3108_v45 = vpop.f32.mrb[6].mxu0 }
 0x73e   : > { %v3119_v53 = vmul.f32 %v3117_v31, %v3108_v45  ;;  %v3110_v37 = vpop.f32.mrb[7].mxu0 }
 0x73f   : > { %v3120_v2 = vmul.f32 %v3117_v31, %v3110_v37 }
 0x740   : > { %v3128_v51 = vadd.f32 %v3126_v41, %v3119_v53 }
 0x741   : > { %v3129_v59 = vadd.f32 %v3126_v41, %v3120_v2 }
 0x742   : > { %v5932_v25 = vmax.f32 %v3128_v51, 0.0 }
 0x743   : > { %v5934_v61 = vmax.f32 %v3129_v59, 0.0 }
 0x744   : > { %3132 = vrot.lane.b32.xlu0 %v5932_v25, %s3898_s6 }
 0x745   : > { %3134 = vrot.lane.b32.xlu1 %v5934_v61, %s3898_s6  ;;  %s6562_s6 = smov 98  }
 0x748   : > { %3140 = vrot.lane.b32.xlu0 %v5932_v25, %s3899_s30 }
 0x749   : > { %3142 = vrot.lane.b32.xlu1 %v5934_v61, %s3899_s30  ;;  %s6563_s30 = smov 96  }
 0x74c   : > { %3148 = vrot.lane.b32.xlu0 %v5932_v25, %s3900_s9 }
 0x74d   : > { %3150 = vrot.lane.b32.xlu1 %v5934_v61, %s3900_s9  ;;  %s6564_s9 = smov 94  }
 0x750   : > { %3156 = vrot.lane.b32.xlu0 %v5932_v25, %s3904_s28 }
 0x751   : > { %3158 = vrot.lane.b32.xlu1 %v5934_v61, %s3904_s28 }
 0x754   : > { %3166 = vrot.lane.b32.xlu0 %v5932_v25, %s6561_s4 }
 0x755   : > { %3168 = vrot.lane.b32.xlu1 %v5934_v61, %s6561_s4  ;;  %s6566_s4 = sld [smem:[#allocation95_spill]] }
 0x758   : > { %3174 = vrot.lane.b32.xlu0 %v5932_v25, %s6562_s6 }
 0x759   : > { %3176 = vrot.lane.b32.xlu1 %v5934_v61, %s6562_s6 }
 0x75b   : > { %s791_s6 = scalar_lea.vmem %s6566_s4, %s3656_s5 }
 0x75c   : > { %3182 = vrot.lane.b32.xlu0 %v5932_v25, %s6563_s30 }
 0x75d   : > { %3184 = vrot.lane.b32.xlu1 %v5934_v61, %s6563_s30  ;;  %s6565_s30 = sld [smem:[#allocation89_spill]] }
 0x760   : > { %3190 = vrot.lane.b32.xlu0 %v5932_v25, %s6564_s9 }
 0x761   : > { %3192 = vrot.lane.b32.xlu1 %v5934_v61, %s6564_s9 }
 0x763   : > { %v3334_v15 = vld [vmem:[%s6565_s30 + $0x80] sm:$0xff]  ;;  %v3335_v17 = vld [vmem:[%s6565_s30 + $0x88] sm:$0xff]  ;;  %v3336_v4 = vld [vmem:[%s6565_s30 + $0x90] sm:$0xff] }
 0x764   : > { %3285 = vperm.xlu0 %3868, %v3281_v14   ;;  %v3318_v26 = vld [vmem:[%s6565_s30] sm:$0xff]  ;;  %v3754_v60 = vpack.c.bf16 %v3335_v17, %v3334_v15  ;;  %v3319_v9 = vld [vmem:[%s6565_s30 + $0x8] sm:$0xff]  ;;  %v3337_v3 = vld [vmem:[%s6565_s30 + $0x98] sm:$0xff] }
 0x765   : > { %3302 = vperm.xlu1 %3869, %v3648_v30   ;;  %v3756_v57 = vpack.c.bf16 %v3319_v9, %v3318_v26  ;;  %v3758_v6 = vpack.c.bf16 %v3337_v3, %v3336_v4  ;;  %v3320_v23 = vld [vmem:[%s6565_s30 + $0x10] sm:$0xff]  ;;  %v3321_v24 = vld [vmem:[%s6565_s30 + $0x18] sm:$0xff]  ;;  %v3338_v36 = vld [vmem:[%s6565_s30 + $0xa0] sm:$0xff] }
 0x766   : > { %3755 = vmatprep.subr.bf16.mxu1 %v3754_v60  ;;  %v3339_v58 = vld [vmem:[%s6565_s30 + $0xa8] sm:$0xff]  ;;  %v3760_v34 = vpack.c.bf16 %v3321_v24, %v3320_v23  ;;  %v3322_v52 = vld [vmem:[%s6565_s30 + $0x20] sm:$0xff]  ;;  %v3340_v40 = vld [vmem:[%s6565_s30 + $0xb0] sm:$0xff] }
 0x767   : > { %3757 = vmatpush3.bf16.msra.mxu1 %v3756_v57  ;;  %v3762_v11 = vpack.c.bf16 %v3339_v58, %v3338_v36  ;;  %v3323_v22 = vld [vmem:[%s6565_s30 + $0x28] sm:$0xff]  ;;  %v3341_v8 = vld [vmem:[%s6565_s30 + $0xb8] sm:$0xff]  ;;  %v3324_v49 = vld [vmem:[%s6565_s30 + $0x30] sm:$0xff] }
 0x768   : > { %3290 = vperm.xlu0 %3868, %v3282_v0   ;;  %3759 = vmatprep.subr.bf16.mxu1 %v3758_v6  ;;  %v3764_v47 = vpack.c.bf16 %v3323_v22, %v3322_v52  ;;  %v3766_v43 = vpack.c.bf16 %v3341_v8, %v3340_v40  ;;  %v3325_v44 = vld [vmem:[%s6565_s30 + $0x38] sm:$0xff]  ;;  %v3342_v42 = vld [vmem:[%s6565_s30 + $0xc0] sm:$0xff]  ;;  %v3343_v16 = vld [vmem:[%s6565_s30 + $0xc8] sm:$0xff]  ;;  %v3164_v40 = vmul.f32 %v5932_v25, %v5711_v55 }
 0x769   : > { %3307 = vperm.xlu1 %3869, %v3649_v63   ;;  %v3768_v32 = vpack.c.bf16 %v3325_v44, %v3324_v49  ;;  %v3770_v39 = vpack.c.bf16 %v3343_v16, %v3342_v42  ;;  %v3326_v5 = vld [vmem:[%s6565_s30 + $0x40] sm:$0xff]  ;;  %v3327_v46 = vld [vmem:[%s6565_s30 + $0x48] sm:$0xff]  ;;  %v3345_v19 = vld [vmem:[%s6565_s30 + $0xd8] sm:$0xff] }
 0x76a   : > { %v3772_v31 = vpack.c.bf16 %v3327_v46, %v3326_v5 }
 0x76b   : > { %3761 = vmatpush3.bf16.msra.mxu1 %v3760_v34 }
 0x76c   : > { %3763 = vmatprep.subr.bf16.mxu1 %v3762_v11 }
 0x76f   : > { %3765 = vmatpush3.bf16.msra.mxu1 %v3764_v47 }
 0x770   : > { %3767 = vmatprep.subr.bf16.mxu1 %v3766_v43 }
 0x773   : > { %3769 = vmatpush3.bf16.msra.mxu1 %v3768_v32 }
 0x774   : > { %3771 = vmatprep.subr.bf16.mxu1 %v3770_v39 }
 0x777   : > { %3773 = vmatpush3.bf16.msra.mxu1 %v3772_v31 }
 0x7b6   : > { %v3133_v45 = vpop.permute.xlu0 %3132 }
 0x7b7   : > { %v3135_v53 = vpop.permute.xlu1 %3134 }
 0x7b8   : > { %v3136_v37 = vsel %vm2588_vm0, %v3133_v45, %v3135_v53  ;;  %v3137_v41 = vsel %vm2588_vm0, %v3135_v53, %v3133_v45 }
 0x7b9   : > { %v3138_v30 = vmul.f32 %v3137_v41, %v5657_v21  ;;  %v3139_v0 = vmul.f32 %v3136_v37, %v5660_v48  ;;  %v3346_v37 = vld [vmem:[%s6565_s30 + $0xe0] sm:$0xff] }
 0x7ba   : > { %v3141_v2 = vpop.permute.xlu0 %3140 }
 0x7bb   : > { %v3143_v51 = vpop.permute.xlu1 %3142 }
 0x7bc   : > { %v3144_v59 = vsel %vm2609_vm1, %v3141_v2, %v3143_v51  ;;  %v3145_v14 = vsel %vm2609_vm1, %v3143_v51, %v3141_v2  ;;  %v3347_v2 = vld [vmem:[%s6565_s30 + $0xe8] sm:$0xff]  ;;  %v3330_v51 = vld [vmem:[%s6565_s30 + $0x60] sm:$0xff] }
 0x7bd   : > { %v3146_v63 = vmul.f32 %v3145_v14, %v5673_v28  ;;  %v3147_v15 = vmul.f32 %v3144_v59, %v5676_v18  ;;  %v3331_v59 = vld [vmem:[%s6565_s30 + $0x68] sm:$0xff]  ;;  %v3778_v14 = vpack.c.bf16 %v3347_v2, %v3346_v37 }
 0x7be   : > { %v3149_v17 = vpop.permute.xlu0 %3148 }
 0x7bf   : > { %v3740_v26 = vpack.c.bf16 %v3146_v63, %v3138_v30  ;;  %v3151_v60 = vpop.permute.xlu1 %3150  ;;  %v3738_v9 = vpack.c.bf16 %v3147_v15, %v3139_v0  ;;  %v3348_v30 = vld [vmem:[%s6565_s30 + $0xf0] sm:$0xff]  ;;  %v3349_v0 = vld [vmem:[%s6565_s30 + $0xf8] sm:$0xff]  ;;  %v3780_v63 = vpack.c.bf16 %v3331_v59, %v3330_v51 }
 0x7c0   : > { %v3152_v4 = vsel %vm2631_vm2, %v3149_v17, %v3151_v60  ;;  %v3153_v3 = vsel %vm2631_vm2, %v3151_v60, %v3149_v17  ;;  %v3782_v15 = vpack.c.bf16 %v3349_v0, %v3348_v30  ;;  %v3332_v17 = vld [vmem:[%s6565_s30 + $0x70] sm:$0xff] }
 0x7c1   : > { %3739 = vmatprep.subr.bf16.mxu0 %v3738_v9  ;;  %v3154_v18 = vmul.f32 %v3153_v3, %v5714_v10  ;;  %v3155_v6 = vmul.f32 %v3152_v4, %v5730_v33 }
 0x7c2   : > { %v3157_v57 = vpop.permute.xlu0 %3156  ;;  %3741 = vmatpush1.bf16.msra.mxu0 %v3740_v26  ;;  %v3333_v26 = vld [vmem:[%s6565_s30 + $0x78] sm:$0xff] }
 0x7c3   : > { %v3159_v21 = vpop.permute.xlu1 %3158  ;;  %v3784_v60 = vpack.c.bf16 %v3333_v26, %v3332_v17 }
 0x7c4   : > { %v3160_v48 = vsel %vm2653_vm3, %v3157_v57, %v3159_v21  ;;  %v3161_v28 = vsel %vm2653_vm3, %v3159_v21, %v3157_v57 }
 0x7c5   : > { %v3162_v23 = vmul.f32 %v3161_v28, %v5720_v27  ;;  %v3163_v24 = vmul.f32 %v3160_v48, %v5742_v54  ;;  %v3165_v27 = vmul.f32 %v5934_v61, %v5723_v12 }
 0x7c6   : > { %v3167_v36 = vpop.permute.xlu0 %3166 }
 0x7c7   : > { %v3744_v58 = vpack.c.bf16 %v3162_v23, %v3154_v18  ;;  %v3169_v34 = vpop.permute.xlu1 %3168  ;;  %v3742_v11 = vpack.c.bf16 %v3163_v24, %v3155_v6 }
 0x7c8   : > { %v3170_v52 = vsel %vm2690_vm4, %v3167_v36, %v3169_v34  ;;  %v3171_v22 = vsel %vm2690_vm4, %v3169_v34, %v3167_v36 }
 0x7c9   : > { %v3172_v10 = vmul.f32 %v3170_v52, %v5766_v29  ;;  %v3173_v33 = vmul.f32 %v3171_v22, %v5779_v35  ;;  %3743 = vmatprep.subr.bf16.mxu0 %v3742_v11 }
 0x7ca   : > { %v3175_v54 = vpop.permute.xlu0 %3174  ;;  %3745 = vmatpush1.bf16.msra.mxu0 %v3744_v58 }
 0x7cb   : > { %v3748_v8 = vpack.c.bf16 %v3172_v10, %v3164_v40  ;;  %v3177_v47 = vpop.permute.xlu1 %3176  ;;  %v3746_v43 = vpack.c.bf16 %v3173_v33, %v3165_v27 }
 0x7cc   : > { %v3178_v49 = vsel %vm2712_vm6, %v3175_v54, %v3177_v47  ;;  %v3179_v55 = vsel %vm2712_vm6, %v3177_v47, %v3175_v54 }
 0x7cd   : > { %3747 = vmatprep.subr.bf16.mxu0 %v3746_v43  ;;  %v3180_v61 = vmul.f32 %v3178_v49, %v5782_v1  ;;  %v3181_v44 = vmul.f32 %v3179_v55, %v5785_v20  ;;  %v3198_v20 = vld [vmem:[%s6179_s22] sm:$0xf] }
 0x7ce   : > { %v3183_v25 = vpop.permute.xlu0 %3182  ;;  %3749 = vmatpush1.bf16.msra.mxu0 %v3748_v8 }
 0x7cf   : > { %v3185_v29 = vpop.permute.xlu1 %3184 }
 0x7d0   : > { %v3186_v35 = vsel %vm2734_vm9, %v3183_v25, %v3185_v29  ;;  %v3187_v12 = vsel %vm2734_vm9, %v3185_v29, %v3183_v25  ;;  %v3426_v29 = vld [vmem:[%s6181_s24 + $0x8] sm:$0x3] }
 0x7d1   : > { %v3188_v42 = vmul.f32 %v3186_v35, %v5814_v50  ;;  %v3189_v16 = vmul.f32 %v3187_v12, %v5817_v62  ;;  %v3344_v50 = vld [vmem:[%s6565_s30 + $0xd0] sm:$0xff]  ;;  %v3428_v35 = vld [vmem:[%s6182_s25 + $0x8] sm:$0x3]  ;;  %v3427_v12 = vld [vmem:[%s6182_s25] sm:$0xff] }
 0x7d2   : > { %v3191_v32 = vpop.permute.xlu0 %3190  ;;  %v3774_v62 = vpack.c.bf16 %v3345_v19, %v3344_v50 }
 0x7d3   : > { %v3752_v39 = vpack.c.bf16 %v3188_v42, %v3180_v61  ;;  %v3193_v5 = vpop.permute.xlu1 %3192  ;;  %v3750_v46 = vpack.c.bf16 %v3189_v16, %v3181_v44 }
 0x7d4   : > { %v3195_v31 = vsel %vm2756_vm11, %v3193_v5, %v3191_v32  ;;  %v3194_v45 = vsel %vm2756_vm11, %v3191_v32, %v3193_v5  ;;  %3775 = vmatprep.subr.bf16.mxu1 %v3774_v62 }
 0x7d5   : > { %v3197_v53 = vmul.f32 %v3195_v31, %v5869_v13  ;;  %3751 = vmatprep.subr.bf16.mxu0 %v3750_v46  ;;  %v3196_v1 = vmul.f32 %v3194_v45, %v5866_v56  ;;  %v3328_v56 = vld [vmem:[%s6565_s30 + $0x50] sm:$0xff]  ;;  %v3329_v13 = vld [vmem:[%s6565_s30 + $0x58] sm:$0xff] }
 0x7d6   : > { %3753 = vmatpush1.bf16.msra.mxu0 %v3752_v39  ;;  %v3776_v41 = vpack.c.bf16 %v3329_v13, %v3328_v56 }
 0x7d7   : > { %3218 = vmatprep.subr.mxu0 %v3197_v53 }
 0x7d8   : > { %3777 = vmatpush3.bf16.msra.mxu1 %v3776_v41 }
 0x7d9   : > { %3779 = vmatprep.subr.bf16.mxu1 %v3778_v14 }
 0x7da   : > { %3219 = vmatpush1.msra.mxu0 %v3196_v1 }
 0x7db   : > { %3647 = vmatmul.mubr.msk.f32.vlgmr.msra.gmra.mrb[8].mxu0 %vm1312_vm14, %v3198_v20 }
 0x7dc   : > { %3781 = vmatpush3.bf16.msra.mxu1 %v3780_v63 }
 0x7dd   : > { %3783 = vmatprep.subr.bf16.mxu1 %v3782_v15 }
 0x7e0   : > { %3785 = vmatpush3.bf16.msra.mxu1 %v3784_v60 }
 0x7e3   : > { %v3286_v9 = vpop.permute.xlu0 %3285 }
 0x7e4   : > { %v3303_v4 = vpop.permute.xlu1 %3302 }
 0x7e7   : > { %v3291_v28 = vpop.permute.xlu0 %3290 }
 0x7e8   : > { %v3308_v58 = vpop.permute.xlu1 %3307 }
 0x8ae   : > { %v3268_v3 = vpop.f32.mrb[8].mxu0 }
 0x8af   : > { %v3275_v57 = vrot.slane %v3268_v3, 2  ;;  %v3270_v21 = vpop.f32.mrb[9].mxu0 }
 0x8b0   : > { %v3276_v48 = vrot.slane %v3270_v21, 2 }
 0x8b1   : > { %v3279_v18 = vsel %vm1029_vm10, %v5920_v38, %v3275_v57  ;;  %v3295_v34 = vmul.f32 %v3291_v28, %v3275_v57  ;;  %v3425_v38 = vld [vmem:[%s6181_s24] sm:$0xff] }
 0x8b2   : > { %v3293_v6 = vmul.f32 %v3286_v9, %v3279_v18  ;;  %v3280_v23 = vsel %vm1029_vm10, %v5922_v7, %v3276_v48  ;;  %v3296_v24 = vmul.f32 %v3291_v28, %v3276_v48  ;;  %vm3429_vm10 = vcmask 80896  }
 0x8b3   : > { %v3294_v36 = vmul.f32 %v3286_v9, %v3280_v23  ;;  %v3312_v33 = vadd.f32 %v3308_v58, %v3295_v34  ;;  %3703 = vmatprep.mubr.msk.f32.mxu0 %vm3429_vm10, %v3425_v38 }
 0x8b4   : > { %v3310_v11 = vadd.f32 %v3303_v4, %v3293_v6  ;;  %v3313_v22 = vadd.f32 %v3308_v58, %v3296_v24 }
 0x8b5   : > { %v3311_v52 = vadd.f32 %v3303_v4, %v3294_v36  ;;  %v3316_v54 = vmax.f32 %v3312_v33, 0.0 }
 0x8b6   : > { %v3314_v10 = vmax.f32 %v3310_v11, 0.0  ;;  %v3317_v27 = vmax.f32 %v3313_v22, 0.0 }
 0x8b7   : > { %v3315_v40 = vmax.f32 %v3311_v52, 0.0 }
 0x8b9   : > { %3414 = vmatprep.mubr.f32.mxu1 %v3315_v40 }
 0x8ba   : > { %3415 = vmatmul.mubr.f32.vlgmr.msra.gmra.mrb[2].mxu1 %v3314_v10 }
 0x8bb   : > { %3419 = vmatprep.mubr.f32.mxu1 %v3317_v27 }
 0x8be   : > { %3420 = vmatmul.mubr.f32.gmra.mrb[4].mxu1 %v3316_v54 }
 0x98d   : > { %v3689_v7 = vpop.f32.mrb[2].mxu1 }
 0x98e   : > { %v3690_v8 = vpop.f32.mrb[3].mxu1 }
 0x98f   : > { %v3691_v47 = vadd.f32 %v3690_v8, %v3689_v7 }
 0x991   : > { %v3692_v43 = vpop.f32.mrb[4].mxu1 }
 0x992   : > { %v3693_v49 = vpop.f32.mrb[5].mxu1 }
 0x993   : > { %v3694_v55 = vadd.f32 %v3693_v49, %v3692_v43 }
 0x995   : > { %v3786_v25 = vpack.c.bf16 %v3694_v55, %v3691_v47 }
 0x997   : > { %3788 = vmatprep.subr.msk.bf16.mxu0 %vm3787_vm7, %v3786_v25 }
 0x998   : > { %3791 = vmatpush3.bf16.msk.msra.mxu0 %vm3787_vm7, %v3786_v25 }
 0x99b   : > { %3704 = vmatmul.mubr.msk.f32.vlgmr.msra.gmra.mrb[10].mxu0 %vm3429_vm10, %v3426_v29 }
 0xa6e   : > { %v3705_v61 = vpop.f32.mrb[10].mxu0 }
 0xa6f   : > { %v3511_v44 = vadd.f32 %v3705_v61, %v3428_v35  ;;  %v3505_v42 = vpop.f32.mrb[11].mxu0 }
 0xa70   : > { %v3506_v16 = vadd.f32 %v3505_v42, %v3427_v12 }
 0xa71   : > { %3517 = vst.msk [vmem:[%s791_s6 + $0x8] sm:$0x3] %vm3516_vm12, %v3511_v44 }
 0xa72   : > { %3515 = vst.msk [vmem:[%s791_s6] sm:$0xff] %vm3514_vm15, %v3506_v16 }
 0xa73 PF: > { %s6567_s3 = sld [smem:[#allocation2_spill]] }
 0xa79   : > { %s36_s27 = sadd.s32 1, %s6567_s3  }
 0xa7a   : > { %p33_p4 = scmp.ge.s32.totalorder %s36_s27, 4  }
 0xa7c   :  { %35 = sbr.rel (!%p33_p4) target bundleno = 13 (0xd), region = 208 }

</bundles_post_ra>
